<compile_context>
chip_gen: v7x
topology: tpu7x:2x2x1
jax: 0.10.0
libtpu: 0.0.40
codegen_flags: <defaults>
</compile_context>

<pallas_src>
import jax
import jax.numpy as jnp
from jax import lax
from jax.experimental import pallas as pl
from jax.experimental.pallas import tpu as pltpu

EPS = 1e-5
LANE = 128
VMEM_LIMIT = 32 * 1024 * 1024  # explicit scoped-VMEM budget (safe on v5e/v6e/v7x)


def _round_up(x, m):
    return (x + m - 1) // m * m


def _pick_row_tile(m, target):
    """Largest multiple-of-8 row tile <= target that divides M (or M itself)."""
    if m <= target:
        return m
    t = (min(target, m) // 8) * 8
    while t >= 8:
        if m % t == 0:
            return t
        t -= 8
    return m


def _cparams(*semantics):
    return pltpu.CompilerParams(dimension_semantics=semantics,
                                vmem_limit_bytes=VMEM_LIMIT)


def _fold_bn(s, ss, m, gamma, beta):
    """Fold batch stats (sum, sumsq over m rows) + gamma/beta into scale/shift."""
    mean = s / m
    var = jnp.maximum(ss / m - mean * mean, 0.0)      # biased variance (training-mode BN)
    a = gamma * lax.rsqrt(var + EPS)
    return a, beta - mean * a


# ----------------------------------------------------------------------------- kernels

def _stats_kernel(x_ref, s_ref, ss_ref):
    # per-channel sum / sumsq accumulated across row tiles (reduction axis = grid axis 0)
    @pl.when(pl.program_id(0) == 0)
    def _():
        s_ref[...] = jnp.zeros_like(s_ref)
        ss_ref[...] = jnp.zeros_like(ss_ref)

    x = x_ref[...]
    s_ref[...] += jnp.sum(x, axis=0, keepdims=True)
    ss_ref[...] += jnp.sum(x * x, axis=0, keepdims=True)


def _stage1_kernel(x_ref, a1_ref, c1_ref, w1_ref, y_ref, s_ref, ss_ref):
    # bn1 (pre-folded scale/shift) -> relu -> conv1 (1x1 == matmul, bf16 MXU).
    # Also accumulates per-channel stats of the conv1 output (in f32) for bn2.
    @pl.when(pl.program_id(0) == 0)
    def _():
        s_ref[...] = jnp.zeros_like(s_ref)
        ss_ref[...] = jnp.zeros_like(ss_ref)

    h = jnp.maximum(x_ref[...] * a1_ref[...] + c1_ref[...], 0.0)
    y = jnp.dot(h.astype(jnp.bfloat16), w1_ref[...],
                preferred_element_type=jnp.float32)
    y_ref[...] = y.astype(y_ref.dtype)
    s_ref[...] += jnp.sum(y, axis=0, keepdims=True)
    ss_ref[...] += jnp.sum(y * y, axis=0, keepdims=True)


def _conv3x3_kernel(y1_ref, a2_ref, c2_ref, w2_ref, y2_ref, s_ref, ss_ref, zp_ref):
    # bn2 (pre-folded) -> relu -> 3x3 conv (pad=1, stride=1) as 9 accumulated matmuls
    # over shifted views of a zero-padded VMEM scratch image. Accumulates bn3 stats.
    n = pl.program_id(0)
    H, W, C = y1_ref.shape[1], y1_ref.shape[2], y1_ref.shape[3]
    Co = w2_ref.shape[2]

    @pl.when(n == 0)
    def _():
        s_ref[...] = jnp.zeros_like(s_ref)
        ss_ref[...] = jnp.zeros_like(ss_ref)
        zp_ref[...] = jnp.zeros_like(zp_ref)   # zero the halo once; it is never overwritten

    z = jnp.maximum(y1_ref[0].astype(jnp.float32) * a2_ref[...] + c2_ref[...], 0.0)
    zb = z.astype(zp_ref.dtype)
    zp_ref[1:H + 1, 1:W + 1, :] = zb           # zero-pad AFTER bn+relu (Conv2d semantics)

    # center tap (kh=1,kw=1 -> idx 4) straight from registers: no VMEM round-trip
    acc = jnp.dot(zb.reshape(H * W, C), w2_ref[4], preferred_element_type=jnp.float32)
    for idx in (0, 1, 2, 3, 5, 6, 7, 8):
        ky, kx = idx // 3, idx % 3
        patch = zp_ref[ky:ky + H, kx:kx + W, :].reshape(H * W, C)
        acc += jnp.dot(patch, w2_ref[idx], preferred_element_type=jnp.float32)

    y2_ref[0] = acc.astype(y2_ref.dtype)
    s_ref[...] += jnp.sum(acc, axis=0, keepdims=True)
    ss_ref[...] += jnp.sum(acc * acc, axis=0, keepdims=True)


def _stage2b_kernel(y2_ref, a3_ref, c3_ref, w3_ref, res_ref, o_ref):
    # bn3 (pre-folded) -> relu -> conv3 (1x1 matmul, bf16) -> + identity residual (f32)
    h = jnp.maximum(y2_ref[...].astype(jnp.float32) * a3_ref[...] + c3_ref[...], 0.0)
    o_ref[...] = jnp.dot(h.astype(jnp.bfloat16), w3_ref[...],
                         preferred_element_type=jnp.float32) + res_ref[...]


# ---------------------------------------------------------------------- pallas wrappers

def _channel_stats(x2d, tm):
    M, C = x2d.shape
    return pl.pallas_call(
        _stats_kernel,
        out_shape=(jax.ShapeDtypeStruct((1, C), jnp.float32),
                   jax.ShapeDtypeStruct((1, C), jnp.float32)),
        grid=(M // tm,),
        in_specs=[pl.BlockSpec((tm, C), lambda i: (i, 0))],
        out_specs=(pl.BlockSpec((1, C), lambda i: (0, 0)),
                   pl.BlockSpec((1, C), lambda i: (0, 0))),
        compiler_params=_cparams("arbitrary"),
    )(x2d)


def _stage1(x2d, a1, c1, w1, tm):
    M, Cin = x2d.shape
    P = w1.shape[1]
    return pl.pallas_call(
        _stage1_kernel,
        out_shape=(jax.ShapeDtypeStruct((M, P), jnp.bfloat16),
                   jax.ShapeDtypeStruct((1, P), jnp.float32),
                   jax.ShapeDtypeStruct((1, P), jnp.float32)),
        grid=(M // tm,),
        in_specs=[pl.BlockSpec((tm, Cin), lambda i: (i, 0)),
                  pl.BlockSpec((1, Cin), lambda i: (0, 0)),
                  pl.BlockSpec((1, Cin), lambda i: (0, 0)),
                  pl.BlockSpec((Cin, P), lambda i: (0, 0))],   # weight resident in VMEM
        out_specs=(pl.BlockSpec((tm, P), lambda i: (i, 0)),
                   pl.BlockSpec((1, P), lambda i: (0, 0)),
                   pl.BlockSpec((1, P), lambda i: (0, 0))),
        compiler_params=_cparams("arbitrary"),
    )(x2d, a1, c1, w1)


def _conv3x3(y1_img, a2, c2, w2):
    N, H, W, P = y1_img.shape
    Co = w2.shape[2]
    return pl.pallas_call(
        _conv3x3_kernel,
        out_shape=(jax.ShapeDtypeStruct((N, H * W, Co), jnp.bfloat16),
                   jax.ShapeDtypeStruct((1, Co), jnp.float32),
                   jax.ShapeDtypeStruct((1, Co), jnp.float32)),
        grid=(N,),
        in_specs=[pl.BlockSpec((1, H, W, P), lambda n: (n, 0, 0, 0)),
                  pl.BlockSpec((1, P), lambda n: (0, 0)),
                  pl.BlockSpec((1, P), lambda n: (0, 0)),
                  pl.BlockSpec((9, P, Co), lambda n: (0, 0, 0))],
        out_specs=(pl.BlockSpec((1, H * W, Co), lambda n: (n, 0, 0)),
                   pl.BlockSpec((1, Co), lambda n: (0, 0)),
                   pl.BlockSpec((1, Co), lambda n: (0, 0))),
        scratch_shapes=[pltpu.VMEM((H + 2, W + 2, P), jnp.bfloat16)],
        compiler_params=_cparams("arbitrary"),
    )(y1_img, a2, c2, w2)


def _stage2b(y2, a3, c3, w3, res, tm):
    M, P = y2.shape
    Co = w3.shape[1]
    return pl.pallas_call(
        _stage2b_kernel,
        out_shape=jax.ShapeDtypeStruct((M, Co), jnp.float32),
        grid=(M // tm,),
        in_specs=[pl.BlockSpec((tm, P), lambda i: (i, 0)),
                  pl.BlockSpec((1, P), lambda i: (0, 0)),
                  pl.BlockSpec((1, P), lambda i: (0, 0)),
                  pl.BlockSpec((P, Co), lambda i: (0, 0)),
                  pl.BlockSpec((tm, Co), lambda i: (i, 0))],
        out_specs=pl.BlockSpec((tm, Co), lambda i: (i, 0)),
        compiler_params=_cparams("parallel"),   # no cross-tile state -> megacore-shardable
    )(y2, a3, c3, w3, res)


# ---------------------------------------------------------------------------- forward

def preact_bottleneck_forward(x_nchw, params, stride=1, row_tile=512):
    # TODO(synk): downsample is None in this configuration -> identity residual only;
    #             stride>1 / downsample path not implemented.
    assert stride == 1, "only stride=1 (downsample=None) is supported"
    N, Cin, H, W = x_nchw.shape
    planes = params["w1"].shape[0]
    Cout = params["w3"].shape[0]
    assert Cout == Cin and Cout == 4 * planes, "identity residual requires inplanes == planes*4"

    CinP = _round_up(Cin, LANE)
    PP = _round_up(planes, LANE)
    CoutP = _round_up(Cout, LANE)
    assert CinP == CoutP
    M = N * H * W
    tm = _pick_row_tile(M, row_tile)
    f32, bf16 = jnp.float32, jnp.bfloat16

    # activations: NHWC, flattened rows, channels zero-padded to the lane width
    x2d = jnp.transpose(x_nchw, (0, 2, 3, 1)).reshape(M, Cin).astype(f32)
    x2d = jnp.pad(x2d, ((0, 0), (0, CinP - Cin)))

    # weights: lane-padded, bf16 (cast once, kept resident in VMEM via constant index_maps)
    w1 = jnp.pad(params["w1"][:, :, 0, 0].T, ((0, CinP - Cin), (0, PP - planes))).astype(bf16)
    w2 = jnp.transpose(params["w2"], (2, 3, 1, 0)).reshape(9, planes, planes)
    w2 = jnp.pad(w2, ((0, 0), (0, PP - planes), (0, PP - planes))).astype(bf16)
    w3 = jnp.pad(params["w3"][:, :, 0, 0].T, ((0, PP - planes), (0, CoutP - Cout))).astype(bf16)

    def pad_vec(v, c):
        v = v.reshape(1, -1).astype(f32)
        return jnp.pad(v, ((0, 0), (0, c - v.shape[1])))

    g1, b1 = pad_vec(params["g1"], CinP), pad_vec(params["b1"], CinP)
    g2, b2 = pad_vec(params["g2"], PP), pad_vec(params["b2"], PP)
    g3, b3 = pad_vec(params["g3"], PP), pad_vec(params["b3"], PP)

    # pass 1: bn1 statistics over x
    s1, ss1 = _channel_stats(x2d, tm)
    a1, c1 = _fold_bn(s1, ss1, M, g1, b1)

    # pass 2: bn1+relu -> conv1 (1x1), fused bn2-stat accumulation
    y1, s2, ss2 = _stage1(x2d, a1, c1, w1, tm)
    a2, c2 = _fold_bn(s2, ss2, M, g2, b2)

    # pass 3: bn2+relu -> conv2 (3x3, pad=1), fused bn3-stat accumulation
    y2, s3, ss3 = _conv3x3(y1.reshape(N, H, W, PP), a2, c2, w2)
    a3, c3 = _fold_bn(s3, ss3, M, g3, b3)

    # pass 4: bn3+relu -> conv3 (1x1) -> + identity residual
    out2d = _stage2b(y2.reshape(M, PP), a3, c3, w3, x2d, tm)

    out = out2d[:, :Cout].reshape(N, H, W, Cout)
    return jnp.transpose(out, (0, 3, 1, 2))


# ---------------------------------------------------------------- params & f32 reference

def init_params(key, inplanes, planes):
    """Deterministic synthetic parameters in torch layout (OIHW conv weights, (C,) BN params)."""
    ks = jax.random.split(key, 9)
    f32 = jnp.float32
    return dict(
        w1=0.1 * jax.random.normal(ks[0], (planes, inplanes, 1, 1), f32),
        w2=0.1 * jax.random.normal(ks[1], (planes, planes, 3, 3), f32),
        w3=0.1 * jax.random.normal(ks[2], (planes * 4, planes, 1, 1), f32),
        g1=1.0 + 0.1 * jax.random.normal(ks[3], (inplanes,), f32),
        b1=0.1 * jax.random.normal(ks[4], (inplanes,), f32),
        g2=1.0 + 0.1 * jax.random.normal(ks[5], (planes,), f32),
        b2=0.1 * jax.random.normal(ks[6], (planes,), f32),
        g3=1.0 + 0.1 * jax.random.normal(ks[7], (planes,), f32),
        b3=0.1 * jax.random.normal(ks[8], (planes,), f32),
    )


def reference_forward(x, p):
    """Independent pure-JAX NCHW f32 reference mirroring the PyTorch forward (training-mode BN)."""
    def bn(h, g, b):
        mean = jnp.mean(h, axis=(0, 2, 3), keepdims=True)
        var = jnp.mean(jnp.square(h - mean), axis=(0, 2, 3), keepdims=True)
        return (h - mean) * lax.rsqrt(var + EPS) * g.reshape(1, -1, 1, 1) + b.reshape(1, -1, 1, 1)

    dn = ("NCHW", "OIHW", "NCHW")
    out = jnp.maximum(bn(x, p["g1"], p["b1"]), 0.0)
    out = lax.conv_general_dilated(out, p["w1"], (1, 1), "VALID", dimension_numbers=dn)
    out = jnp.maximum(bn(out, p["g2"], p["b2"]), 0.0)
    out = lax.conv_general_dilated(out, p["w2"], (1, 1), ((1, 1), (1, 1)), dimension_numbers=dn)
    out = jnp.maximum(bn(out, p["g3"], p["b3"]), 0.0)
    out = lax.conv_general_dilated(out, p["w3"], (1, 1), "VALID", dimension_numbers=dn)
    return out + x


if __name__ == "__main__":
    # inplanes == planes * expansion so the identity residual matches (downsample=None, stride=1)
    N, inplanes, planes, H, W = 2, 16, 4, 16, 16
    key = jax.random.PRNGKey(0)
    kx_, kp_ = jax.random.split(key)
    x = jax.random.normal(kx_, (N, inplanes, H, W), jnp.float32)
    params = init_params(kp_, inplanes, planes)

    # row_tile=128 -> 4 row tiles over M=512: exercises the tiled stats-accumulation path.
    fwd = jax.jit(lambda xx: preact_bottleneck_forward(xx, params, stride=1, row_tile=128))
    out = jax.block_until_ready(fwd(x))

    assert out.shape == (N, planes * 4, H, W), out.shape
    ref = reference_forward(x, params)
    max_err = float(jnp.max(jnp.abs(out - ref)))
    # bf16 MXU operands (f32 accumulation) bound the achievable accuracy vs. the pure-f32 reference.
    assert jnp.allclose(out, ref, rtol=2e-2, atol=2e-2), f"max abs err {max_err}"

    print("KERNEL_OK")
</pallas_src>

<mosaic_0001>
module attributes {stable_mosaic.version = 11 : i64} {
  func.func @_stats_kernel(%arg0: i32, %arg1: memref<128x128xf32, #tpu.memory_space<vmem>>, %arg2: memref<1x128xf32, #tpu.memory_space<vmem>>, %arg3: memref<1x128xf32, #tpu.memory_space<vmem>>) attributes {dimension_semantics = [#tpu.dimension_semantics<arbitrary>], iteration_bounds = array<i64: 4>, scalar_prefetch = 0 : i64, scratch_operands = 0 : i64, tpu.core_type = #tpu.core_type<tc>, window_params = [{transform_indices = @transform_0, window_bounds = array<i64: 128, 128>}, {pipeline_mode = #tpu.pipeline_mode<synchronous>, transform_indices = @transform_1, window_bounds = array<i64: 1, 128>}, {pipeline_mode = #tpu.pipeline_mode<synchronous>, transform_indices = @transform_2, window_bounds = array<i64: 1, 128>}]} {
    %c0_i32 = arith.constant 0 : i32
    %0 = arith.cmpi eq, %arg0, %c0_i32 : i32
    %1 = arith.extui %0 : i1 to i32
    %c0_i32_0 = arith.constant 0 : i32
    %2 = arith.cmpi ne, %1, %c0_i32_0 : i32
    scf.if %2 {
      %cst_11 = arith.constant 0.000000e+00 : f32
      %15 = vector.broadcast %cst_11 : f32 to vector<1x128xf32>
      %c0_12 = arith.constant 0 : index
      %c0_13 = arith.constant 0 : index
      %16 = vector.load %arg2[%c0_12, %c0_13] : memref<1x128xf32, #tpu.memory_space<vmem>>, vector<1x128xf32>
      tpu.vector_store %arg2[%c0_12, %c0_13], %15 {strides = array<i32>} : memref<1x128xf32, #tpu.memory_space<vmem>>, vector<1x128xf32>,
      %cst_14 = arith.constant 0.000000e+00 : f32
      %17 = vector.broadcast %cst_14 : f32 to vector<1x128xf32>
      %c0_15 = arith.constant 0 : index
      %c0_16 = arith.constant 0 : index
      %18 = vector.load %arg3[%c0_15, %c0_16] : memref<1x128xf32, #tpu.memory_space<vmem>>, vector<1x128xf32>
      tpu.vector_store %arg3[%c0_15, %c0_16], %17 {strides = array<i32>} : memref<1x128xf32, #tpu.memory_space<vmem>>, vector<1x128xf32>,
    } else {
    }
    %c0 = arith.constant 0 : index
    %c0_1 = arith.constant 0 : index
    %3 = vector.load %arg1[%c0, %c0_1] : memref<128x128xf32, #tpu.memory_space<vmem>>, vector<128x128xf32>
    %c0_2 = arith.constant 0 : index
    %c0_3 = arith.constant 0 : index
    %4 = vector.load %arg2[%c0_2, %c0_3] : memref<1x128xf32, #tpu.memory_space<vmem>>, vector<1x128xf32>
    %cst = arith.constant dense<0.000000e+00> : vector<128xf32>
    %5 = vector.multi_reduction <add>, %3, %cst [0] : vector<128x128xf32> to vector<128xf32>
    %6 = vector.shape_cast %5 : vector<128xf32> to vector<1x128xf32>
    %7 = arith.addf %4, %6 : vector<1x128xf32>
    %c0_4 = arith.constant 0 : index
    %c0_5 = arith.constant 0 : index
    %8 = vector.load %arg2[%c0_4, %c0_5] : memref<1x128xf32, #tpu.memory_space<vmem>>, vector<1x128xf32>
    tpu.vector_store %arg2[%c0_4, %c0_5], %7 {strides = array<i32>} : memref<1x128xf32, #tpu.memory_space<vmem>>, vector<1x128xf32>,
    %c0_6 = arith.constant 0 : index
    %c0_7 = arith.constant 0 : index
    %9 = vector.load %arg3[%c0_6, %c0_7] : memref<1x128xf32, #tpu.memory_space<vmem>>, vector<1x128xf32>
    %10 = arith.mulf %3, %3 : vector<128x128xf32>
    %cst_8 = arith.constant dense<0.000000e+00> : vector<128xf32>
    %11 = vector.multi_reduction <add>, %10, %cst_8 [0] : vector<128x128xf32> to vector<128xf32>
    %12 = vector.shape_cast %11 : vector<128xf32> to vector<1x128xf32>
    %13 = arith.addf %9, %12 : vector<1x128xf32>
    %c0_9 = arith.constant 0 : index
    %c0_10 = arith.constant 0 : index
    %14 = vector.load %arg3[%c0_9, %c0_10] : memref<1x128xf32, #tpu.memory_space<vmem>>, vector<1x128xf32>
    tpu.vector_store %arg3[%c0_9, %c0_10], %13 {strides = array<i32>} : memref<1x128xf32, #tpu.memory_space<vmem>>, vector<1x128xf32>,
    return
  }
  func.func @transform_0(%arg0: i32) -> (i32, i32) {
    %c0_i32 = arith.constant 0 : i32
    %c0_i32_0 = arith.constant 0 : i32
    return %arg0, %c0_i32 : i32, i32
  }
  func.func @transform_1(%arg0: i32) -> (i32, i32) {
    %c0_i32 = arith.constant 0 : i32
    %c0_i32_0 = arith.constant 0 : i32
    %c0_i32_1 = arith.constant 0 : i32
    return %c0_i32, %c0_i32_0 : i32, i32
  }
  func.func @transform_2(%arg0: i32) -> (i32, i32) {
    %c0_i32 = arith.constant 0 : i32
    %c0_i32_0 = arith.constant 0 : i32
    %c0_i32_1 = arith.constant 0 : i32
    return %c0_i32, %c0_i32_0 : i32, i32
  }
}

module attributes {stable_mosaic.version = 11 : i64} {
  func.func @_stage1_kernel(%arg0: i32, %arg1: memref<128x128xf32, #tpu.memory_space<vmem>>, %arg2: memref<1x128xf32, #tpu.memory_space<vmem>>, %arg3: memref<1x128xf32, #tpu.memory_space<vmem>>, %arg4: memref<128x128xbf16, #tpu.memory_space<vmem>>, %arg5: memref<128x128xbf16, #tpu.memory_space<vmem>>, %arg6: memref<1x128xf32, #tpu.memory_space<vmem>>, %arg7: memref<1x128xf32, #tpu.memory_space<vmem>>) attributes {dimension_semantics = [#tpu.dimension_semantics<arbitrary>], iteration_bounds = array<i64: 4>, scalar_prefetch = 0 : i64, scratch_operands = 0 : i64, tpu.core_type = #tpu.core_type<tc>, window_params = [{transform_indices = @transform_0, window_bounds = array<i64: 128, 128>}, {pipeline_mode = #tpu.pipeline_mode<synchronous>, transform_indices = @transform_1, window_bounds = array<i64: 1, 128>}, {pipeline_mode = #tpu.pipeline_mode<synchronous>, transform_indices = @transform_2, window_bounds = array<i64: 1, 128>}, {pipeline_mode = #tpu.pipeline_mode<synchronous>, transform_indices = @transform_3, window_bounds = array<i64: 128, 128>}, {transform_indices = @transform_4, window_bounds = array<i64: 128, 128>}, {pipeline_mode = #tpu.pipeline_mode<synchronous>, transform_indices = @transform_5, window_bounds = array<i64: 1, 128>}, {pipeline_mode = #tpu.pipeline_mode<synchronous>, transform_indices = @transform_6, window_bounds = array<i64: 1, 128>}]} {
    %c0_i32 = arith.constant 0 : i32
    %0 = arith.cmpi eq, %arg0, %c0_i32 : i32
    %1 = arith.extui %0 : i1 to i32
    %c0_i32_0 = arith.constant 0 : i32
    %2 = arith.cmpi ne, %1, %c0_i32_0 : i32
    scf.if %2 {
      %cst_21 = arith.constant 0.000000e+00 : f32
      %28 = vector.broadcast %cst_21 : f32 to vector<1x128xf32>
      %c0_22 = arith.constant 0 : index
      %c0_23 = arith.constant 0 : index
      %29 = vector.load %arg6[%c0_22, %c0_23] : memref<1x128xf32, #tpu.memory_space<vmem>>, vector<1x128xf32>
      tpu.vector_store %arg6[%c0_22, %c0_23], %28 {strides = array<i32>} : memref<1x128xf32, #tpu.memory_space<vmem>>, vector<1x128xf32>,
      %cst_24 = arith.constant 0.000000e+00 : f32
      %30 = vector.broadcast %cst_24 : f32 to vector<1x128xf32>
      %c0_25 = arith.constant 0 : index
      %c0_26 = arith.constant 0 : index
      %31 = vector.load %arg7[%c0_25, %c0_26] : memref<1x128xf32, #tpu.memory_space<vmem>>, vector<1x128xf32>
      tpu.vector_store %arg7[%c0_25, %c0_26], %30 {strides = array<i32>} : memref<1x128xf32, #tpu.memory_space<vmem>>, vector<1x128xf32>,
    } else {
    }
    %c0 = arith.constant 0 : index
    %c0_1 = arith.constant 0 : index
    %3 = vector.load %arg1[%c0, %c0_1] : memref<128x128xf32, #tpu.memory_space<vmem>>, vector<128x128xf32>
    %c0_2 = arith.constant 0 : index
    %c0_3 = arith.constant 0 : index
    %4 = vector.load %arg2[%c0_2, %c0_3] : memref<1x128xf32, #tpu.memory_space<vmem>>, vector<1x128xf32>
    %5 = vector.broadcast %4 : vector<1x128xf32> to vector<128x128xf32>
    %6 = arith.mulf %3, %5 : vector<128x128xf32>
    %c0_4 = arith.constant 0 : index
    %c0_5 = arith.constant 0 : index
    %7 = vector.load %arg3[%c0_4, %c0_5] : memref<1x128xf32, #tpu.memory_space<vmem>>, vector<1x128xf32>
    %8 = vector.broadcast %7 : vector<1x128xf32> to vector<128x128xf32>
    %9 = arith.addf %6, %8 : vector<128x128xf32>
    %cst = arith.constant 0.000000e+00 : f32
    %10 = vector.broadcast %cst : f32 to vector<128x128xf32>
    %11 = arith.maximumf %9, %10 : vector<128x128xf32>
    %12 = arith.truncf %11 : vector<128x128xf32> to vector<128x128xbf16>
    %c0_6 = arith.constant 0 : index
    %c0_7 = arith.constant 0 : index
    %13 = vector.load %arg4[%c0_6, %c0_7] : memref<128x128xbf16, #tpu.memory_space<vmem>>, vector<128x128xbf16>
    %cst_8 = arith.constant dense<0.000000e+00> : vector<128x128xf32>
    %14 = tpu.matmul %12, %13, %cst_8 {dimension_numbers = #tpu.dot_dimension_numbers<[1], [0], [0], [1], [0, 0, 1, 1], [], []>} : vector<128x128xbf16>, vector<128x128xbf16>, vector<128x128xf32> -> vector<128x128xf32>
    %15 = arith.truncf %14 : vector<128x128xf32> to vector<128x128xbf16>
    %c0_9 = arith.constant 0 : index
    %c0_10 = arith.constant 0 : index
    %16 = vector.load %arg5[%c0_9, %c0_10] : memref<128x128xbf16, #tpu.memory_space<vmem>>, vector<128x128xbf16>
    tpu.vector_store %arg5[%c0_9, %c0_10], %15 {strides = array<i32>} : memref<128x128xbf16, #tpu.memory_space<vmem>>, vector<128x128xbf16>,
    %c0_11 = arith.constant 0 : index
    %c0_12 = arith.constant 0 : index
    %17 = vector.load %arg6[%c0_11, %c0_12] : memref<1x128xf32, #tpu.memory_space<vmem>>, vector<1x128xf32>
    %cst_13 = arith.constant dense<0.000000e+00> : vector<128xf32>
    %18 = vector.multi_reduction <add>, %14, %cst_13 [0] : vector<128x128xf32> to vector<128xf32>
    %19 = vector.shape_cast %18 : vector<128xf32> to vector<1x128xf32>
    %20 = arith.addf %17, %19 : vector<1x128xf32>
    %c0_14 = arith.constant 0 : index
    %c0_15 = arith.constant 0 : index
    %21 = vector.load %arg6[%c0_14, %c0_15] : memref<1x128xf32, #tpu.memory_space<vmem>>, vector<1x128xf32>
    tpu.vector_store %arg6[%c0_14, %c0_15], %20 {strides = array<i32>} : memref<1x128xf32, #tpu.memory_space<vmem>>, vector<1x128xf32>,
    %c0_16 = arith.constant 0 : index
    %c0_17 = arith.constant 0 : index
    %22 = vector.load %arg7[%c0_16, %c0_17] : memref<1x128xf32, #tpu.memory_space<vmem>>, vector<1x128xf32>
    %23 = arith.mulf %14, %14 : vector<128x128xf32>
    %cst_18 = arith.constant dense<0.000000e+00> : vector<128xf32>
    %24 = vector.multi_reduction <add>, %23, %cst_18 [0] : vector<128x128xf32> to vector<128xf32>
    %25 = vector.shape_cast %24 : vector<128xf32> to vector<1x128xf32>
    %26 = arith.addf %22, %25 : vector<1x128xf32>
    %c0_19 = arith.constant 0 : index
    %c0_20 = arith.constant 0 : index
    %27 = vector.load %arg7[%c0_19, %c0_20] : memref<1x128xf32, #tpu.memory_space<vmem>>, vector<1x128xf32>
    tpu.vector_store %arg7[%c0_19, %c0_20], %26 {strides = array<i32>} : memref<1x128xf32, #tpu.memory_space<vmem>>, vector<1x128xf32>,
    return
  }
  func.func @transform_0(%arg0: i32) -> (i32, i32) {
    %c0_i32 = arith.constant 0 : i32
    %c0_i32_0 = arith.constant 0 : i32
    return %arg0, %c0_i32 : i32, i32
  }
  func.func @transform_1(%arg0: i32) -> (i32, i32) {
    %c0_i32 = arith.constant 0 : i32
    %c0_i32_0 = arith.constant 0 : i32
    %c0_i32_1 = arith.constant 0 : i32
    return %c0_i32, %c0_i32_0 : i32, i32
  }
  func.func @transform_2(%arg0: i32) -> (i32, i32) {
    %c0_i32 = arith.constant 0 : i32
    %c0_i32_0 = arith.constant 0 : i32
    %c0_i32_1 = arith.constant 0 : i32
    return %c0_i32, %c0_i32_0 : i32, i32
  }
  func.func @transform_3(%arg0: i32) -> (i32, i32) {
    %c0_i32 = arith.constant 0 : i32
    %c0_i32_0 = arith.constant 0 : i32
    %c0_i32_1 = arith.constant 0 : i32
    return %c0_i32, %c0_i32_0 : i32, i32
  }
  func.func @transform_4(%arg0: i32) -> (i32, i32) {
    %c0_i32 = arith.constant 0 : i32
    %c0_i32_0 = arith.constant 0 : i32
    return %arg0, %c0_i32 : i32, i32
  }
  func.func @transform_5(%arg0: i32) -> (i32, i32) {
    %c0_i32 = arith.constant 0 : i32
    %c0_i32_0 = arith.constant 0 : i32
    %c0_i32_1 = arith.constant 0 : i32
    return %c0_i32, %c0_i32_0 : i32, i32
  }
  func.func @transform_6(%arg0: i32) -> (i32, i32) {
    %c0_i32 = arith.constant 0 : i32
    %c0_i32_0 = arith.constant 0 : i32
    %c0_i32_1 = arith.constant 0 : i32
    return %c0_i32, %c0_i32_0 : i32, i32
  }
}

module attributes {stable_mosaic.version = 11 : i64} {
  func.func @_conv3x3_kernel(%arg0: i32, %arg1: memref<1x16x16x128xbf16, #tpu.memory_space<vmem>>, %arg2: memref<1x128xf32, #tpu.memory_space<vmem>>, %arg3: memref<1x128xf32, #tpu.memory_space<vmem>>, %arg4: memref<9x128x128xbf16, #tpu.memory_space<vmem>>, %arg5: memref<1x256x128xbf16, #tpu.memory_space<vmem>>, %arg6: memref<1x128xf32, #tpu.memory_space<vmem>>, %arg7: memref<1x128xf32, #tpu.memory_space<vmem>>, %arg8: memref<18x18x128xbf16, #tpu.memory_space<vmem>>) attributes {dimension_semantics = [#tpu.dimension_semantics<arbitrary>], iteration_bounds = array<i64: 2>, scalar_prefetch = 0 : i64, scratch_operands = 1 : i64, tpu.core_type = #tpu.core_type<tc>, window_params = [{transform_indices = @transform_0, window_bounds = array<i64: 1, 16, 16, 128>}, {pipeline_mode = #tpu.pipeline_mode<synchronous>, transform_indices = @transform_1, window_bounds = array<i64: 1, 128>}, {pipeline_mode = #tpu.pipeline_mode<synchronous>, transform_indices = @transform_2, window_bounds = array<i64: 1, 128>}, {pipeline_mode = #tpu.pipeline_mode<synchronous>, transform_indices = @transform_3, window_bounds = array<i64: 9, 128, 128>}, {transform_indices = @transform_4, window_bounds = array<i64: 1, 256, 128>}, {pipeline_mode = #tpu.pipeline_mode<synchronous>, transform_indices = @transform_5, window_bounds = array<i64: 1, 128>}, {pipeline_mode = #tpu.pipeline_mode<synchronous>, transform_indices = @transform_6, window_bounds = array<i64: 1, 128>}]} {
    %c0_i32 = arith.constant 0 : i32
    %0 = arith.cmpi eq, %arg0, %c0_i32 : i32
    %1 = arith.extui %0 : i1 to i32
    %c0_i32_0 = arith.constant 0 : i32
    %2 = arith.cmpi ne, %1, %c0_i32_0 : i32
    scf.if %2 {
      %cst_76 = arith.constant 0.000000e+00 : f32
      %85 = vector.broadcast %cst_76 : f32 to vector<1x128xf32>
      %c0_77 = arith.constant 0 : index
      %c0_78 = arith.constant 0 : index
      %86 = vector.load %arg6[%c0_77, %c0_78] : memref<1x128xf32, #tpu.memory_space<vmem>>, vector<1x128xf32>
      tpu.vector_store %arg6[%c0_77, %c0_78], %85 {strides = array<i32>} : memref<1x128xf32, #tpu.memory_space<vmem>>, vector<1x128xf32>,
      %cst_79 = arith.constant 0.000000e+00 : f32
      %87 = vector.broadcast %cst_79 : f32 to vector<1x128xf32>
      %c0_80 = arith.constant 0 : index
      %c0_81 = arith.constant 0 : index
      %88 = vector.load %arg7[%c0_80, %c0_81] : memref<1x128xf32, #tpu.memory_space<vmem>>, vector<1x128xf32>
      tpu.vector_store %arg7[%c0_80, %c0_81], %87 {strides = array<i32>} : memref<1x128xf32, #tpu.memory_space<vmem>>, vector<1x128xf32>,
      %cst_82 = arith.constant 0.000000e+00 : bf16
      %89 = vector.broadcast %cst_82 : bf16 to vector<18x18x128xbf16>
      %c0_83 = arith.constant 0 : index
      %c0_84 = arith.constant 0 : index
      %c0_85 = arith.constant 0 : index
      %90 = vector.load %arg8[%c0_83, %c0_84, %c0_85] : memref<18x18x128xbf16, #tpu.memory_space<vmem>>, vector<18x18x128xbf16>
      tpu.vector_store %arg8[%c0_83, %c0_84, %c0_85], %89 {strides = array<i32>} : memref<18x18x128xbf16, #tpu.memory_space<vmem>>, vector<18x18x128xbf16>,
    } else {
    }
    %c0 = arith.constant 0 : index
    %c0_1 = arith.constant 0 : index
    %c0_2 = arith.constant 0 : index
    %c0_3 = arith.constant 0 : index
    %3 = vector.load %arg1[%c0, %c0_1, %c0_2, %c0_3] : memref<1x16x16x128xbf16, #tpu.memory_space<vmem>>, vector<1x16x16x128xbf16>
    %4 = vector.shape_cast %3 : vector<1x16x16x128xbf16> to vector<16x16x128xbf16>
    %5 = arith.extf %4 : vector<16x16x128xbf16> to vector<16x16x128xf32>
    %c0_4 = arith.constant 0 : index
    %c0_5 = arith.constant 0 : index
    %6 = vector.load %arg2[%c0_4, %c0_5] : memref<1x128xf32, #tpu.memory_space<vmem>>, vector<1x128xf32>
    %7 = vector.shape_cast %6 : vector<1x128xf32> to vector<1x1x128xf32>
    %8 = vector.broadcast %7 : vector<1x1x128xf32> to vector<16x16x128xf32>
    %9 = arith.mulf %5, %8 : vector<16x16x128xf32>
    %c0_6 = arith.constant 0 : index
    %c0_7 = arith.constant 0 : index
    %10 = vector.load %arg3[%c0_6, %c0_7] : memref<1x128xf32, #tpu.memory_space<vmem>>, vector<1x128xf32>
    %11 = vector.shape_cast %10 : vector<1x128xf32> to vector<1x1x128xf32>
    %12 = vector.broadcast %11 : vector<1x1x128xf32> to vector<16x16x128xf32>
    %13 = arith.addf %9, %12 : vector<16x16x128xf32>
    %cst = arith.constant 0.000000e+00 : f32
    %14 = vector.broadcast %cst : f32 to vector<16x16x128xf32>
    %15 = arith.maximumf %13, %14 : vector<16x16x128xf32>
    %16 = arith.truncf %15 : vector<16x16x128xf32> to vector<16x16x128xbf16>
    %c1 = arith.constant 1 : index
    %c1_8 = arith.constant 1 : index
    %c0_9 = arith.constant 0 : index
    %17 = vector.load %arg8[%c1, %c1_8, %c0_9] : memref<18x18x128xbf16, #tpu.memory_space<vmem>>, vector<16x16x128xbf16>
    tpu.vector_store %arg8[%c1, %c1_8, %c0_9], %16 {strides = array<i32>} : memref<18x18x128xbf16, #tpu.memory_space<vmem>>, vector<16x16x128xbf16>,
    %18 = vector.shape_cast %16 : vector<16x16x128xbf16> to vector<256x128xbf16>
    %c4 = arith.constant 4 : index
    %c0_10 = arith.constant 0 : index
    %c0_11 = arith.constant 0 : index
    %19 = vector.load %arg4[%c4, %c0_10, %c0_11] : memref<9x128x128xbf16, #tpu.memory_space<vmem>>, vector<1x128x128xbf16>
    %20 = vector.shape_cast %19 : vector<1x128x128xbf16> to vector<128x128xbf16>
    %cst_12 = arith.constant dense<0.000000e+00> : vector<256x128xf32>
    %21 = tpu.matmul %18, %20, %cst_12 {dimension_numbers = #tpu.dot_dimension_numbers<[1], [0], [0], [1], [0, 0, 1, 1], [], []>} : vector<256x128xbf16>, vector<128x128xbf16>, vector<256x128xf32> -> vector<256x128xf32>
    %c0_13 = arith.constant 0 : index
    %c0_14 = arith.constant 0 : index
    %c0_15 = arith.constant 0 : index
    %22 = vector.load %arg8[%c0_13, %c0_14, %c0_15] : memref<18x18x128xbf16, #tpu.memory_space<vmem>>, vector<16x16x128xbf16>
    %23 = vector.shape_cast %22 : vector<16x16x128xbf16> to vector<256x128xbf16>
    %c0_16 = arith.constant 0 : index
    %c0_17 = arith.constant 0 : index
    %c0_18 = arith.constant 0 : index
    %24 = vector.load %arg4[%c0_16, %c0_17, %c0_18] : memref<9x128x128xbf16, #tpu.memory_space<vmem>>, vector<1x128x128xbf16>
    %25 = vector.shape_cast %24 : vector<1x128x128xbf16> to vector<128x128xbf16>
    %cst_19 = arith.constant dense<0.000000e+00> : vector<256x128xf32>
    %26 = tpu.matmul %23, %25, %cst_19 {dimension_numbers = #tpu.dot_dimension_numbers<[1], [0], [0], [1], [0, 0, 1, 1], [], []>} : vector<256x128xbf16>, vector<128x128xbf16>, vector<256x128xf32> -> vector<256x128xf32>
    %27 = arith.addf %21, %26 : vector<256x128xf32>
    %c0_20 = arith.constant 0 : index
    %c1_21 = arith.constant 1 : index
    %c0_22 = arith.constant 0 : index
    %28 = vector.load %arg8[%c0_20, %c1_21, %c0_22] : memref<18x18x128xbf16, #tpu.memory_space<vmem>>, vector<16x16x128xbf16>
    %29 = vector.shape_cast %28 : vector<16x16x128xbf16> to vector<256x128xbf16>
    %c1_23 = arith.constant 1 : index
    %c0_24 = arith.constant 0 : index
    %c0_25 = arith.constant 0 : index
    %30 = vector.load %arg4[%c1_23, %c0_24, %c0_25] : memref<9x128x128xbf16, #tpu.memory_space<vmem>>, vector<1x128x128xbf16>
    %31 = vector.shape_cast %30 : vector<1x128x128xbf16> to vector<128x128xbf16>
    %cst_26 = arith.constant dense<0.000000e+00> : vector<256x128xf32>
    %32 = tpu.matmul %29, %31, %cst_26 {dimension_numbers = #tpu.dot_dimension_numbers<[1], [0], [0], [1], [0, 0, 1, 1], [], []>} : vector<256x128xbf16>, vector<128x128xbf16>, vector<256x128xf32> -> vector<256x128xf32>
    %33 = arith.addf %27, %32 : vector<256x128xf32>
    %c0_27 = arith.constant 0 : index
    %c2 = arith.constant 2 : index
    %c0_28 = arith.constant 0 : index
    %34 = vector.load %arg8[%c0_27, %c2, %c0_28] : memref<18x18x128xbf16, #tpu.memory_space<vmem>>, vector<16x16x128xbf16>
    %35 = vector.shape_cast %34 : vector<16x16x128xbf16> to vector<256x128xbf16>
    %c2_29 = arith.constant 2 : index
    %c0_30 = arith.constant 0 : index
    %c0_31 = arith.constant 0 : index
    %36 = vector.load %arg4[%c2_29, %c0_30, %c0_31] : memref<9x128x128xbf16, #tpu.memory_space<vmem>>, vector<1x128x128xbf16>
    %37 = vector.shape_cast %36 : vector<1x128x128xbf16> to vector<128x128xbf16>
    %cst_32 = arith.constant dense<0.000000e+00> : vector<256x128xf32>
    %38 = tpu.matmul %35, %37, %cst_32 {dimension_numbers = #tpu.dot_dimension_numbers<[1], [0], [0], [1], [0, 0, 1, 1], [], []>} : vector<256x128xbf16>, vector<128x128xbf16>, vector<256x128xf32> -> vector<256x128xf32>
    %39 = arith.addf %33, %38 : vector<256x128xf32>
    %c1_33 = arith.constant 1 : index
    %c0_34 = arith.constant 0 : index
    %c0_35 = arith.constant 0 : index
    %40 = vector.load %arg8[%c1_33, %c0_34, %c0_35] : memref<18x18x128xbf16, #tpu.memory_space<vmem>>, vector<16x16x128xbf16>
    %41 = vector.shape_cast %40 : vector<16x16x128xbf16> to vector<256x128xbf16>
    %c3 = arith.constant 3 : index
    %c0_36 = arith.constant 0 : index
    %c0_37 = arith.constant 0 : index
    %42 = vector.load %arg4[%c3, %c0_36, %c0_37] : memref<9x128x128xbf16, #tpu.memory_space<vmem>>, vector<1x128x128xbf16>
    %43 = vector.shape_cast %42 : vector<1x128x128xbf16> to vector<128x128xbf16>
    %cst_38 = arith.constant dense<0.000000e+00> : vector<256x128xf32>
    %44 = tpu.matmul %41, %43, %cst_38 {dimension_numbers = #tpu.dot_dimension_numbers<[1], [0], [0], [1], [0, 0, 1, 1], [], []>} : vector<256x128xbf16>, vector<128x128xbf16>, vector<256x128xf32> -> vector<256x128xf32>
    %45 = arith.addf %39, %44 : vector<256x128xf32>
    %c1_39 = arith.constant 1 : index
    %c2_40 = arith.constant 2 : index
    %c0_41 = arith.constant 0 : index
    %46 = vector.load %arg8[%c1_39, %c2_40, %c0_41] : memref<18x18x128xbf16, #tpu.memory_space<vmem>>, vector<16x16x128xbf16>
    %47 = vector.shape_cast %46 : vector<16x16x128xbf16> to vector<256x128xbf16>
    %c5 = arith.constant 5 : index
    %c0_42 = arith.constant 0 : index
    %c0_43 = arith.constant 0 : index
    %48 = vector.load %arg4[%c5, %c0_42, %c0_43] : memref<9x128x128xbf16, #tpu.memory_space<vmem>>, vector<1x128x128xbf16>
    %49 = vector.shape_cast %48 : vector<1x128x128xbf16> to vector<128x128xbf16>
    %cst_44 = arith.constant dense<0.000000e+00> : vector<256x128xf32>
    %50 = tpu.matmul %47, %49, %cst_44 {dimension_numbers = #tpu.dot_dimension_numbers<[1], [0], [0], [1], [0, 0, 1, 1], [], []>} : vector<256x128xbf16>, vector<128x128xbf16>, vector<256x128xf32> -> vector<256x128xf32>
    %51 = arith.addf %45, %50 : vector<256x128xf32>
    %c2_45 = arith.constant 2 : index
    %c0_46 = arith.constant 0 : index
    %c0_47 = arith.constant 0 : index
    %52 = vector.load %arg8[%c2_45, %c0_46, %c0_47] : memref<18x18x128xbf16, #tpu.memory_space<vmem>>, vector<16x16x128xbf16>
    %53 = vector.shape_cast %52 : vector<16x16x128xbf16> to vector<256x128xbf16>
    %c6 = arith.constant 6 : index
    %c0_48 = arith.constant 0 : index
    %c0_49 = arith.constant 0 : index
    %54 = vector.load %arg4[%c6, %c0_48, %c0_49] : memref<9x128x128xbf16, #tpu.memory_space<vmem>>, vector<1x128x128xbf16>
    %55 = vector.shape_cast %54 : vector<1x128x128xbf16> to vector<128x128xbf16>
    %cst_50 = arith.constant dense<0.000000e+00> : vector<256x128xf32>
    %56 = tpu.matmul %53, %55, %cst_50 {dimension_numbers = #tpu.dot_dimension_numbers<[1], [0], [0], [1], [0, 0, 1, 1], [], []>} : vector<256x128xbf16>, vector<128x128xbf16>, vector<256x128xf32> -> vector<256x128xf32>
    %57 = arith.addf %51, %56 : vector<256x128xf32>
    %c2_51 = arith.constant 2 : index
    %c1_52 = arith.constant 1 : index
    %c0_53 = arith.constant 0 : index
    %58 = vector.load %arg8[%c2_51, %c1_52, %c0_53] : memref<18x18x128xbf16, #tpu.memory_space<vmem>>, vector<16x16x128xbf16>
    %59 = vector.shape_cast %58 : vector<16x16x128xbf16> to vector<256x128xbf16>
    %c7 = arith.constant 7 : index
    %c0_54 = arith.constant 0 : index
    %c0_55 = arith.constant 0 : index
    %60 = vector.load %arg4[%c7, %c0_54, %c0_55] : memref<9x128x128xbf16, #tpu.memory_space<vmem>>, vector<1x128x128xbf16>
    %61 = vector.shape_cast %60 : vector<1x128x128xbf16> to vector<128x128xbf16>
    %cst_56 = arith.constant dense<0.000000e+00> : vector<256x128xf32>
    %62 = tpu.matmul %59, %61, %cst_56 {dimension_numbers = #tpu.dot_dimension_numbers<[1], [0], [0], [1], [0, 0, 1, 1], [], []>} : vector<256x128xbf16>, vector<128x128xbf16>, vector<256x128xf32> -> vector<256x128xf32>
    %63 = arith.addf %57, %62 : vector<256x128xf32>
    %c2_57 = arith.constant 2 : index
    %c2_58 = arith.constant 2 : index
    %c0_59 = arith.constant 0 : index
    %64 = vector.load %arg8[%c2_57, %c2_58, %c0_59] : memref<18x18x128xbf16, #tpu.memory_space<vmem>>, vector<16x16x128xbf16>
    %65 = vector.shape_cast %64 : vector<16x16x128xbf16> to vector<256x128xbf16>
    %c8 = arith.constant 8 : index
    %c0_60 = arith.constant 0 : index
    %c0_61 = arith.constant 0 : index
    %66 = vector.load %arg4[%c8, %c0_60, %c0_61] : memref<9x128x128xbf16, #tpu.memory_space<vmem>>, vector<1x128x128xbf16>
    %67 = vector.shape_cast %66 : vector<1x128x128xbf16> to vector<128x128xbf16>
    %cst_62 = arith.constant dense<0.000000e+00> : vector<256x128xf32>
    %68 = tpu.matmul %65, %67, %cst_62 {dimension_numbers = #tpu.dot_dimension_numbers<[1], [0], [0], [1], [0, 0, 1, 1], [], []>} : vector<256x128xbf16>, vector<128x128xbf16>, vector<256x128xf32> -> vector<256x128xf32>
    %69 = arith.addf %63, %68 : vector<256x128xf32>
    %70 = arith.truncf %69 : vector<256x128xf32> to vector<256x128xbf16>
    %c0_63 = arith.constant 0 : index
    %c0_64 = arith.constant 0 : index
    %c0_65 = arith.constant 0 : index
    %71 = vector.load %arg5[%c0_63, %c0_64, %c0_65] : memref<1x256x128xbf16, #tpu.memory_space<vmem>>, vector<1x256x128xbf16>
    %72 = vector.shape_cast %71 : vector<1x256x128xbf16> to vector<256x128xbf16>
    %73 = vector.shape_cast %70 : vector<256x128xbf16> to vector<1x256x128xbf16>
    tpu.vector_store %arg5[%c0_63, %c0_64, %c0_65], %73 {strides = array<i32>} : memref<1x256x128xbf16, #tpu.memory_space<vmem>>, vector<1x256x128xbf16>,
    %c0_66 = arith.constant 0 : index
    %c0_67 = arith.constant 0 : index
    %74 = vector.load %arg6[%c0_66, %c0_67] : memref<1x128xf32, #tpu.memory_space<vmem>>, vector<1x128xf32>
    %cst_68 = arith.constant dense<0.000000e+00> : vector<128xf32>
    %75 = vector.multi_reduction <add>, %69, %cst_68 [0] : vector<256x128xf32> to vector<128xf32>
    %76 = vector.shape_cast %75 : vector<128xf32> to vector<1x128xf32>
    %77 = arith.addf %74, %76 : vector<1x128xf32>
    %c0_69 = arith.constant 0 : index
    %c0_70 = arith.constant 0 : index
    %78 = vector.load %arg6[%c0_69, %c0_70] : memref<1x128xf32, #tpu.memory_space<vmem>>, vector<1x128xf32>
    tpu.vector_store %arg6[%c0_69, %c0_70], %77 {strides = array<i32>} : memref<1x128xf32, #tpu.memory_space<vmem>>, vector<1x128xf32>,
    %c0_71 = arith.constant 0 : index
    %c0_72 = arith.constant 0 : index
    %79 = vector.load %arg7[%c0_71, %c0_72] : memref<1x128xf32, #tpu.memory_space<vmem>>, vector<1x128xf32>
    %80 = arith.mulf %69, %69 : vector<256x128xf32>
    %cst_73 = arith.constant dense<0.000000e+00> : vector<128xf32>
    %81 = vector.multi_reduction <add>, %80, %cst_73 [0] : vector<256x128xf32> to vector<128xf32>
    %82 = vector.shape_cast %81 : vector<128xf32> to vector<1x128xf32>
    %83 = arith.addf %79, %82 : vector<1x128xf32>
    %c0_74 = arith.constant 0 : index
    %c0_75 = arith.constant 0 : index
    %84 = vector.load %arg7[%c0_74, %c0_75] : memref<1x128xf32, #tpu.memory_space<vmem>>, vector<1x128xf32>
    tpu.vector_store %arg7[%c0_74, %c0_75], %83 {strides = array<i32>} : memref<1x128xf32, #tpu.memory_space<vmem>>, vector<1x128xf32>,
    return
  }
  func.func @transform_0(%arg0: i32) -> (i32, i32, i32, i32) {
    %c0_i32 = arith.constant 0 : i32
    %c0_i32_0 = arith.constant 0 : i32
    %c0_i32_1 = arith.constant 0 : i32
    %c0_i32_2 = arith.constant 0 : i32
    return %arg0, %c0_i32, %c0_i32_0, %c0_i32_1 : i32, i32, i32, i32
  }
  func.func @transform_1(%arg0: i32) -> (i32, i32) {
    %c0_i32 = arith.constant 0 : i32
    %c0_i32_0 = arith.constant 0 : i32
    %c0_i32_1 = arith.constant 0 : i32
    return %c0_i32, %c0_i32_0 : i32, i32
  }
  func.func @transform_2(%arg0: i32) -> (i32, i32) {
    %c0_i32 = arith.constant 0 : i32
    %c0_i32_0 = arith.constant 0 : i32
    %c0_i32_1 = arith.constant 0 : i32
    return %c0_i32, %c0_i32_0 : i32, i32
  }
  func.func @transform_3(%arg0: i32) -> (i32, i32, i32) {
    %c0_i32 = arith.constant 0 : i32
    %c0_i32_0 = arith.constant 0 : i32
    %c0_i32_1 = arith.constant 0 : i32
    %c0_i32_2 = arith.constant 0 : i32
    return %c0_i32, %c0_i32_0, %c0_i32_1 : i32, i32, i32
  }
  func.func @transform_4(%arg0: i32) -> (i32, i32, i32) {
    %c0_i32 = arith.constant 0 : i32
    %c0_i32_0 = arith.constant 0 : i32
    %c0_i32_1 = arith.constant 0 : i32
    return %arg0, %c0_i32, %c0_i32_0 : i32, i32, i32
  }
  func.func @transform_5(%arg0: i32) -> (i32, i32) {
    %c0_i32 = arith.constant 0 : i32
    %c0_i32_0 = arith.constant 0 : i32
    %c0_i32_1 = arith.constant 0 : i32
    return %c0_i32, %c0_i32_0 : i32, i32
  }
  func.func @transform_6(%arg0: i32) -> (i32, i32) {
    %c0_i32 = arith.constant 0 : i32
    %c0_i32_0 = arith.constant 0 : i32
    %c0_i32_1 = arith.constant 0 : i32
    return %c0_i32, %c0_i32_0 : i32, i32
  }
}

module attributes {stable_mosaic.version = 11 : i64} {
  func.func @_stage2b_kernel(%arg0: i32, %arg1: memref<128x128xbf16, #tpu.memory_space<vmem>>, %arg2: memref<1x128xf32, #tpu.memory_space<vmem>>, %arg3: memref<1x128xf32, #tpu.memory_space<vmem>>, %arg4: memref<128x128xbf16, #tpu.memory_space<vmem>>, %arg5: memref<128x128xf32, #tpu.memory_space<vmem>>, %arg6: memref<128x128xf32, #tpu.memory_space<vmem>>) attributes {dimension_semantics = [#tpu.dimension_semantics<parallel>], iteration_bounds = array<i64: 4>, scalar_prefetch = 0 : i64, scratch_operands = 0 : i64, tpu.core_type = #tpu.core_type<tc>, window_params = [{transform_indices = @transform_0, window_bounds = array<i64: 128, 128>}, {pipeline_mode = #tpu.pipeline_mode<synchronous>, transform_indices = @transform_1, window_bounds = array<i64: 1, 128>}, {pipeline_mode = #tpu.pipeline_mode<synchronous>, transform_indices = @transform_2, window_bounds = array<i64: 1, 128>}, {pipeline_mode = #tpu.pipeline_mode<synchronous>, transform_indices = @transform_3, window_bounds = array<i64: 128, 128>}, {transform_indices = @transform_4, window_bounds = array<i64: 128, 128>}, {transform_indices = @transform_5, window_bounds = array<i64: 128, 128>}]} {
    %c0 = arith.constant 0 : index
    %c0_0 = arith.constant 0 : index
    %0 = vector.load %arg1[%c0, %c0_0] : memref<128x128xbf16, #tpu.memory_space<vmem>>, vector<128x128xbf16>
    %1 = arith.extf %0 : vector<128x128xbf16> to vector<128x128xf32>
    %c0_1 = arith.constant 0 : index
    %c0_2 = arith.constant 0 : index
    %2 = vector.load %arg2[%c0_1, %c0_2] : memref<1x128xf32, #tpu.memory_space<vmem>>, vector<1x128xf32>
    %3 = vector.broadcast %2 : vector<1x128xf32> to vector<128x128xf32>
    %4 = arith.mulf %1, %3 : vector<128x128xf32>
    %c0_3 = arith.constant 0 : index
    %c0_4 = arith.constant 0 : index
    %5 = vector.load %arg3[%c0_3, %c0_4] : memref<1x128xf32, #tpu.memory_space<vmem>>, vector<1x128xf32>
    %6 = vector.broadcast %5 : vector<1x128xf32> to vector<128x128xf32>
    %7 = arith.addf %4, %6 : vector<128x128xf32>
    %cst = arith.constant 0.000000e+00 : f32
    %8 = vector.broadcast %cst : f32 to vector<128x128xf32>
    %9 = arith.maximumf %7, %8 : vector<128x128xf32>
    %10 = arith.truncf %9 : vector<128x128xf32> to vector<128x128xbf16>
    %c0_5 = arith.constant 0 : index
    %c0_6 = arith.constant 0 : index
    %11 = vector.load %arg4[%c0_5, %c0_6] : memref<128x128xbf16, #tpu.memory_space<vmem>>, vector<128x128xbf16>
    %cst_7 = arith.constant dense<0.000000e+00> : vector<128x128xf32>
    %12 = tpu.matmul %10, %11, %cst_7 {dimension_numbers = #tpu.dot_dimension_numbers<[1], [0], [0], [1], [0, 0, 1, 1], [], []>} : vector<128x128xbf16>, vector<128x128xbf16>, vector<128x128xf32> -> vector<128x128xf32>
    %c0_8 = arith.constant 0 : index
    %c0_9 = arith.constant 0 : index
    %13 = vector.load %arg5[%c0_8, %c0_9] : memref<128x128xf32, #tpu.memory_space<vmem>>, vector<128x128xf32>
    %14 = arith.addf %12, %13 : vector<128x128xf32>
    %c0_10 = arith.constant 0 : index
    %c0_11 = arith.constant 0 : index
    %15 = vector.load %arg6[%c0_10, %c0_11] : memref<128x128xf32, #tpu.memory_space<vmem>>, vector<128x128xf32>
    tpu.vector_store %arg6[%c0_10, %c0_11], %14 {strides = array<i32>} : memref<128x128xf32, #tpu.memory_space<vmem>>, vector<128x128xf32>,
    return
  }
  func.func @transform_0(%arg0: i32) -> (i32, i32) {
    %c0_i32 = arith.constant 0 : i32
    %c0_i32_0 = arith.constant 0 : i32
    return %arg0, %c0_i32 : i32, i32
  }
  func.func @transform_1(%arg0: i32) -> (i32, i32) {
    %c0_i32 = arith.constant 0 : i32
    %c0_i32_0 = arith.constant 0 : i32
    %c0_i32_1 = arith.constant 0 : i32
    return %c0_i32, %c0_i32_0 : i32, i32
  }
  func.func @transform_2(%arg0: i32) -> (i32, i32) {
    %c0_i32 = arith.constant 0 : i32
    %c0_i32_0 = arith.constant 0 : i32
    %c0_i32_1 = arith.constant 0 : i32
    return %c0_i32, %c0_i32_0 : i32, i32
  }
  func.func @transform_3(%arg0: i32) -> (i32, i32) {
    %c0_i32 = arith.constant 0 : i32
    %c0_i32_0 = arith.constant 0 : i32
    %c0_i32_1 = arith.constant 0 : i32
    return %c0_i32, %c0_i32_0 : i32, i32
  }
  func.func @transform_4(%arg0: i32) -> (i32, i32) {
    %c0_i32 = arith.constant 0 : i32
    %c0_i32_0 = arith.constant 0 : i32
    return %arg0, %c0_i32 : i32, i32
  }
  func.func @transform_5(%arg0: i32) -> (i32, i32) {
    %c0_i32 = arith.constant 0 : i32
    %c0_i32_0 = arith.constant 0 : i32
    return %arg0, %c0_i32 : i32, i32
  }
}

</mosaic_0001>

<bundles_post_ra>
// kernel: _lambda_.4
= control target key start
LH: loop header
LB: loop body
LE: loop exit
PB: predicated region body
PF: predicated region fallthrough
CT: control target
= control target key end

     0   :  { %s291_s9 = smov 0   ;;  %s341_s0 = inlined_call_operand.vmem [shape: f32[512,128], index: 0, kind: input, shape index: {}]   ;;  %s342_s1 = inlined_call_operand.vmem [shape: f32[1,128], index: 1, kind: output, shape index: {0}]   ;;  %s343_s2 = inlined_call_operand.vmem [shape: f32[1,128], index: 2, kind: output, shape index: {1}]  }
   0x1 LB: > { %s249_s10 = sadd.s32 4294967295, %s273_s9   ;;  %p252_p0 = scmp.ge.s32.totalorder %s273_s9, 1  ;;  %s273_s9 = sphi %s291_s9, %s13_s9  }
   0x2   : > { %p106_p1 = scmp.lt.s32.totalorder %s273_s9, 5 }
   0x4   : > { %p107_p2 = pnand %p252_p0, %p106_p1 }
   0x5   : > { %s253_s11 = sshll.u32 (!%p107_p2), %s249_s10, 4  ;;  %p255_p4 = scmp.ne.s32.totalorder (!%p107_p2), %s249_s10, 0 }
   0x6   : > { %110 = sbr.rel (%p107_p2) target bundleno = 68 (0x44), region = 24  ;;  %p124_p3 = scmp.lt.s32.totalorder (!%p107_p2), %s253_s11, 63 }
   0xd   : > { %s345_s11 = smov (!%p124_p3, %s253_s11), 63  ;;  %132 = sbr.rel (%p255_p4) target bundleno = 20 (0x14), region = 28 }
   0xe   : > { %s254_s12 = sshll.u32 %s345_s11, 3  ;;  %v275_v0 = vmov (!%p255_p4), 0.0  }
   0xf   : > { %s302_s15 = scalar_lea.vmem %s341_s0, %s254_s12  ;;  %133 = vst [vmem:[%s342_s1] sm:$0x1] (!%p255_p4), %v275_v0  ;;  %134 = vst [vmem:[%s343_s2] sm:$0x1] (!%p255_p4), %v275_v0 }
  0x14 PF: > { %v135_v1 = vld [vmem:[%s302_s15] sm:$0xff]  ;;  %v136_v2 = vld [vmem:[%s302_s15 + $0x8] sm:$0xff]  ;;  %v137_v3 = vld [vmem:[%s302_s15 + $0x10] sm:$0xff] }
  0x15   : > { %v138_v4 = vld [vmem:[%s302_s15 + $0x18] sm:$0xff]  ;;  %v152_v5 = vadd.f32 %v136_v2, %v135_v1  ;;  %v176_v6 = vmul.f32 %v135_v1, %v135_v1  ;;  %v177_v7 = vmul.f32 %v136_v2, %v136_v2  ;;  %v178_v8 = vmul.f32 %v137_v3, %v137_v3  ;;  %v139_v9 = vld [vmem:[%s302_s15 + $0x20] sm:$0xff]  ;;  %v140_v13 = vld [vmem:[%s302_s15 + $0x28] sm:$0xff] }
  0x16   : > { %v179_v11 = vmul.f32 %v138_v4, %v138_v4  ;;  %v180_v15 = vmul.f32 %v139_v9, %v139_v9  ;;  %v141_v17 = vld [vmem:[%s302_s15 + $0x30] sm:$0xff]  ;;  %v181_v19 = vmul.f32 %v140_v13, %v140_v13  ;;  %v142_v21 = vld [vmem:[%s302_s15 + $0x38] sm:$0xff]  ;;  %v143_v25 = vld [vmem:[%s302_s15 + $0x40] sm:$0xff] }
  0x17   : > { %v153_v10 = vadd.f32 %v152_v5, %v137_v3  ;;  %v192_v12 = vadd.f32 %v177_v7, %v176_v6  ;;  %v182_v23 = vmul.f32 %v141_v17, %v141_v17  ;;  %v183_v27 = vmul.f32 %v142_v21, %v142_v21  ;;  %v144_v29 = vld [vmem:[%s302_s15 + $0x48] sm:$0xff]  ;;  %v145_v33 = vld [vmem:[%s302_s15 + $0x50] sm:$0xff]  ;;  %v146_v37 = vld [vmem:[%s302_s15 + $0x58] sm:$0xff] }
  0x18   : > { %v184_v31 = vmul.f32 %v143_v25, %v143_v25  ;;  %v185_v35 = vmul.f32 %v144_v29, %v144_v29  ;;  %v186_v39 = vmul.f32 %v145_v33, %v145_v33  ;;  %v147_v41 = vld [vmem:[%s302_s15 + $0x60] sm:$0xff]  ;;  %v187_v43 = vmul.f32 %v146_v37, %v146_v37  ;;  %v148_v45 = vld [vmem:[%s302_s15 + $0x68] sm:$0xff]  ;;  %v149_v49 = vld [vmem:[%s302_s15 + $0x70] sm:$0xff] }
  0x19   : > { %v154_v14 = vadd.f32 %v153_v10, %v138_v4  ;;  %v193_v16 = vadd.f32 %v192_v12, %v178_v8  ;;  %v188_v47 = vmul.f32 %v147_v41, %v147_v41  ;;  %v189_v51 = vmul.f32 %v148_v45, %v148_v45  ;;  %v150_v53 = vld [vmem:[%s302_s15 + $0x78] sm:$0xff]  ;;  %v151_v7 = vld [vmem:[%s342_s1] sm:$0x1] }
  0x1a   : > { %v190_v55 = vmul.f32 %v149_v49, %v149_v49  ;;  %v191_v58 = vmul.f32 %v150_v53, %v150_v53  ;;  %v175_v12 = vld [vmem:[%s343_s2] sm:$0x1] }
  0x1b   : > { %v155_v18 = vadd.f32 %v154_v14, %v139_v9  ;;  %v194_v20 = vadd.f32 %v193_v16, %v179_v11 }
  0x1d   : > { %v156_v22 = vadd.f32 %v155_v18, %v140_v13  ;;  %v195_v24 = vadd.f32 %v194_v20, %v180_v15 }
  0x1f   : > { %v157_v26 = vadd.f32 %v156_v22, %v141_v17  ;;  %v196_v28 = vadd.f32 %v195_v24, %v181_v19 }
  0x21   : > { %v158_v30 = vadd.f32 %v157_v26, %v142_v21  ;;  %v197_v32 = vadd.f32 %v196_v28, %v182_v23 }
  0x23   : > { %v159_v34 = vadd.f32 %v158_v30, %v143_v25  ;;  %v198_v36 = vadd.f32 %v197_v32, %v183_v27 }
  0x25   : > { %v160_v38 = vadd.f32 %v159_v34, %v144_v29  ;;  %v199_v40 = vadd.f32 %v198_v36, %v184_v31 }
  0x27   : > { %v161_v42 = vadd.f32 %v160_v38, %v145_v33  ;;  %v200_v44 = vadd.f32 %v199_v40, %v185_v35 }
  0x29   : > { %v162_v46 = vadd.f32 %v161_v42, %v146_v37  ;;  %v201_v48 = vadd.f32 %v200_v44, %v186_v39 }
  0x2b   : > { %v163_v50 = vadd.f32 %v162_v46, %v147_v41  ;;  %v202_v52 = vadd.f32 %v201_v48, %v187_v43 }
  0x2d   : > { %v164_v54 = vadd.f32 %v163_v50, %v148_v45  ;;  %v203_v56 = vadd.f32 %v202_v52, %v188_v47 }
  0x2f   : > { %v165_v57 = vadd.f32 %v164_v54, %v149_v49  ;;  %v204_v59 = vadd.f32 %v203_v56, %v189_v51 }
  0x31   : > { %v166_v60 = vadd.f32 %v165_v57, %v150_v53  ;;  %v205_v61 = vadd.f32 %v204_v59, %v190_v55 }
  0x33   : > { %v167_v62 = vrot.slane %v166_v60, 4  ;;  %v206_v63 = vadd.f32 %v205_v61, %v191_v58 }
  0x35   : > { %v168_v0 = vadd.f32 %v167_v62, %v166_v60  ;;  %v207_v1 = vrot.slane %v206_v63, 4 }
  0x37   : > { %v169_v2 = vrot.slane %v168_v0, 2  ;;  %v208_v3 = vadd.f32 %v207_v1, %v206_v63 }
  0x39   : > { %v170_v4 = vadd.f32 %v169_v2, %v168_v0  ;;  %v209_v5 = vrot.slane %v208_v3, 2 }
  0x3b   : > { %v171_v6 = vrot.slane %v170_v4, 1  ;;  %v210_v8 = vadd.f32 %v209_v5, %v208_v3 }
  0x3d   : > { %v172_v9 = vadd.f32 %v171_v6, %v170_v4  ;;  %v211_v10 = vrot.slane %v210_v8, 1 }
  0x3f   : > { %v173_v11 = vadd.f32 %v172_v9, %v151_v7  ;;  %v212_v13 = vadd.f32 %v211_v10, %v210_v8 }
  0x41   : > { %174 = vst [vmem:[%s342_s1] sm:$0x1] %v173_v11  ;;  %v213_v14 = vadd.f32 %v212_v13, %v175_v12 }
  0x43   : > { %214 = vst [vmem:[%s343_s2] sm:$0x1] %v213_v14 }
  0x44 PF: > { %s13_s9 = sadd.s32 1, %s273_s9  }
  0x45   : > { %p10_p5 = scmp.ge.s32.totalorder %s13_s9, 6  }
  0x47   :  { %12 = sbr.rel (!%p10_p5) target bundleno = 1 (0x1), region = 62 }

// kernel: _lambda_.7
= control target key start
LH: loop header
LB: loop body
LE: loop exit
PB: predicated region body
PF: predicated region fallthrough
CT: control target
= control target key end

     0   :  { %s794_s18 = smov 0   ;;  %s930_s0 = inlined_call_operand.vmem [shape: bf16[512,128], index: 0, kind: input, shape index: {}]   ;;  %s931_s1 = inlined_call_operand.vmem [shape: f32[1,128], index: 1, kind: input, shape index: {}]   ;;  %s932_s2 = inlined_call_operand.vmem [shape: f32[1,128], index: 2, kind: input, shape index: {}]   ;;  %s933_s3 = inlined_call_operand.vmem [shape: bf16[128,128], index: 3, kind: input, shape index: {}]   ;;  %s934_s4 = inlined_call_operand.vmem [shape: f32[512,128], index: 4, kind: input, shape index: {}]   ;;  %s935_s5 = inlined_call_operand.vmem [shape: f32[512,128], index: 5, kind: output, shape index: {}]  }
   0x1 LB: > { %s614_s19 = sadd.s32 4294967295, %s762_s18   ;;  %p618_p0 = scmp.ge.s32.totalorder %s762_s18, 1  ;;  %s762_s18 = sphi %s794_s18, %s15_s18  }
   0x2   : > { %p199_p1 = scmp.lt.s32.totalorder %s762_s18, 5 }
   0x4   : > { %p200_p2 = pnand %p618_p0, %p199_p1 }
   0x5   : > { %v748_v0 = vld [vmem:[%s933_s3] sm:$0xff] (!%p200_p2)   ;;  %s619_s22 = sshll.u32 (!%p200_p2), %s614_s19, 4  ;;  %v749_v1 = vld [vmem:[%s933_s3 + $0x8] sm:$0xff] (!%p200_p2)   ;;  %v750_v2 = vld [vmem:[%s933_s3 + $0x10] sm:$0xff] (!%p200_p2)  }
   0x6   : > { %203 = sbr.rel (%p200_p2) target bundleno = 265 (0x109), region = 40  ;;  %p233_p3 = scmp.lt.s32.totalorder (!%p200_p2), %s619_s22, 63  ;;  %692 = vmatprep.subr.bf16.mxu0 (!%p200_p2), %v748_v0  ;;  %724 = vmatprep.subr.bf16.mxu1 (!%p200_p2), %v748_v0  ;;  %v751_v3 = vld [vmem:[%s933_s3 + $0x18] sm:$0xff] (!%p200_p2)   ;;  %v826_v5 = vld [vmem:[%s931_s1] ss:$0 sm:$0xff] (!%p200_p2)  ;;  %v753_v32 = vld [vmem:[%s933_s3 + $0x28] sm:$0xff] (!%p200_p2)  }
   0x7   : > { %693 = vmatpush3.bf16.msra.mxu0 (!%p200_p2), %v748_v0  ;;  %732 = vmatpush3.bf16.msra.mxu1 (!%p200_p2), %v748_v0  ;;  %v833_v10 = vld [vmem:[%s932_s2] ss:$0 sm:$0xff] (!%p200_p2)  ;;  %v754_v48 = vld [vmem:[%s933_s3 + $0x30] sm:$0xff] (!%p200_p2)   ;;  %v755_v63 = vld [vmem:[%s933_s3 + $0x38] sm:$0xff] (!%p200_p2)  }
   0x8   : > { %694 = vmatprep.subr.bf16.mxu0 (!%p200_p2), %v749_v1  ;;  %725 = vmatprep.subr.bf16.mxu1 (!%p200_p2), %v749_v1  ;;  %v752_v17 = vld [vmem:[%s933_s3 + $0x20] sm:$0xff] (!%p200_p2)  }
   0xb   : > { %695 = vmatpush3.bf16.msra.mxu0 (!%p200_p2), %v749_v1  ;;  %733 = vmatpush3.bf16.msra.mxu1 (!%p200_p2), %v749_v1 }
   0xc   : > { %696 = vmatprep.subr.bf16.mxu0 (!%p200_p2), %v750_v2  ;;  %726 = vmatprep.subr.bf16.mxu1 (!%p200_p2), %v750_v2 }
   0xd   : > { %s937_s22 = smov (!%p233_p3, %s619_s22), 63 }
   0xe   : > { %s620_s27 = sshll.u32 %s937_s22, 2  ;;  %s622_s21 = sshll.u32 %s937_s22, 3 }
   0xf   : > { %s817_s30 = scalar_lea.vmem %s930_s0, %s620_s27  ;;  %697 = vmatpush3.bf16.msra.mxu0 %v750_v2  ;;  %734 = vmatpush3.bf16.msra.mxu1 %v750_v2  ;;  %s888_s25 = scalar_lea.vmem %s934_s4, %s622_s21 }
  0x10   : > { %v638_v4 = vld [vmem:[%s817_s30] sm:$0xff]   ;;  %v669_v9 = vld [vmem:[%s817_s30 + $0x8] sm:$0xff]   ;;  %v670_v16 = vld [vmem:[%s817_s30 + $0x10] sm:$0xff]   ;;  %698 = vmatprep.subr.bf16.mxu0 %v751_v3  ;;  %727 = vmatprep.subr.bf16.mxu1 %v751_v3  ;;  %s897_s22 = scalar_lea.vmem %s935_s5, %s622_s21 }
  0x11   : > { %v639_v6 = vunpack.c.l.bf16 %v638_v4  ;;  %v640_v7 = vunpack.c.h.bf16 %v638_v4  ;;  %v672_v8 = vld [vmem:[%s817_s30 + $0x20] sm:$0xff]   ;;  %v673_v13 = vld [vmem:[%s817_s30 + $0x28] sm:$0xff]   ;;  %v643_v20 = vunpack.c.l.bf16 %v669_v9  ;;  %v644_v21 = vunpack.c.h.bf16 %v669_v9  ;;  %v674_v31 = vld [vmem:[%s817_s30 + $0x30] sm:$0xff]  }
  0x12   : > { %v655_v11 = vunpack.c.l.bf16 %v672_v8  ;;  %v656_v12 = vunpack.c.h.bf16 %v672_v8  ;;  %v659_v24 = vunpack.c.l.bf16 %v673_v13  ;;  %v660_v25 = vunpack.c.h.bf16 %v673_v13  ;;  %v671_v44 = vld [vmem:[%s817_s30 + $0x18] sm:$0xff]  }
  0x13   : > { %v290_v14 = vmul.f32 %v639_v6, %v826_v5  ;;  %v291_v15 = vmul.f32 %v640_v7, %v826_v5  ;;  %v647_v28 = vunpack.c.l.bf16 %v670_v16  ;;  %699 = vmatpush3.bf16.msra.mxu0 %v751_v3  ;;  %735 = vmatpush3.bf16.msra.mxu1 %v751_v3  ;;  %v292_v35 = vmul.f32 %v643_v20, %v826_v5  ;;  %v675_v47 = vld [vmem:[%s817_s30 + $0x38] sm:$0xff]  }
  0x14   : > { %v298_v18 = vmul.f32 %v655_v11, %v826_v5  ;;  %v299_v19 = vmul.f32 %v656_v12, %v826_v5  ;;  %700 = vmatprep.subr.bf16.mxu0 %v752_v17  ;;  %728 = vmatprep.subr.bf16.mxu1 %v752_v17  ;;  %v293_v36 = vmul.f32 %v644_v21, %v826_v5  ;;  %v648_v40 = vunpack.c.h.bf16 %v670_v16 }
  0x15   : > { %v313_v22 = vadd.f32 %v833_v10, %v290_v14  ;;  %v314_v23 = vadd.f32 %v833_v10, %v291_v15  ;;  %v300_v38 = vmul.f32 %v659_v24, %v826_v5  ;;  %v301_v39 = vmul.f32 %v660_v25, %v826_v5 }
  0x16   : > { %v321_v26 = vadd.f32 %v833_v10, %v298_v18  ;;  %v322_v27 = vadd.f32 %v833_v10, %v299_v19  ;;  %v294_v42 = vmul.f32 %v647_v28, %v826_v5  ;;  %v663_v43 = vunpack.c.l.bf16 %v674_v31  ;;  %v369_v28 = vld [vmem:[%s888_s25] sm:$0xff] }
  0x17   : > { %v329_v29 = vmax.f32 %v313_v22, 0.0  ;;  %v330_v30 = vmax.f32 %v314_v23, 0.0  ;;  %701 = vmatpush3.bf16.msra.mxu0 %v752_v17  ;;  %736 = vmatpush3.bf16.msra.mxu1 %v752_v17  ;;  %v295_v45 = vmul.f32 %v648_v40, %v826_v5  ;;  %v664_v46 = vunpack.c.h.bf16 %v674_v31 }
  0x18   : > { %v337_v33 = vmax.f32 %v321_v26, 0.0  ;;  %v338_v34 = vmax.f32 %v322_v27, 0.0  ;;  %702 = vmatprep.subr.bf16.mxu0 %v753_v32  ;;  %729 = vmatprep.subr.bf16.mxu1 %v753_v32  ;;  %v315_v49 = vadd.f32 %v833_v10, %v292_v35  ;;  %v316_v50 = vadd.f32 %v833_v10, %v293_v36  ;;  %v379_v27 = vld [vmem:[%s888_s25 + $0x50] sm:$0xff] }
  0x19   : > { %v345_v37 = vpack.c.bf16 %v330_v30, %v329_v29  ;;  %v302_v51 = vmul.f32 %v663_v43, %v826_v5  ;;  %v323_v52 = vadd.f32 %v833_v10, %v300_v38  ;;  %v324_v53 = vadd.f32 %v833_v10, %v301_v39  ;;  %v377_v29 = vld [vmem:[%s888_s25 + $0x40] sm:$0xff]  ;;  %v370_v38 = vld [vmem:[%s888_s25 + $0x8] sm:$0xff] }
  0x1a   : > { %v349_v41 = vpack.c.bf16 %v338_v34, %v337_v33  ;;  %v303_v54 = vmul.f32 %v664_v46, %v826_v5  ;;  %v651_v55 = vunpack.c.l.bf16 %v671_v44  ;;  %v317_v56 = vadd.f32 %v833_v10, %v294_v42  ;;  %v380_v33 = vld [vmem:[%s888_s25 + $0x58] sm:$0xff]  ;;  %v378_v39 = vld [vmem:[%s888_s25 + $0x48] sm:$0xff] }
  0x1b   : > { %708 = vmatprep.mubr.bf16.mxu0 %v345_v37  ;;  %v652_v57 = vunpack.c.h.bf16 %v671_v44  ;;  %v667_v58 = vunpack.c.l.bf16 %v675_v47  ;;  %v668_v59 = vunpack.c.h.bf16 %v675_v47  ;;  %703 = vmatpush3.bf16.msra.mxu0 %v753_v32  ;;  %v318_v60 = vadd.f32 %v833_v10, %v295_v45 }
  0x1c   : > { %716 = vmatprep.mubr.bf16.mxu1 %v349_v41  ;;  %737 = vmatpush3.bf16.msra.mxu1 %v753_v32  ;;  %v325_v61 = vadd.f32 %v833_v10, %v302_v51  ;;  %v326_v62 = vadd.f32 %v833_v10, %v303_v54  ;;  %v331_v0 = vmax.f32 %v315_v49, 0.0  ;;  %v332_v1 = vmax.f32 %v316_v50, 0.0  ;;  %v372_v32 = vld [vmem:[%s888_s25 + $0x18] sm:$0xff]  ;;  %v375_v50 = vld [vmem:[%s888_s25 + $0x30] sm:$0xff] }
  0x1d   : > { %704 = vmatprep.subr.bf16.mxu0 %v754_v48  ;;  %730 = vmatprep.subr.bf16.mxu1 %v754_v48  ;;  %v339_v2 = vmax.f32 %v323_v52, 0.0  ;;  %v340_v3 = vmax.f32 %v324_v53, 0.0  ;;  %v296_v4 = vmul.f32 %v651_v55, %v826_v5  ;;  %v297_v6 = vmul.f32 %v652_v57, %v826_v5  ;;  %v383_v51 = vld [vmem:[%s888_s25 + $0x70] sm:$0xff]  ;;  %v373_v52 = vld [vmem:[%s888_s25 + $0x20] sm:$0xff]  ;;  %v384_v57 = vld [vmem:[%s888_s25 + $0x78] sm:$0xff] }
  0x1e   : > { %v304_v7 = vmul.f32 %v667_v58, %v826_v5  ;;  %v305_v8 = vmul.f32 %v668_v59, %v826_v5  ;;  %v333_v9 = vmax.f32 %v317_v56, 0.0  ;;  %v334_v11 = vmax.f32 %v318_v60, 0.0  ;;  %v381_v53 = vld [vmem:[%s888_s25 + $0x60] sm:$0xff]  ;;  %v376_v56 = vld [vmem:[%s888_s25 + $0x38] sm:$0xff] }
  0x1f   : > { %705 = vmatpush3.bf16.msra.mxu0 %v754_v48  ;;  %v341_v12 = vmax.f32 %v325_v61, 0.0  ;;  %v342_v13 = vmax.f32 %v326_v62, 0.0  ;;  %v346_v14 = vpack.c.bf16 %v332_v1, %v331_v0  ;;  %v350_v15 = vpack.c.bf16 %v340_v3, %v339_v2  ;;  %v374_v62 = vld [vmem:[%s888_s25 + $0x28] sm:$0xff] }
  0x20   : > { %738 = vmatpush3.bf16.msra.mxu1 %v754_v48  ;;  %706 = vmatprep.subr.bf16.mxu0 %v755_v63  ;;  %v319_v16 = vadd.f32 %v833_v10, %v296_v4  ;;  %v320_v17 = vadd.f32 %v833_v10, %v297_v6  ;;  %v327_v18 = vadd.f32 %v833_v10, %v304_v7 }
  0x21   : > { %731 = vmatprep.subr.bf16.mxu1 %v755_v63  ;;  %v328_v19 = vadd.f32 %v833_v10, %v305_v8  ;;  %v347_v5 = vpack.c.bf16 %v334_v11, %v333_v9  ;;  %v351_v20 = vpack.c.bf16 %v342_v13, %v341_v12  ;;  %v371_v10 = vld [vmem:[%s888_s25 + $0x10] sm:$0xff] }
  0x22   : > { %v335_v21 = vmax.f32 %v319_v16, 0.0  ;;  %v336_v22 = vmax.f32 %v320_v17, 0.0  ;;  %v343_v23 = vmax.f32 %v327_v18, 0.0 }
  0x23   : > { %707 = vmatpush3.bf16.msra.mxu0 %v755_v63  ;;  %v344_v24 = vmax.f32 %v328_v19, 0.0 }
  0x24   : > { %739 = vmatpush3.bf16.msra.mxu1 %v755_v63  ;;  %v348_v25 = vpack.c.bf16 %v336_v22, %v335_v21  ;;  %v382_v63 = vld [vmem:[%s888_s25 + $0x68] sm:$0xff] }
  0x25   : > { %v352_v26 = vpack.c.bf16 %v344_v24, %v343_v23 }
  0x26   : > { %709 = vmatmul.mubr.bf16.vlgmr.msra.gmra.mrb[0].mxu0 %v346_v14 }
  0x27   : > { %717 = vmatmul.mubr.bf16.vlgmr.msra.gmra.mrb[0].mxu1 %v350_v15  ;;  %712 = vmatprep.mubr.bf16.mxu0 %v347_v5 }
  0x28   : > { %720 = vmatprep.mubr.bf16.mxu1 %v351_v20 }
  0x2e   : > { %713 = vmatmul.mubr.bf16.gmra.mrb[4].mxu0 %v348_v25 }
  0x2f   : > { %721 = vmatmul.mubr.bf16.gmra.mrb[4].mxu1 %v352_v26 }
  0xf9   : > { %v710_v30 = vpop.f32.mrb[0].mxu0 }
  0xfa   : > { %v718_v31 = vpop.f32.mrb[0].mxu1  ;;  %v476_v34 = vadd.f32 %v710_v30, %v371_v10  ;;  %v467_v36 = vpop.f32.mrb[1].mxu0 }
  0xfb   : > { %v508_v35 = vadd.f32 %v718_v31, %v379_v27  ;;  %v499_v37 = vpop.f32.mrb[1].mxu1  ;;  %v468_v40 = vadd.f32 %v467_v36, %v369_v28  ;;  %v711_v42 = vpop.f32.mrb[2].mxu0 }
  0xfc   : > { %v500_v41 = vadd.f32 %v499_v37, %v377_v29  ;;  %v719_v43 = vpop.f32.mrb[2].mxu1  ;;  %532 = vst [vmem:[%s897_s22 + $0x10] sm:$0xff] %v476_v34  ;;  %v479_v44 = vadd.f32 %v711_v42, %v372_v32  ;;  %v470_v46 = vpop.f32.mrb[3].mxu0 }
  0xfd   : > { %540 = vst [vmem:[%s897_s22 + $0x50] sm:$0xff] %v508_v35  ;;  %v511_v45 = vadd.f32 %v719_v43, %v380_v33  ;;  %v502_v47 = vpop.f32.mrb[3].mxu1  ;;  %530 = vst [vmem:[%s897_s22] sm:$0xff] %v468_v40  ;;  %v471_v48 = vadd.f32 %v470_v46, %v370_v38 }
  0xfe   : > { %538 = vst [vmem:[%s897_s22 + $0x40] sm:$0xff] %v500_v41  ;;  %v503_v49 = vadd.f32 %v502_v47, %v378_v39  ;;  %533 = vst [vmem:[%s897_s22 + $0x18] sm:$0xff] %v479_v44 }
  0xff   : > { %541 = vst [vmem:[%s897_s22 + $0x58] sm:$0xff] %v511_v45  ;;  %531 = vst [vmem:[%s897_s22 + $0x8] sm:$0xff] %v471_v48 }
 0x100   : > { %539 = vst [vmem:[%s897_s22 + $0x48] sm:$0xff] %v503_v49 }
 0x101   : > { %v714_v54 = vpop.f32.mrb[4].mxu0 }
 0x102   : > { %v722_v55 = vpop.f32.mrb[4].mxu1  ;;  %v492_v58 = vadd.f32 %v714_v54, %v375_v50  ;;  %v483_v60 = vpop.f32.mrb[5].mxu0 }
 0x103   : > { %v524_v59 = vadd.f32 %v722_v55, %v383_v51  ;;  %v515_v61 = vpop.f32.mrb[5].mxu1  ;;  %v484_v0 = vadd.f32 %v483_v60, %v373_v52  ;;  %v715_v2 = vpop.f32.mrb[6].mxu0 }
 0x104   : > { %v516_v1 = vadd.f32 %v515_v61, %v381_v53  ;;  %v723_v3 = vpop.f32.mrb[6].mxu1  ;;  %536 = vst [vmem:[%s897_s22 + $0x30] sm:$0xff] %v492_v58  ;;  %v495_v4 = vadd.f32 %v715_v2, %v376_v56  ;;  %v486_v7 = vpop.f32.mrb[7].mxu0 }
 0x105   : > { %544 = vst [vmem:[%s897_s22 + $0x70] sm:$0xff] %v524_v59  ;;  %v527_v6 = vadd.f32 %v723_v3, %v384_v57  ;;  %v518_v8 = vpop.f32.mrb[7].mxu1  ;;  %534 = vst [vmem:[%s897_s22 + $0x20] sm:$0xff] %v484_v0  ;;  %v487_v9 = vadd.f32 %v486_v7, %v374_v62 }
 0x106   : > { %542 = vst [vmem:[%s897_s22 + $0x60] sm:$0xff] %v516_v1  ;;  %v519_v11 = vadd.f32 %v518_v8, %v382_v63  ;;  %537 = vst [vmem:[%s897_s22 + $0x38] sm:$0xff] %v495_v4 }
 0x107   : > { %545 = vst [vmem:[%s897_s22 + $0x78] sm:$0xff] %v527_v6  ;;  %535 = vst [vmem:[%s897_s22 + $0x28] sm:$0xff] %v487_v9 }
 0x108   : > { %543 = vst [vmem:[%s897_s22 + $0x68] sm:$0xff] %v519_v11 }
 0x109 PF: > { %s15_s18 = sadd.s32 1, %s762_s18  }
 0x10a   : > { %p12_p4 = scmp.ge.s32.totalorder %s15_s18, 6  }
 0x10c   :  { %14 = sbr.rel (!%p12_p4) target bundleno = 1 (0x1), region = 73 }

// kernel: _lambda_.5
= control target key start
LH: loop header
LB: loop body
LE: loop exit
PB: predicated region body
PF: predicated region fallthrough
CT: control target
= control target key end

     0   :  { %s942_s21 = smov 0   ;;  %s1071_s0 = inlined_call_operand.vmem [shape: f32[512,128], index: 0, kind: input, shape index: {}]   ;;  %s1072_s1 = inlined_call_operand.vmem [shape: f32[1,128], index: 1, kind: input, shape index: {}]   ;;  %s1073_s2 = inlined_call_operand.vmem [shape: f32[1,128], index: 2, kind: input, shape index: {}]   ;;  %s1074_s3 = inlined_call_operand.vmem [shape: bf16[128,128], index: 3, kind: input, shape index: {}]   ;;  %s1075_s4 = inlined_call_operand.vmem [shape: bf16[512,128], index: 4, kind: output, shape index: {0}]   ;;  %s1076_s5 = inlined_call_operand.vmem [shape: f32[1,128], index: 5, kind: output, shape index: {1}]   ;;  %s1077_s6 = inlined_call_operand.vmem [shape: f32[1,128], index: 6, kind: output, shape index: {2}]  }
   0x1 LB: > { %s716_s22 = sadd.s32 4294967295, %s904_s21   ;;  %p720_p0 = scmp.ge.s32.totalorder %s904_s21, 1  ;;  %s904_s21 = sphi %s942_s21, %s17_s21  }
   0x2   : > { %p208_p1 = scmp.lt.s32.totalorder %s904_s21, 5 }
   0x4   : > { %p209_p2 = pnand %p720_p0, %p208_p1 }
   0x5   : > { %s721_s23 = sshll.u32 (!%p209_p2), %s716_s22, 4  ;;  %p725_p4 = scmp.ne.s32.totalorder (!%p209_p2), %s716_s22, 0 }
   0x6   : > { %212 = sbr.rel (%p209_p2) target bundleno = 315 (0x13b), region = 36  ;;  %p239_p3 = scmp.lt.s32.totalorder (!%p209_p2), %s721_s23, 63 }
   0xd   : > { %s1079_s23 = smov (!%p239_p3, %s721_s23), 63  ;;  %254 = sbr.rel (%p725_p4) target bundleno = 20 (0x14), region = 40 }
   0xe   : > { %s722_s24 = sshll.u32 %s1079_s23, 3  ;;  %s724_s25 = sshll.u32 %s1079_s23, 2  ;;  %v906_v0 = vmov (!%p725_p4), 0.0  }
   0xf   : > { %s953_s28 = scalar_lea.vmem %s1071_s0, %s722_s24  ;;  %s958_s7 = scalar_lea.vmem %s1075_s4, %s724_s25  ;;  %255 = vst [vmem:[%s1076_s5] sm:$0x1] (!%p725_p4), %v906_v0  ;;  %256 = vst [vmem:[%s1077_s6] sm:$0x1] (!%p725_p4), %v906_v0 }
  0x14 PF: > { %v890_v1 = vld [vmem:[%s1074_s3] sm:$0xff]   ;;  %v891_v2 = vld [vmem:[%s1074_s3 + $0x8] sm:$0xff]   ;;  %v892_v3 = vld [vmem:[%s1074_s3 + $0x10] sm:$0xff]  }
  0x15   : > { %833 = vmatprep.subr.bf16.mxu0 %v890_v1  ;;  %865 = vmatprep.subr.bf16.mxu1 %v890_v1  ;;  %v893_v4 = vld [vmem:[%s1074_s3 + $0x18] sm:$0xff]   ;;  %v257_v5 = vld [vmem:[%s953_s28] sm:$0xff]  ;;  %v258_v6 = vld [vmem:[%s953_s28 + $0x8] sm:$0xff] }
  0x16   : > { %834 = vmatpush3.bf16.msra.mxu0 %v890_v1  ;;  %873 = vmatpush3.bf16.msra.mxu1 %v890_v1  ;;  %v983_v7 = vld [vmem:[%s1072_s1] ss:$0 sm:$0xff]  ;;  %v266_v17 = vld [vmem:[%s953_s28 + $0x48] sm:$0xff]  ;;  %v259_v19 = vld [vmem:[%s953_s28 + $0x10] sm:$0xff] }
  0x17   : > { %835 = vmatprep.subr.bf16.mxu0 %v891_v2  ;;  %866 = vmatprep.subr.bf16.mxu1 %v891_v2  ;;  %v280_v8 = vmul.f32 %v983_v7, %v257_v5  ;;  %v281_v9 = vmul.f32 %v983_v7, %v258_v6  ;;  %v990_v10 = vld [vmem:[%s1073_s2] ss:$0 sm:$0xff]  ;;  %v895_v18 = vld [vmem:[%s1074_s3 + $0x28] sm:$0xff]   ;;  %v260_v20 = vld [vmem:[%s953_s28 + $0x18] sm:$0xff]  ;;  %v289_v27 = vmul.f32 %v983_v7, %v266_v17 }
  0x18   : > { %v894_v13 = vld [vmem:[%s1074_s3 + $0x20] sm:$0xff]   ;;  %v267_v24 = vld [vmem:[%s953_s28 + $0x50] sm:$0xff]  ;;  %v268_v25 = vld [vmem:[%s953_s28 + $0x58] sm:$0xff]  ;;  %v282_v30 = vmul.f32 %v983_v7, %v259_v19  ;;  %v283_v31 = vmul.f32 %v983_v7, %v260_v20 }
  0x19   : > { %v303_v11 = vadd.f32 %v990_v10, %v280_v8  ;;  %v304_v12 = vadd.f32 %v990_v10, %v281_v9  ;;  %v265_v14 = vld [vmem:[%s953_s28 + $0x40] sm:$0xff]  ;;  %v262_v26 = vld [vmem:[%s953_s28 + $0x28] sm:$0xff]  ;;  %v312_v34 = vadd.f32 %v990_v10, %v289_v27  ;;  %v290_v35 = vmul.f32 %v983_v7, %v267_v24  ;;  %v896_v41 = vld [vmem:[%s1074_s3 + $0x30] sm:$0xff]  }
  0x1a   : > { %836 = vmatpush3.bf16.msra.mxu0 %v891_v2  ;;  %874 = vmatpush3.bf16.msra.mxu1 %v891_v2  ;;  %v261_v22 = vld [vmem:[%s953_s28 + $0x20] sm:$0xff]  ;;  %v288_v23 = vmul.f32 %v983_v7, %v265_v14  ;;  %v270_v29 = vld [vmem:[%s953_s28 + $0x68] sm:$0xff]  ;;  %v291_v36 = vmul.f32 %v983_v7, %v268_v25  ;;  %v285_v37 = vmul.f32 %v983_v7, %v262_v26  ;;  %v263_v46 = vld [vmem:[%s953_s28 + $0x30] sm:$0xff] }
  0x1b   : > { %837 = vmatprep.subr.bf16.mxu0 %v892_v3  ;;  %867 = vmatprep.subr.bf16.mxu1 %v892_v3  ;;  %v319_v15 = vmax.f32 %v303_v11, 0.0  ;;  %v320_v16 = vmax.f32 %v304_v12, 0.0  ;;  %v269_v28 = vld [vmem:[%s953_s28 + $0x60] sm:$0xff]  ;;  %v284_v33 = vmul.f32 %v983_v7, %v261_v22  ;;  %v293_v40 = vmul.f32 %v983_v7, %v270_v29  ;;  %v264_v47 = vld [vmem:[%s953_s28 + $0x38] sm:$0xff]  ;;  %v271_v54 = vld [vmem:[%s953_s28 + $0x70] sm:$0xff] }
  0x1c   : > { %v311_v32 = vadd.f32 %v990_v10, %v288_v23  ;;  %v292_v39 = vmul.f32 %v983_v7, %v269_v28  ;;  %v328_v42 = vmax.f32 %v312_v34, 0.0  ;;  %v305_v43 = vadd.f32 %v990_v10, %v282_v30  ;;  %v272_v55 = vld [vmem:[%s953_s28 + $0x78] sm:$0xff] }
  0x1d   : > { %v335_v21 = vpack.c.bf16 %v320_v16, %v319_v15  ;;  %v306_v44 = vadd.f32 %v990_v10, %v283_v31  ;;  %v307_v45 = vadd.f32 %v990_v10, %v284_v33  ;;  %v313_v49 = vadd.f32 %v990_v10, %v290_v35  ;;  %v897_v56 = vld [vmem:[%s1074_s3 + $0x38] sm:$0xff]  }
  0x1e   : > { %838 = vmatpush3.bf16.msra.mxu0 %v892_v3  ;;  %875 = vmatpush3.bf16.msra.mxu1 %v892_v3  ;;  %v327_v38 = vmax.f32 %v311_v32, 0.0  ;;  %v314_v50 = vadd.f32 %v990_v10, %v291_v36  ;;  %v308_v51 = vadd.f32 %v990_v10, %v285_v37  ;;  %v315_v52 = vadd.f32 %v990_v10, %v292_v39 }
  0x1f   : > { %839 = vmatprep.subr.bf16.mxu0 %v893_v4  ;;  %868 = vmatprep.subr.bf16.mxu1 %v893_v4  ;;  %v316_v53 = vadd.f32 %v990_v10, %v293_v40  ;;  %v321_v57 = vmax.f32 %v305_v43, 0.0  ;;  %v322_v58 = vmax.f32 %v306_v44, 0.0  ;;  %v286_v59 = vmul.f32 %v983_v7, %v263_v46 }
  0x20   : > { %849 = vmatprep.mubr.bf16.mxu0 %v335_v21  ;;  %v339_v48 = vpack.c.bf16 %v328_v42, %v327_v38  ;;  %v287_v60 = vmul.f32 %v983_v7, %v264_v47  ;;  %v329_v61 = vmax.f32 %v313_v49, 0.0  ;;  %v330_v62 = vmax.f32 %v314_v50, 0.0 }
  0x21   : > { %v294_v63 = vmul.f32 %v983_v7, %v271_v54  ;;  %v295_v0 = vmul.f32 %v983_v7, %v272_v55  ;;  %v323_v1 = vmax.f32 %v307_v45, 0.0  ;;  %v324_v2 = vmax.f32 %v308_v51, 0.0 }
  0x22   : > { %840 = vmatpush3.bf16.msra.mxu0 %v893_v4  ;;  %876 = vmatpush3.bf16.msra.mxu1 %v893_v4  ;;  %v331_v3 = vmax.f32 %v315_v52, 0.0  ;;  %v332_v4 = vmax.f32 %v316_v53, 0.0  ;;  %v336_v5 = vpack.c.bf16 %v322_v58, %v321_v57  ;;  %v309_v6 = vadd.f32 %v990_v10, %v286_v59 }
  0x23   : > { %841 = vmatprep.subr.bf16.mxu0 %v894_v13  ;;  %869 = vmatprep.subr.bf16.mxu1 %v894_v13  ;;  %v310_v8 = vadd.f32 %v990_v10, %v287_v60  ;;  %v340_v9 = vpack.c.bf16 %v330_v62, %v329_v61  ;;  %v317_v11 = vadd.f32 %v990_v10, %v294_v63 }
  0x24   : > { %857 = vmatprep.mubr.bf16.mxu1 %v339_v48  ;;  %v318_v12 = vadd.f32 %v990_v10, %v295_v0  ;;  %v337_v7 = vpack.c.bf16 %v324_v2, %v323_v1  ;;  %v325_v14 = vmax.f32 %v309_v6, 0.0 }
  0x25   : > { %v326_v15 = vmax.f32 %v310_v8, 0.0  ;;  %v333_v16 = vmax.f32 %v317_v11, 0.0 }
  0x26   : > { %842 = vmatpush3.bf16.msra.mxu0 %v894_v13  ;;  %877 = vmatpush3.bf16.msra.mxu1 %v894_v13  ;;  %v341_v13 = vpack.c.bf16 %v332_v4, %v331_v3  ;;  %v334_v17 = vmax.f32 %v318_v12, 0.0 }
  0x27   : > { %843 = vmatprep.subr.bf16.mxu0 %v895_v18  ;;  %870 = vmatprep.subr.bf16.mxu1 %v895_v18 }
  0x28   : > { %v342_v19 = vpack.c.bf16 %v334_v17, %v333_v16 }
  0x2a   : > { %844 = vmatpush3.bf16.msra.mxu0 %v895_v18  ;;  %878 = vmatpush3.bf16.msra.mxu1 %v895_v18  ;;  %v338_v18 = vpack.c.bf16 %v326_v15, %v325_v14 }
  0x2b   : > { %845 = vmatprep.subr.bf16.mxu0 %v896_v41  ;;  %871 = vmatprep.subr.bf16.mxu1 %v896_v41 }
  0x2e   : > { %846 = vmatpush3.bf16.msra.mxu0 %v896_v41  ;;  %879 = vmatpush3.bf16.msra.mxu1 %v896_v41 }
  0x2f   : > { %847 = vmatprep.subr.bf16.mxu0 %v897_v56  ;;  %872 = vmatprep.subr.bf16.mxu1 %v897_v56 }
  0x32   : > { %848 = vmatpush3.bf16.msra.mxu0 %v897_v56  ;;  %880 = vmatpush3.bf16.msra.mxu1 %v897_v56 }
  0x35   : > { %850 = vmatmul.mubr.bf16.vlgmr.msra.gmra.mrb[0].mxu0 %v336_v5  ;;  %858 = vmatmul.mubr.bf16.vlgmr.msra.gmra.mrb[0].mxu1 %v340_v9 }
  0x36   : > { %853 = vmatprep.mubr.bf16.mxu0 %v337_v7  ;;  %861 = vmatprep.mubr.bf16.mxu1 %v341_v13 }
  0x3d   : > { %854 = vmatmul.mubr.bf16.gmra.mrb[4].mxu0 %v338_v18  ;;  %862 = vmatmul.mubr.bf16.gmra.mrb[4].mxu1 %v342_v19 }
 0x108   : > { %v851_v20 = vpop.f32.mrb[0].mxu0  ;;  %v859_v10 = vpop.f32.mrb[0].mxu1 }
 0x109   : > { %v441_v21 = vpop.f32.mrb[1].mxu0  ;;  %v473_v22 = vpop.f32.mrb[1].mxu1  ;;  %v611_v34 = vmul.f32 %v851_v20, %v851_v20  ;;  %v619_v6 = vmul.f32 %v859_v10, %v859_v10 }
 0x10a   : > { %v852_v23 = vpop.f32.mrb[2].mxu0  ;;  %v860_v24 = vpop.f32.mrb[2].mxu1  ;;  %v609_v25 = vmul.f32 %v441_v21, %v441_v21  ;;  %v617_v0 = vmul.f32 %v473_v22, %v473_v22 }
 0x10b   : > { %v778_v26 = vpack.c.bf16 %v852_v23, %v851_v20  ;;  %v444_v27 = vpop.f32.mrb[3].mxu0  ;;  %v798_v28 = vpack.c.bf16 %v860_v24, %v859_v10  ;;  %v476_v29 = vpop.f32.mrb[3].mxu1  ;;  %v612_v37 = vmul.f32 %v852_v23, %v852_v23  ;;  %v620_v11 = vmul.f32 %v860_v24, %v860_v24 }
 0x10c   : > { %v773_v30 = vpack.c.bf16 %v444_v27, %v441_v21  ;;  %v585_v31 = vadd.f32 %v444_v27, %v441_v21  ;;  %v610_v32 = vmul.f32 %v444_v27, %v444_v27  ;;  %v793_v33 = vpack.c.bf16 %v476_v29, %v473_v22 }
 0x10d   : > { %810 = vst [vmem:[%s958_s7 + $0x8] sm:$0xff] %v778_v26   ;;  %814 = vst [vmem:[%s958_s7 + $0x28] sm:$0xff] %v798_v28   ;;  %v618_v5 = vmul.f32 %v476_v29, %v476_v29 }
 0x10e   : > { %774 = vst [vmem:[%s958_s7] sm:$0xff] %v773_v30   ;;  %v586_v35 = vadd.f32 %v851_v20, %v585_v31  ;;  %v625_v36 = vadd.f32 %v610_v32, %v609_v25  ;;  %813 = vst [vmem:[%s958_s7 + $0x20] sm:$0xff] %v793_v33  }
 0x110   : > { %v626_v38 = vadd.f32 %v625_v36, %v611_v34  ;;  %v855_v39 = vpop.f32.mrb[4].mxu0  ;;  %v587_v40 = vadd.f32 %v852_v23, %v586_v35  ;;  %v863_v41 = vpop.f32.mrb[4].mxu1  ;;  %v584_v34 = vld [vmem:[%s1076_s5] sm:$0x1] }
 0x111   : > { %v457_v42 = vpop.f32.mrb[5].mxu0  ;;  %v489_v43 = vpop.f32.mrb[5].mxu1  ;;  %v615_v58 = vmul.f32 %v855_v39, %v855_v39  ;;  %v623_v19 = vmul.f32 %v863_v41, %v863_v41 }
 0x112   : > { %v588_v44 = vadd.f32 %v587_v40, %v457_v42  ;;  %v613_v45 = vmul.f32 %v457_v42, %v457_v42  ;;  %v627_v46 = vadd.f32 %v626_v38, %v612_v37  ;;  %v856_v47 = vpop.f32.mrb[6].mxu0  ;;  %v864_v48 = vpop.f32.mrb[6].mxu1  ;;  %v621_v13 = vmul.f32 %v489_v43, %v489_v43  ;;  %v608_v37 = vld [vmem:[%s1077_s6] sm:$0x1] }
 0x113   : > { %v788_v49 = vpack.c.bf16 %v856_v47, %v855_v39  ;;  %v460_v50 = vpop.f32.mrb[7].mxu0  ;;  %v808_v51 = vpack.c.bf16 %v864_v48, %v863_v41  ;;  %v492_v52 = vpop.f32.mrb[7].mxu1  ;;  %v616_v61 = vmul.f32 %v856_v47, %v856_v47 }
 0x114   : > { %v628_v53 = vadd.f32 %v627_v46, %v613_v45  ;;  %v783_v54 = vpack.c.bf16 %v460_v50, %v457_v42  ;;  %v589_v55 = vadd.f32 %v588_v44, %v460_v50  ;;  %v614_v56 = vmul.f32 %v460_v50, %v460_v50 }
 0x115   : > { %812 = vst [vmem:[%s958_s7 + $0x18] sm:$0xff] %v788_v49   ;;  %816 = vst [vmem:[%s958_s7 + $0x38] sm:$0xff] %v808_v51   ;;  %v803_v57 = vpack.c.bf16 %v492_v52, %v489_v43  ;;  %v622_v18 = vmul.f32 %v492_v52, %v492_v52 }
 0x116   : > { %811 = vst [vmem:[%s958_s7 + $0x10] sm:$0xff] %v783_v54   ;;  %v590_v59 = vadd.f32 %v855_v39, %v589_v55  ;;  %v629_v60 = vadd.f32 %v628_v53, %v614_v56 }
 0x117   : > { %815 = vst [vmem:[%s958_s7 + $0x30] sm:$0xff] %v803_v57  }
 0x118   : > { %v630_v62 = vadd.f32 %v629_v60, %v615_v58  ;;  %v591_v63 = vadd.f32 %v856_v47, %v590_v59 }
 0x11a   : > { %v592_v1 = vadd.f32 %v591_v63, %v473_v22  ;;  %v631_v2 = vadd.f32 %v630_v62, %v616_v61  ;;  %v624_v22 = vmul.f32 %v864_v48, %v864_v48 }
 0x11c   : > { %v632_v3 = vadd.f32 %v631_v2, %v617_v0  ;;  %v593_v4 = vadd.f32 %v592_v1, %v476_v29 }
 0x11e   : > { %v594_v8 = vadd.f32 %v859_v10, %v593_v4  ;;  %v633_v9 = vadd.f32 %v632_v3, %v618_v5 }
 0x120   : > { %v634_v12 = vadd.f32 %v633_v9, %v619_v6  ;;  %v595_v7 = vadd.f32 %v860_v24, %v594_v8 }
 0x122   : > { %v596_v14 = vadd.f32 %v595_v7, %v489_v43  ;;  %v635_v15 = vadd.f32 %v634_v12, %v620_v11 }
 0x124   : > { %v636_v16 = vadd.f32 %v635_v15, %v621_v13  ;;  %v597_v17 = vadd.f32 %v596_v14, %v492_v52 }
 0x126   : > { %v598_v20 = vadd.f32 %v863_v41, %v597_v17  ;;  %v637_v21 = vadd.f32 %v636_v16, %v622_v18 }
 0x128   : > { %v599_v23 = vadd.f32 %v864_v48, %v598_v20  ;;  %v638_v25 = vadd.f32 %v637_v21, %v623_v19 }
 0x12a   : > { %v600_v26 = vrot.slane %v599_v23, 4  ;;  %v639_v27 = vadd.f32 %v638_v25, %v624_v22 }
 0x12c   : > { %v601_v28 = vadd.f32 %v600_v26, %v599_v23  ;;  %v640_v10 = vrot.slane %v639_v27, 4 }
 0x12e   : > { %v602_v29 = vrot.slane %v601_v28, 2  ;;  %v641_v30 = vadd.f32 %v640_v10, %v639_v27 }
 0x130   : > { %v603_v31 = vadd.f32 %v602_v29, %v601_v28  ;;  %v642_v24 = vrot.slane %v641_v30, 2 }
 0x132   : > { %v604_v32 = vrot.slane %v603_v31, 1  ;;  %v643_v33 = vadd.f32 %v642_v24, %v641_v30 }
 0x134   : > { %v605_v35 = vadd.f32 %v604_v32, %v603_v31  ;;  %v644_v36 = vrot.slane %v643_v33, 1 }
 0x136   : > { %v606_v38 = vadd.f32 %v605_v35, %v584_v34  ;;  %v645_v39 = vadd.f32 %v644_v36, %v643_v33 }
 0x138   : > { %607 = vst [vmem:[%s1076_s5] sm:$0x1] %v606_v38  ;;  %v646_v40 = vadd.f32 %v645_v39, %v608_v37 }
 0x13a   : > { %647 = vst [vmem:[%s1077_s6] sm:$0x1] %v646_v40 }
 0x13b PF: > { %s17_s21 = sadd.s32 1, %s904_s21  }
 0x13c   : > { %p14_p5 = scmp.ge.s32.totalorder %s17_s21, 6  }
 0x13e   :  { %16 = sbr.rel (!%p14_p5) target bundleno = 1 (0x1), region = 86 }

// kernel: _lambda_.6
= control target key start
LH: loop header
LB: loop body
LE: loop exit
PB: predicated region body
PF: predicated region fallthrough
CT: control target
= control target key end

     0   :  { %s7590_s21 = smov 0   ;;  %s9040_s0 = inlined_call_operand.vmem [shape: bf16[2,16,16,128], index: 0, kind: input, shape index: {}]   ;;  %s9041_s1 = inlined_call_operand.vmem [shape: f32[1,128], index: 1, kind: input, shape index: {}]   ;;  %s9042_s2 = inlined_call_operand.vmem [shape: f32[1,128], index: 2, kind: input, shape index: {}]   ;;  %s9043_s3 = inlined_call_operand.vmem [shape: bf16[9,128,128], index: 3, kind: input, shape index: {}]   ;;  %s9044_s4 = inlined_call_operand.vmem [shape: bf16[2,256,128], index: 4, kind: output, shape index: {0}]   ;;  %s9045_s5 = inlined_call_operand.vmem [shape: f32[1,128], index: 5, kind: output, shape index: {1}]   ;;  %s9046_s6 = inlined_call_operand.vmem [shape: f32[1,128], index: 6, kind: output, shape index: {2}]  }
   0x1 LB: > { %s5750_s22 = sadd.s32 4294967295, %s7551_s21   ;;  %p5754_p0 = scmp.ge.s32.totalorder %s7551_s21, 1  ;;  %s7551_s21 = sphi %s7590_s21, %s17_s21  }
   0x2   : > { %p207_p1 = scmp.lt.s32.totalorder %s7551_s21, 3 }
   0x4   : > { %p208_p2 = pnand %p5754_p0, %p207_p1 }
   0x6   : > { %211 = sbr.rel (%p208_p2) target bundleno = 642 (0x282), region = 36 }
   0xd   : > { %p237_p3 = scmp.lt.s32.totalorder %s5750_s22, 1  ;;  %p5759_p4 = scmp.ne.s32.totalorder %s5750_s22, 0 }
   0xe   : > { %v7553_v0 = vmov (!%p5759_p4), 0.0   ;;  %v7554_v1 = vmov (!%p5759_p4), 0  }
   0xf   : > { %s238_s23 = scalar_select %p237_p3, %s5750_s22, 1 }
  0x10   : > { %251 = sbr.rel (%p5759_p4) target bundleno = 44 (0x2c), region = 40  ;;  %252 = vst [vmem:[%s9045_s5] sm:$0x1] (!%p5759_p4), %v7553_v0  ;;  %253 = vst [vmem:[%s9046_s6] sm:$0x1] (!%p5759_p4), %v7553_v0 }
  0x11   : > { %s6204_s24 = sshll.u32 %s238_s23, 7  ;;  %254 = vst [vmem:[#allocation2] sm:$0xf] (!%p5759_p4), %v7554_v1  ;;  %255 = vst [vmem:[#allocation2 + $0x4] sm:$0xf] (!%p5759_p4), %v7554_v1 }
  0x12   : > { %s7601_s27 = scalar_lea.vmem %s9040_s0, %s6204_s24  ;;  %s7606_s30 = scalar_lea.vmem %s9044_s4, %s6204_s24  ;;  %256 = vst [vmem:[#allocation2 + $0x8] sm:$0x1] (!%p5759_p4), %v7554_v1  ;;  %257 = vst [vmem:[#allocation2 + $0xc] sm:$0xf] (!%p5759_p4), %v7554_v1 }
  0x13   : > { %258 = vst [vmem:[#allocation2 + $0x10] sm:$0xf] (!%p5759_p4), %v7554_v1  ;;  %259 = vst [vmem:[#allocation2 + $0x14] sm:$0x1] (!%p5759_p4), %v7554_v1 }
  0x14   : > { %260 = vst [vmem:[#allocation2 + $0x18] sm:$0xf] (!%p5759_p4), %v7554_v1  ;;  %261 = vst [vmem:[#allocation2 + $0x1c] sm:$0xf] (!%p5759_p4), %v7554_v1 }
  0x15   : > { %262 = vst [vmem:[#allocation2 + $0x20] sm:$0x1] (!%p5759_p4), %v7554_v1  ;;  %263 = vst [vmem:[#allocation2 + $0x24] sm:$0xf] (!%p5759_p4), %v7554_v1 }
  0x16   : > { %264 = vst [vmem:[#allocation2 + $0x28] sm:$0xf] (!%p5759_p4), %v7554_v1  ;;  %265 = vst [vmem:[#allocation2 + $0x2c] sm:$0x1] (!%p5759_p4), %v7554_v1 }
  0x17   : > { %266 = vst [vmem:[#allocation2 + $0x30] sm:$0xf] %v7554_v1  ;;  %267 = vst [vmem:[#allocation2 + $0x34] sm:$0xf] %v7554_v1 }
  0x18   : > { %268 = vst [vmem:[#allocation2 + $0x38] sm:$0x1] %v7554_v1  ;;  %269 = vst [vmem:[#allocation2 + $0x3c] sm:$0xf] %v7554_v1 }
  0x19   : > { %270 = vst [vmem:[#allocation2 + $0x40] sm:$0xf] %v7554_v1  ;;  %271 = vst [vmem:[#allocation2 + $0x44] sm:$0x1] %v7554_v1 }
  0x1a   : > { %272 = vst [vmem:[#allocation2 + $0x48] sm:$0xf] %v7554_v1  ;;  %273 = vst [vmem:[#allocation2 + $0x4c] sm:$0xf] %v7554_v1 }
  0x1b   : > { %274 = vst [vmem:[#allocation2 + $0x50] sm:$0x1] %v7554_v1  ;;  %275 = vst [vmem:[#allocation2 + $0x54] sm:$0xf] %v7554_v1 }
  0x1c   : > { %276 = vst [vmem:[#allocation2 + $0x58] sm:$0xf] %v7554_v1  ;;  %277 = vst [vmem:[#allocation2 + $0x5c] sm:$0x1] %v7554_v1 }
  0x1d   : > { %278 = vst [vmem:[#allocation2 + $0x60] sm:$0xf] %v7554_v1  ;;  %279 = vst [vmem:[#allocation2 + $0x64] sm:$0xf] %v7554_v1 }
  0x1e   : > { %280 = vst [vmem:[#allocation2 + $0x68] sm:$0x1] %v7554_v1  ;;  %281 = vst [vmem:[#allocation2 + $0x6c] sm:$0xf] %v7554_v1 }
  0x1f   : > { %282 = vst [vmem:[#allocation2 + $0x70] sm:$0xf] %v7554_v1  ;;  %283 = vst [vmem:[#allocation2 + $0x74] sm:$0x1] %v7554_v1 }
  0x20   : > { %284 = vst [vmem:[#allocation2 + $0x78] sm:$0xf] %v7554_v1  ;;  %285 = vst [vmem:[#allocation2 + $0x7c] sm:$0xf] %v7554_v1 }
  0x21   : > { %286 = vst [vmem:[#allocation2 + $0x80] sm:$0x1] %v7554_v1  ;;  %287 = vst [vmem:[#allocation2 + $0x84] sm:$0xf] %v7554_v1 }
  0x22   : > { %288 = vst [vmem:[#allocation2 + $0x88] sm:$0xf] %v7554_v1  ;;  %289 = vst [vmem:[#allocation2 + $0x8c] sm:$0x1] %v7554_v1 }
  0x23   : > { %290 = vst [vmem:[#allocation2 + $0x90] sm:$0xf] %v7554_v1  ;;  %291 = vst [vmem:[#allocation2 + $0x94] sm:$0xf] %v7554_v1 }
  0x24   : > { %292 = vst [vmem:[#allocation2 + $0x98] sm:$0x1] %v7554_v1  ;;  %293 = vst [vmem:[#allocation2 + $0x9c] sm:$0xf] %v7554_v1 }
  0x25   : > { %294 = vst [vmem:[#allocation2 + $0xa0] sm:$0xf] %v7554_v1  ;;  %295 = vst [vmem:[#allocation2 + $0xa4] sm:$0x1] %v7554_v1 }
  0x26   : > { %296 = vst [vmem:[#allocation2 + $0xa8] sm:$0xf] %v7554_v1  ;;  %297 = vst [vmem:[#allocation2 + $0xac] sm:$0xf] %v7554_v1 }
  0x27   : > { %298 = vst [vmem:[#allocation2 + $0xb0] sm:$0x1] %v7554_v1  ;;  %299 = vst [vmem:[#allocation2 + $0xb4] sm:$0xf] %v7554_v1 }
  0x28   : > { %300 = vst [vmem:[#allocation2 + $0xb8] sm:$0xf] %v7554_v1  ;;  %301 = vst [vmem:[#allocation2 + $0xbc] sm:$0x1] %v7554_v1 }
  0x29   : > { %302 = vst [vmem:[#allocation2 + $0xc0] sm:$0xf] %v7554_v1  ;;  %303 = vst [vmem:[#allocation2 + $0xc4] sm:$0xf] %v7554_v1 }
  0x2a   : > { %304 = vst [vmem:[#allocation2 + $0xc8] sm:$0x1] %v7554_v1  ;;  %305 = vst [vmem:[#allocation2 + $0xcc] sm:$0xf] %v7554_v1 }
  0x2b   : > { %306 = vst [vmem:[#allocation2 + $0xd0] sm:$0xf] %v7554_v1  ;;  %307 = vst [vmem:[#allocation2 + $0xd4] sm:$0x1] %v7554_v1 }
  0x2c PF: > { %v7374_v2 = vld [vmem:[%s9043_s3] sm:$0xff]   ;;  %v7376_v4 = vld [vmem:[%s9043_s3 + $0x8] sm:$0xff]   ;;  %v7378_v6 = vld [vmem:[%s9043_s3 + $0x10] sm:$0xff]   ;;  %vm902_vm0 = vcmask 1043456   ;;  %vm578_vm1 = vsmask.f32 256 }
  0x2d   : > { %v7375_v3 = vld [vmem:[%s9043_s3 + $0xc0] sm:$0xff]   ;;  %6660 = vmatprep.subr.bf16.mxu1 %v7374_v2  ;;  %v7377_v5 = vld [vmem:[%s9043_s3 + $0xc8] sm:$0xff]   ;;  %v7379_v7 = vld [vmem:[%s9043_s3 + $0xd0] sm:$0xff]   ;;  %vm909_vm2 = vcmask 1040384   ;;  %vm579_vm3 = vsmask.f32 4368 }
  0x2e   : > { %6852 = vmatprep.subr.bf16.mxu0 %v7375_v3  ;;  %6661 = vmatpush3.bf16.msra.mxu1 %v7374_v2  ;;  %v7380_v8 = vld [vmem:[%s9043_s3 + $0x18] sm:$0xff]   ;;  %v7382_v10 = vld [vmem:[%s9043_s3 + $0x20] sm:$0xff]   ;;  %v7384_v12 = vld [vmem:[%s9043_s3 + $0x28] sm:$0xff]   ;;  %vm903_vm4 = vsmask.f32 7938  ;;  %vm2419_vm8 = vcmask 1042432  }
  0x2f   : > { %6853 = vmatpush3.bf16.msra.mxu0 %v7375_v3  ;;  %6662 = vmatprep.subr.bf16.mxu1 %v7376_v4  ;;  %v7381_v9 = vld [vmem:[%s9043_s3 + $0xd8] sm:$0xff]   ;;  %v7383_v11 = vld [vmem:[%s9043_s3 + $0xe0] sm:$0xff]   ;;  %v7385_v14 = vld [vmem:[%s9043_s3 + $0xe8] sm:$0xff]   ;;  %vm2420_vm9 = vcmask 1046532   ;;  %vm1646_vm11 = vsmask.f32 3328 }
  0x30   : > { %6854 = vmatprep.subr.bf16.mxu0 %v7377_v5  ;;  %v7390_v13 = vld [vmem:[#allocation2] sm:$0xff]   ;;  %v7386_v20 = vld [vmem:[%s9043_s3 + $0x30] sm:$0xff]   ;;  %v6414_v23 = vld [vmem:[%s7601_s27 + $0x8] sm:$0xff]   ;;  %vm1647_vm12 = vsmask.f32 7440 }
  0x31   : > { %v6271_v15 = vld [vmem:[%s7601_s27] sm:$0xff]   ;;  %6676 = vmatprep.mubr.bf16.mxu1 %v7390_v13  ;;  %v7387_v24 = vld [vmem:[%s9043_s3 + $0xf0] sm:$0xff]   ;;  %v6276_v25 = vunpack.c.l.bf16 %v6414_v23  ;;  %v6277_v26 = vunpack.c.h.bf16 %v6414_v23  ;;  %v7388_v27 = vld [vmem:[%s9043_s3 + $0x38] sm:$0xff]  }
  0x32   : > { %6663 = vmatpush3.bf16.msra.mxu1 %v7376_v4  ;;  %v7654_v16 = vld [vmem:[%s9041_s1] ss:$0 sm:$0xff]  ;;  %v6272_v17 = vunpack.c.l.bf16 %v6271_v15  ;;  %v6273_v18 = vunpack.c.h.bf16 %v6271_v15  ;;  %v7389_v32 = vld [vmem:[%s9043_s3 + $0xf8] sm:$0xff]   ;;  %v6415_v35 = vld [vmem:[%s7601_s27 + $0x10] sm:$0xff]  }
  0x33   : > { %6855 = vmatpush3.bf16.msra.mxu0 %v7377_v5  ;;  %6664 = vmatprep.subr.bf16.mxu1 %v7378_v6  ;;  %v7659_v19 = vld [vmem:[%s9042_s2] ss:$0 sm:$0xff]  ;;  %v381_v30 = vmul.f32 %v6276_v25, %v7654_v16  ;;  %v382_v31 = vmul.f32 %v6277_v26, %v7654_v16  ;;  %v6280_v38 = vunpack.c.l.bf16 %v6415_v35  ;;  %v6281_v39 = vunpack.c.h.bf16 %v6415_v35  ;;  %v6416_v40 = vld [vmem:[%s7601_s27 + $0x18] sm:$0xff]   ;;  %vm7716_vm5 = vmor %vm578_vm1, %vm579_vm3 }
  0x34   : > { %6856 = vmatprep.subr.bf16.mxu0 %v7379_v7  ;;  %v379_v21 = vmul.f32 %v6272_v17, %v7654_v16  ;;  %v380_v22 = vmul.f32 %v6273_v18, %v7654_v16  ;;  %v6284_v43 = vunpack.c.l.bf16 %v6416_v40  ;;  %v6285_v44 = vunpack.c.h.bf16 %v6416_v40  ;;  %v7695_v45 = vld [vmem:[%s9043_s3 + $0x100] sm:$0xff]   ;;  %vm7726_vm6 = vmand %vm902_vm0, %vm903_vm4  ;;  %v905_v1 = vld [vmem:[#allocation2 + $0xc] sm:$0xf] }
  0x35   : > { %v420_v36 = vadd.f32 %v7659_v19, %v381_v30  ;;  %v421_v37 = vadd.f32 %v7659_v19, %v382_v31  ;;  %v383_v48 = vmul.f32 %v6280_v38, %v7654_v16  ;;  %v384_v49 = vmul.f32 %v6281_v39, %v7654_v16  ;;  %v7710_v56 = vld [vmem:[%s9043_s3 + $0x140] sm:$0xff]   ;;  %vm7734_vm7 = vmand %vm909_vm2, %vm578_vm1 }
  0x36   : > { %6665 = vmatpush3.bf16.msra.mxu1 %v7378_v6  ;;  %v418_v28 = vadd.f32 %v7659_v19, %v379_v21  ;;  %v419_v29 = vadd.f32 %v7659_v19, %v380_v22  ;;  %v385_v62 = vmul.f32 %v6284_v43, %v7654_v16  ;;  %v386_v63 = vmul.f32 %v6285_v44, %v7654_v16  ;;  %v918_v13 = vld [vmem:[#allocation2 + $0x20] sm:$0x1]  ;;  %vm7908_vm10 = vmor %vm2419_vm8, %vm2420_vm9 }
  0x37   : > { %6857 = vmatpush3.bf16.msra.mxu0 %v7379_v7  ;;  %6666 = vmatprep.subr.bf16.mxu1 %v7380_v8  ;;  %v7697_v46 = vmax.f32 %v420_v36, 0.0  ;;  %v7699_v47 = vmax.f32 %v421_v37, 0.0  ;;  %v422_v57 = vadd.f32 %v7659_v19, %v383_v48  ;;  %v423_v58 = vadd.f32 %v7659_v19, %v384_v49  ;;  %v6417_v22 = vld [vmem:[%s7601_s27 + $0x20] sm:$0xff]   ;;  %v6418_v37 = vld [vmem:[%s7601_s27 + $0x28] sm:$0xff]   ;;  %vm8389_vm13 = vmor %vm1646_vm11, %vm1647_vm12 }
  0x38   : > { %6858 = vmatprep.subr.bf16.mxu0 %v7381_v9  ;;  %v7680_v33 = vmax.f32 %v418_v28, 0.0  ;;  %v7682_v34 = vmax.f32 %v419_v29, 0.0  ;;  %v425_v21 = vadd.f32 %v7659_v19, %v386_v63  ;;  %v6288_v36 = vunpack.c.l.bf16 %v6417_v22  ;;  %v7443_v0 = vld [vmem:[%s9043_s3 + $0x60] sm:$0xff]  }
  0x39   : > { %v6208_v54 = vpack.c.bf16 %v7697_v46, %v7697_v46  ;;  %v6209_v55 = vpack.c.bf16 %v7699_v47, %v7699_v47  ;;  %v7741_v15 = vmax.f32 %v423_v58, 0.0  ;;  %v6289_v44 = vunpack.c.h.bf16 %v6417_v22 }
  0x3a   : > { %6667 = vmatpush3.bf16.msra.mxu1 %v7380_v8  ;;  %v6206_v41 = vpack.c.bf16 %v7680_v33, %v7680_v33  ;;  %v6207_v42 = vpack.c.bf16 %v7682_v34, %v7682_v34  ;;  %v7756_v30 = vmax.f32 %v425_v21, 0.0  ;;  %v387_v48 = vmul.f32 %v6288_v36, %v7654_v16 }
  0x3b   : > { %6859 = vmatpush3.bf16.msra.mxu0 %v7381_v9  ;;  %6668 = vmatprep.subr.bf16.mxu1 %v7382_v10  ;;  %v599_v2 = vshrl.u32 %v6208_v54, 16  ;;  %v602_v3 = vshll.u32 %v6208_v54, 16  ;;  %v607_v4 = vshrl.u32 %v6209_v55, 16  ;;  %v610_v5 = vshll.u32 %v6209_v55, 16  ;;  %v914_v9 = vld [vmem:[#allocation2 + $0x18] sm:$0xf] }
  0x3c   : > { %6860 = vmatprep.subr.bf16.mxu0 %v7383_v11  ;;  %v582_v50 = vshrl.u32 %v6206_v41, 16  ;;  %v585_v51 = vshll.u32 %v6206_v41, 16  ;;  %v590_v52 = vshrl.u32 %v6207_v42, 16  ;;  %v593_v53 = vshll.u32 %v6207_v42, 16  ;;  %v7400_v54 = vld [vmem:[%s9043_s3 + $0x108] sm:$0xff]  }
  0x3d   : > { %v6211_v28 = vpack.c.bf16 %v7741_v15, %v7741_v15  ;;  %v6213_v43 = vpack.c.bf16 %v7756_v30, %v7756_v30 }
  0x3e   : > { %6669 = vmatpush3.bf16.msra.mxu1 %v7382_v10  ;;  %v584_v60 = vrot.slane %v582_v50, 7  ;;  %v7720_v61 = vrot.slane %v590_v52, 7  ;;  %v6292_v52 = vunpack.c.l.bf16 %v6418_v37 }
  0x3f   : > { %6861 = vmatpush3.bf16.msra.mxu0 %v7383_v11  ;;  %6670 = vmatprep.subr.bf16.mxu1 %v7384_v12  ;;  %v601_v11 = vrot.slane %v599_v2, 7  ;;  %v624_v40 = vshrl.u32 %v6211_v28, 16  ;;  %v627_v41 = vshll.u32 %v6211_v28, 16  ;;  %v641_v58 = vshrl.u32 %v6213_v43, 16 }
  0x40   : > { %6862 = vmatprep.subr.bf16.mxu0 %v7385_v14  ;;  %v587_v6 = vor.u32 %v585_v51, %v584_v60  ;;  %v588_v7 = vrot.slane %v584_v60, 4  ;;  %v595_v8 = vor.u32 %v593_v53, %v7720_v61  ;;  %v921_v51 = vld [vmem:[#allocation2 + $0x24] sm:$0xf]  ;;  %v6293_v53 = vunpack.c.h.bf16 %v6418_v37 }
  0x41   : > { %v604_v23 = vor.u32 %v602_v3, %v601_v11  ;;  %v7770_v50 = vrot.slane %v624_v40, 7  ;;  %v644_v60 = vshll.u32 %v6213_v43, 16 }
  0x42   : > { %6671 = vmatpush3.bf16.msra.mxu1 %v7384_v12  ;;  %v609_v12 = vrot.slane %v607_v4, 7  ;;  %v596_v17 = vsel %vm7716_vm5, %v588_v7, %v595_v8  ;;  %v906_v18 = vsel %vm7726_vm6, %v587_v6, %v905_v1  ;;  %v388_v4 = vmul.f32 %v6289_v44, %v7654_v16 }
  0x43   : > { %6863 = vmatpush3.bf16.msra.mxu0 %v7385_v14  ;;  %6672 = vmatprep.subr.bf16.mxu1 %v7386_v20  ;;  %v7739_v14 = vmax.f32 %v422_v57, 0.0  ;;  %907 = vst [vmem:[#allocation2 + $0xc] sm:$0xf] %v906_v18  ;;  %908 = vst [vmem:[#allocation2 + $0x10] sm:$0xf] %v596_v17  ;;  %v629_v3 = vor.u32 %v627_v41, %v7770_v50  ;;  %v426_v6 = vadd.f32 %v7659_v19, %v387_v48 }
  0x44   : > { %6864 = vmatprep.subr.bf16.mxu0 %v7387_v24  ;;  %v612_v25 = vor.u32 %v610_v5, %v609_v12  ;;  %v614_v26 = vrot.slane %v609_v12, 4  ;;  %v389_v7 = vmul.f32 %v6292_v52, %v7654_v16  ;;  %v390_v8 = vmul.f32 %v6293_v53, %v7654_v16  ;;  %v928_v18 = vld [vmem:[#allocation2 + $0x30] sm:$0xf] }
  0x45   : > { %v7788_v17 = vrot.slane %v641_v58, 7  ;;  %v427_v21 = vadd.f32 %v7659_v19, %v388_v4  ;;  %v7791_v22 = vmax.f32 %v426_v6, 0.0  ;;  %v7831_v58 = vld [vmem:[%s9043_s3 + $0x158] sm:$0xff]  }
  0x46   : > { %6673 = vmatpush3.bf16.msra.mxu1 %v7386_v20  ;;  %v424_v20 = vadd.f32 %v7659_v19, %v385_v62  ;;  %v919_v35 = vsel %vm7734_vm7, %v614_v26, %v918_v13  ;;  %v6419_v62 = vld [vmem:[%s7601_s27 + $0x30] sm:$0xff]  }
  0x47   : > { %6865 = vmatpush3.bf16.msra.mxu0 %v7387_v24  ;;  %6674 = vmatprep.subr.bf16.mxu1 %v7388_v27  ;;  %v605_v24 = vrot.slane %v601_v11, 4  ;;  %920 = vst [vmem:[#allocation2 + $0x20] sm:$0x1] %v919_v35  ;;  %v597_v35 = vrot.slane %v7720_v61, 4  ;;  %v7801_v36 = vmax.f32 %v427_v21, 0.0  ;;  %v6214_v37 = vpack.c.bf16 %v7791_v22, %v7791_v22 }
  0x48   : > { %6866 = vmatprep.subr.bf16.mxu0 %v7389_v32  ;;  %v7754_v29 = vmax.f32 %v424_v20, 0.0  ;;  %v6297_v41 = vunpack.c.h.bf16 %v6419_v62 }
  0x49   : > { %v613_v31 = vsel %vm7716_vm5, %v605_v24, %v612_v25  ;;  %v428_v24 = vadd.f32 %v7659_v19, %v389_v7  ;;  %v429_v25 = vadd.f32 %v7659_v19, %v390_v8  ;;  %v650_v43 = vshrl.u32 %v6214_v37, 16 }
  0x4a   : > { %6675 = vmatpush3.bf16.msra.mxu1 %v7388_v27  ;;  %v6210_v27 = vpack.c.bf16 %v7739_v14, %v7739_v14  ;;  %917 = vst [vmem:[#allocation2 + $0x1c] sm:$0xf] %v613_v31  ;;  %v6212_v42 = vpack.c.bf16 %v7754_v29, %v7754_v29  ;;  %v7391_v63 = vld [vmem:[#allocation2 + $0xc] sm:$0xff]   ;;  %v646_v31 = vor.u32 %v644_v60, %v7788_v17  ;;  %v653_v44 = vshll.u32 %v6214_v37, 16 }
  0x4b   : > { %6867 = vmatpush3.bf16.msra.mxu0 %v7389_v32  ;;  %6708 = vmatprep.subr.bf16.mxu1 %v7695_v45  ;;  %v915_v32 = vsel %vm7726_vm6, %v604_v23, %v914_v9  ;;  %v7392_v5 = vld [vmem:[#allocation2 + $0xc] sm:$0xff]   ;;  %v7813_v61 = vmax.f32 %v429_v25, 0.0  ;;  %v392_v53 = vmul.f32 %v6297_v41, %v7654_v16  ;;  %v652_v60 = vrot.slane %v650_v43, 7  ;;  %v942_v25 = vld [vmem:[#allocation2 + $0x48] sm:$0xf] }
  0x4c   : > { %6900 = vmatprep.subr.bf16.mxu0 %v7710_v56  ;;  %916 = vst [vmem:[#allocation2 + $0x18] sm:$0xf] %v915_v32  ;;  %v616_v38 = vshrl.u32 %v6210_v27, 16  ;;  %v619_v39 = vshll.u32 %v6210_v27, 16  ;;  %v633_v55 = vshrl.u32 %v6212_v42, 16  ;;  %v636_v57 = vshll.u32 %v6212_v42, 16  ;;  %6868 = vmatprep.mubr.bf16.mxu0 %v7391_v63 }
  0x4d   : > { %v7396_v9 = vld [vmem:[%s9043_s3 + $0x148] sm:$0xff]   ;;  %6677 = vmatmul.mubr.bf16.vlgmr.msra.gmra.mrb[0].mxu1 %v7392_v5  ;;  %v7407_v23 = vld [vmem:[%s9043_s3 + $0x110] sm:$0xff]   ;;  %v6296_v32 = vunpack.c.l.bf16 %v6419_v62  ;;  %9061 = vst [vmem:[#allocation4_spill] sm:$0xff] %v7813_v61  ;;  %v431_v5 = vadd.f32 %v7659_v19, %v392_v53  ;;  %v631_v7 = vrot.slane %v7770_v50, 4 }
  0x4e   : > { %v618_v49 = vrot.slane %v616_v38, 7  ;;  %v635_v13 = vrot.slane %v633_v55, 7  ;;  %6709 = vmatpush3.bf16.msra.mxu1 %v7695_v45  ;;  %v7805_v38 = vmax.f32 %v428_v24, 0.0  ;;  %v7402_v42 = vld [vmem:[%s9043_s3 + $0x150] sm:$0xff]   ;;  %v7410_v53 = vld [vmem:[%s9043_s3 + $0x168] sm:$0xff]  }
  0x4f   : > { %6710 = vmatprep.subr.bf16.mxu1 %v7400_v54  ;;  %v391_v52 = vmul.f32 %v6296_v32, %v7654_v16 }
  0x50   : > { %v621_v1 = vor.u32 %v619_v39, %v618_v49  ;;  %v622_v2 = vrot.slane %v618_v49, 4  ;;  %v638_v27 = vor.u32 %v636_v57, %v635_v13  ;;  %v639_v28 = vrot.slane %v635_v13, 4  ;;  %9060 = vst [vmem:[#allocation3_spill] sm:$0xff] %v7805_v38  ;;  %v6420_v39 = vld [vmem:[%s7601_s27 + $0x38] sm:$0xff]   ;;  %v911_v57 = vld [vmem:[#allocation2 + $0x14] sm:$0x1] }
  0x51   : > { %v6216_v48 = vpack.c.bf16 %v7805_v38, %v7805_v38  ;;  %v935_v49 = vld [vmem:[#allocation2 + $0x3c] sm:$0xf]  ;;  %v6300_v55 = vunpack.c.l.bf16 %v6420_v39  ;;  %v430_v4 = vadd.f32 %v7659_v19, %v391_v52  ;;  %v6301_v6 = vunpack.c.h.bf16 %v6420_v39 }
  0x52   : > { %v630_v11 = vsel %vm7716_vm5, %v622_v2, %v629_v3  ;;  %v922_v12 = vsel %vm7726_vm6, %v621_v1, %v921_v51  ;;  %v647_v45 = vsel %vm7716_vm5, %v639_v28, %v646_v31  ;;  %v929_v40 = vsel %vm7726_vm6, %v638_v27, %v928_v18  ;;  %6711 = vmatpush3.bf16.msra.mxu1 %v7400_v54  ;;  %v7414_v1 = vld [vmem:[%s9043_s3 + $0x118] sm:$0xff]  }
  0x53   : > { %v7394_v20 = vld [vmem:[#allocation2 + $0x18] sm:$0xff]   ;;  %923 = vst [vmem:[#allocation2 + $0x24] sm:$0xf] %v922_v12  ;;  %924 = vst [vmem:[#allocation2 + $0x28] sm:$0xf] %v630_v11  ;;  %v7824_v51 = vpack.c.bf16 %v7813_v61, %v7813_v61  ;;  %6712 = vmatprep.subr.bf16.mxu1 %v7407_v23  ;;  %v667_v54 = vshrl.u32 %v6216_v48, 16  ;;  %v655_v11 = vor.u32 %v653_v44, %v652_v60 }
  0x54   : > { %v7397_v26 = vld [vmem:[#allocation2 + $0x18] sm:$0xff]   ;;  %6869 = vmatmul.mubr.bf16.vlgmr.msra.gmra.mrb[0].mxu0 %v7394_v20  ;;  %930 = vst [vmem:[#allocation2 + $0x30] sm:$0xf] %v929_v40  ;;  %931 = vst [vmem:[#allocation2 + $0x34] sm:$0xf] %v647_v45  ;;  %v670_v3 = vshll.u32 %v6216_v48, 16  ;;  %v393_v12 = vmul.f32 %v6300_v55, %v7654_v16  ;;  %v912_v13 = vsel %vm7734_vm7, %v597_v35, %v911_v57 }
  0x55   : > { %6901 = vmatpush3.bf16.msra.mxu0 %v7710_v56  ;;  %6680 = vmatprep.mubr.bf16.mxu1 %v7397_v26  ;;  %v6215_v56 = vpack.c.bf16 %v7801_v36, %v7801_v36  ;;  %v669_v20 = vrot.slane %v667_v54, 7  ;;  %v675_v21 = vshrl.u32 %v7824_v51, 16  ;;  %913 = vst [vmem:[#allocation2 + $0x14] sm:$0x1] %v912_v13  ;;  %v936_v24 = vsel %vm7726_vm6, %v655_v11, %v935_v49  ;;  %v7409_v26 = vld [vmem:[%s9043_s3 + $0x160] sm:$0xff]  }
  0x56   : > { %6902 = vmatprep.subr.bf16.mxu0 %v7396_v9  ;;  %6713 = vmatpush3.bf16.msra.mxu1 %v7407_v23  ;;  %v7850_v27 = vmax.f32 %v430_v4, 0.0  ;;  %v7852_v28 = vmax.f32 %v431_v5, 0.0  ;;  %v394_v31 = vmul.f32 %v6301_v6, %v7654_v16  ;;  %v7420_v23 = vld [vmem:[%s9043_s3 + $0x120] sm:$0xff]   ;;  %937 = vst [vmem:[#allocation2 + $0x3c] sm:$0xf] %v936_v24  ;;  %v678_v39 = vshll.u32 %v7824_v51, 16 }
  0x57   : > { %v658_v62 = vshrl.u32 %v6215_v56, 16  ;;  %v661_v63 = vshll.u32 %v6215_v56, 16  ;;  %6714 = vmatprep.subr.bf16.mxu1 %v7414_v1  ;;  %v672_v37 = vor.u32 %v670_v3, %v669_v20  ;;  %v432_v45 = vadd.f32 %v7659_v19, %v393_v12  ;;  %v7861_v40 = vld [vmem:[#allocation2 + $0x10] sm:$0xf]  ;;  %v3242_v5 = vld [vmem:[#allocation2 + $0xc] sm:$0xe] }
  0x58   : > { %9062 = vst [vmem:[#allocation5_spill] sm:$0xff] %v7850_v27  ;;  %9063 = vst [vmem:[#allocation6_spill] sm:$0xff] %v7852_v28  ;;  %v673_v56 = vrot.slane %v669_v20, 4  ;;  %v6218_v43 = vpack.c.bf16 %v7850_v27, %v7850_v27  ;;  %v433_v44 = vadd.f32 %v7659_v19, %v394_v31  ;;  %v7871_v49 = vrot.slane %v675_v21, 7  ;;  %v981_v61 = vld [vmem:[#allocation2 + $0x8c] sm:$0x1] }
  0x59   : > { %6903 = vmatpush3.bf16.msra.mxu0 %v7396_v9  ;;  %v656_v9 = vrot.slane %v652_v60, 4  ;;  %v7842_v18 = vrot.slane %v658_v62, 7  ;;  %v943_v51 = vsel %vm7726_vm6, %v672_v37, %v942_v25  ;;  %v7875_v52 = vmax.f32 %v432_v45, 0.0 }
  0x5a   : > { %v7398_v2 = vld [vmem:[#allocation2 + $0x24] sm:$0xff]   ;;  %6904 = vmatprep.subr.bf16.mxu0 %v7402_v42  ;;  %6715 = vmatpush3.bf16.msra.mxu1 %v7414_v1  ;;  %944 = vst [vmem:[#allocation2 + $0x48] sm:$0xf] %v943_v51  ;;  %v684_v55 = vshrl.u32 %v6218_v43, 16  ;;  %v687_v57 = vshll.u32 %v6218_v43, 16  ;;  %v648_v54 = vrot.slane %v7788_v17, 4  ;;  %v680_v1 = vor.u32 %v678_v39, %v7871_v49 }
  0x5b   : > { %v7399_v8 = vld [vmem:[#allocation2 + $0x24] sm:$0xff]   ;;  %6872 = vmatprep.mubr.bf16.mxu0 %v7398_v2  ;;  %v7401_v32 = vld [vmem:[#allocation2 + $0x30] sm:$0xff]   ;;  %v663_v35 = vor.u32 %v661_v63, %v7842_v18  ;;  %9064 = vst [vmem:[#allocation7_spill] sm:$0xff] %v7875_v52  ;;  %6716 = vmatprep.subr.bf16.mxu1 %v7420_v23  ;;  %v7886_v3 = vmax.f32 %v433_v44, 0.0  ;;  %v6220_v4 = vpack.c.bf16 %v7875_v52, %v7875_v52  ;;  %v665_v6 = vrot.slane %v7842_v18, 4 }
  0x5c   : > { %6681 = vmatmul.mubr.bf16.gmra.mrb[4].mxu1 %v7399_v8  ;;  %v7404_v41 = vld [vmem:[#allocation2 + $0x30] sm:$0xff]   ;;  %6873 = vmatmul.mubr.bf16.gmra.mrb[4].mxu0 %v7401_v32  ;;  %v7424_v63 = vld [vmem:[%s9043_s3 + $0x128] sm:$0xff]   ;;  %v686_v8 = vrot.slane %v684_v55, 7  ;;  %v3340_v13 = vrot.slane %v7861_v40, 5  ;;  %v5978_v37 = vrot.slane %v3242_v5, 9 }
  0x5d   : > { %6905 = vmatpush3.bf16.msra.mxu0 %v7402_v42  ;;  %v6219_v42 = vpack.c.bf16 %v7852_v28, %v7852_v28  ;;  %v664_v48 = vsel %vm7716_vm5, %v656_v9, %v663_v35  ;;  %6684 = vmatprep.mubr.bf16.mxu1 %v7404_v41  ;;  %v949_v2 = vld [vmem:[#allocation2 + $0x54] sm:$0xf]  ;;  %9065 = vst [vmem:[#allocation8_spill] sm:$0xff] %v7886_v3  ;;  %v6421_v9 = vld [vmem:[%s7601_s27 + $0x40] sm:$0xff]   ;;  %v701_v21 = vshrl.u32 %v6220_v4, 16  ;;  %v704_v24 = vshll.u32 %v6220_v4, 16 }
  0x5e   : > { %6906 = vmatprep.subr.bf16.mxu0 %v7831_v58  ;;  %938 = vst [vmem:[#allocation2 + $0x40] sm:$0xf] %v664_v48  ;;  %v3244_v12 = vld [vmem:[#allocation2 + $0x14] sm:$0x1]  ;;  %v6221_v20 = vpack.c.bf16 %v7886_v3, %v7886_v3  ;;  %6717 = vmatpush3.bf16.msra.mxu1 %v7420_v23  ;;  %v689_v25 = vor.u32 %v687_v57, %v686_v8  ;;  %v690_v31 = vrot.slane %v686_v8, 4  ;;  %v6422_v43 = vld [vmem:[%s7601_s27 + $0x48] sm:$0xff]   ;;  %v6305_v4 = vunpack.c.h.bf16 %v6421_v9 }
  0x5f   : > { %v692_v60 = vshrl.u32 %v6219_v42, 16  ;;  %v695_v62 = vshll.u32 %v6219_v42, 16  ;;  %v956_v35 = vld [vmem:[#allocation2 + $0x60] sm:$0xf]  ;;  %6718 = vmatprep.subr.bf16.mxu1 %v7424_v63  ;;  %v703_v45 = vrot.slane %v701_v21, 7  ;;  %v3342_v44 = vrot.slane %v3340_v13, 4 }
  0x60   : > { %v709_v40 = vshrl.u32 %v6221_v20, 16  ;;  %v712_v41 = vshll.u32 %v6221_v20, 16  ;;  %v3343_v48 = vrot.slane %v3244_v12, 5  ;;  %v3245_v51 = vld [vmem:[#allocation2 + $0x18] sm:$0xe]  ;;  %v6308_v12 = vunpack.c.l.bf16 %v6422_v43 }
  0x61   : > { %6907 = vmatpush3.bf16.msra.mxu0 %v7831_v58  ;;  %v7891_v11 = vrot.slane %v692_v60, 7  ;;  %v681_v58 = vsel %vm7716_vm5, %v673_v56, %v680_v1  ;;  %v7904_v56 = vld [vmem:[%s9043_s3 + $0x170] sm:$0xff]   ;;  %v3246_v55 = vld [vmem:[#allocation2 + $0x1c] sm:$0xf]  ;;  %v706_v60 = vor.u32 %v704_v24, %v703_v45  ;;  %v6304_v1 = vunpack.c.l.bf16 %v6421_v9  ;;  %v7917_v5 = vld [vmem:[#allocation2 + $0x20] sm:$0x1] }
  0x62   : > { %6908 = vmatprep.subr.bf16.mxu0 %v7409_v26  ;;  %945 = vst [vmem:[#allocation2 + $0x4c] sm:$0xf] %v681_v58  ;;  %6719 = vmatpush3.bf16.msra.mxu1 %v7424_v63  ;;  %v7919_v58 = vrot.slane %v709_v40, 7  ;;  %v6309_v20 = vunpack.c.h.bf16 %v6422_v43  ;;  %v7417_v63 = vld [vmem:[%s9043_s3 + $0x178] sm:$0xff]   ;;  %v7933_v24 = vsel %vm7908_vm10, %v3342_v44, %v3343_v48  ;;  %v397_v44 = vmul.f32 %v6308_v12, %v7654_v16 }
  0x63   : > { %v697_v32 = vor.u32 %v695_v62, %v7891_v11  ;;  %v707_v62 = vrot.slane %v703_v45, 4  ;;  %v957_v9 = vsel %vm7726_vm6, %v706_v60, %v956_v35  ;;  %v396_v35 = vmul.f32 %v6305_v4, %v7654_v16  ;;  %v932_v40 = vld [vmem:[#allocation2 + $0x38] sm:$0x1]  ;;  %v7958_v4 = vld [vmem:[%s9043_s3 + $0x180] sm:$0xff]  }
  0x64   : > { %958 = vst [vmem:[#allocation2 + $0x60] sm:$0xf] %v957_v9  ;;  %v3347_v45 = vrot.slane %v3246_v55, 5  ;;  %v398_v48 = vmul.f32 %v6309_v20, %v7654_v16  ;;  %v3249_v20 = vld [vmem:[#allocation2 + $0x28] sm:$0xf] }
  0x65   : > { %6909 = vmatpush3.bf16.msra.mxu0 %v7409_v26  ;;  %v698_v42 = vsel %vm7716_vm5, %v690_v31, %v697_v32  ;;  %v950_v26 = vsel %vm7726_vm6, %v689_v25, %v949_v2  ;;  %v7405_v57 = vld [vmem:[#allocation2 + $0x3c] sm:$0xff]   ;;  %v7923_v2 = vsel %vm7908_vm10, %v5978_v37, %v3340_v13  ;;  %v395_v13 = vmul.f32 %v6304_v1, %v7654_v16  ;;  %v925_v25 = vld [vmem:[#allocation2 + $0x2c] sm:$0x1]  ;;  %v7937_v31 = vld [vmem:[%s7601_s27 + $0x50] sm:$0xff]  }
  0x66   : > { %6910 = vmatprep.subr.bf16.mxu0 %v7410_v53  ;;  %951 = vst [vmem:[#allocation2 + $0x54] sm:$0xf] %v950_v26  ;;  %952 = vst [vmem:[#allocation2 + $0x58] sm:$0xf] %v698_v42  ;;  %v7406_v8 = vld [vmem:[#allocation2 + $0x3c] sm:$0xff]   ;;  %6876 = vmatprep.mubr.bf16.mxu0 %v7405_v57  ;;  %v714_v32 = vor.u32 %v712_v41, %v7919_v58  ;;  %v5979_v37 = vrot.slane %v3245_v51, 9  ;;  %v435_v60 = vadd.f32 %v7659_v19, %v396_v35 }
  0x67   : > { %6685 = vmatmul.mubr.bf16.gmra.mrb[8].mxu1 %v7406_v8  ;;  %v434_v26 = vadd.f32 %v7659_v19, %v395_v13  ;;  %v3349_v1 = vrot.slane %v3347_v45, 4  ;;  %v3350_v51 = vrot.slane %v7917_v5, 5  ;;  %v436_v8 = vadd.f32 %v7659_v19, %v397_v44  ;;  %v3248_v5 = vld [vmem:[#allocation2 + $0x24] sm:$0xe] }
  0x68   : > { %v715_v41 = vsel %vm7716_vm5, %v707_v62, %v714_v32  ;;  %v437_v12 = vadd.f32 %v7659_v19, %v398_v48  ;;  %v926_v62 = vsel %vm7734_vm7, %v631_v7, %v925_v25  ;;  %v6010_v13 = vcombine.low %v7923_v2, %v7933_v24  ;;  %v963_v48 = vld [vmem:[#allocation2 + $0x6c] sm:$0xf] }
  0x69   : > { %6911 = vmatpush3.bf16.msra.mxu0 %v7410_v53  ;;  %v7428_v53 = vld [vmem:[%s9043_s3 + $0x130] sm:$0xff]   ;;  %v7408_v43 = vld [vmem:[#allocation2 + $0x48] sm:$0xff]   ;;  %959 = vst [vmem:[#allocation2 + $0x64] sm:$0xf] %v715_v41  ;;  %v7953_v55 = vmax.f32 %v434_v26, 0.0  ;;  %v7973_v32 = vsel %vm7908_vm10, %v5979_v37, %v3347_v45  ;;  %v6312_v50 = vunpack.c.l.bf16 %v7937_v31  ;;  %v7978_v25 = vmax.f32 %v436_v8, 0.0 }
  0x6a   : > { %6912 = vmatprep.subr.bf16.mxu0 %v7904_v56  ;;  %6720 = vmatprep.subr.bf16.mxu1 %v7428_v53  ;;  %v7411_v57 = vld [vmem:[#allocation2 + $0x48] sm:$0xff]   ;;  %927 = vst [vmem:[#allocation2 + $0x2c] sm:$0x1] %v926_v62  ;;  %v933_v2 = vsel %vm7734_vm7, %v648_v54, %v932_v40  ;;  %v7987_v37 = vmax.f32 %v437_v12, 0.0  ;;  %v5980_v45 = vrot.slane %v3248_v5, 9  ;;  %v8000_v5 = vld [vmem:[%s7601_s27 + $0x58] sm:$0xff]  }
  0x6b   : > { %6721 = vmatpush3.bf16.msra.mxu1 %v7428_v53  ;;  %6877 = vmatmul.mubr.bf16.gmra.mrb[8].mxu0 %v7408_v43  ;;  %v7969_v53 = vmax.f32 %v435_v60, 0.0  ;;  %v6222_v7 = vpack.c.bf16 %v7953_v55, %v7953_v55  ;;  %v3354_v43 = vrot.slane %v3249_v20, 5  ;;  %934 = vst [vmem:[#allocation2 + $0x38] sm:$0x1] %v933_v2  ;;  %v399_v17 = vmul.f32 %v6312_v50, %v7654_v16 }
  0x6c   : > { %6688 = vmatprep.mubr.bf16.mxu1 %v7411_v57  ;;  %v7994_v57 = vsel %vm7908_vm10, %v3349_v1, %v3350_v51  ;;  %v6225_v41 = vpack.c.bf16 %v7987_v37, %v7987_v37  ;;  %v6316_v39 = vunpack.c.l.bf16 %v8000_v5 }
  0x6d   : > { %v7412_v9 = vld [vmem:[#allocation2 + $0x54] sm:$0xff]   ;;  %6913 = vmatpush3.bf16.msra.mxu0 %v7904_v56  ;;  %v6313_v56 = vunpack.c.h.bf16 %v7937_v31  ;;  %v6223_v24 = vpack.c.bf16 %v7969_v53, %v7969_v53  ;;  %v718_v26 = vshrl.u32 %v6222_v7, 16  ;;  %v721_v44 = vshll.u32 %v6222_v7, 16 }
  0x6e   : > { %v7413_v35 = vld [vmem:[#allocation2 + $0x54] sm:$0xff]   ;;  %6914 = vmatprep.subr.bf16.mxu0 %v7417_v63  ;;  %6880 = vmatprep.mubr.bf16.mxu0 %v7412_v9  ;;  %v6224_v31 = vpack.c.bf16 %v7978_v25, %v7978_v25  ;;  %v3356_v62 = vrot.slane %v3354_v43, 4  ;;  %v8006_v9 = vsel %vm7908_vm10, %v5980_v45, %v3354_v43  ;;  %v438_v51 = vadd.f32 %v7659_v19, %v399_v17  ;;  %v3251_v17 = vld [vmem:[#allocation2 + $0x30] sm:$0xe] }
  0x6f   : > { %6689 = vmatmul.mubr.bf16.gmra.mrb[12].mxu1 %v7413_v35  ;;  %v726_v54 = vshrl.u32 %v6223_v24, 16  ;;  %v729_v40 = vshll.u32 %v6223_v24, 16  ;;  %v720_v60 = vrot.slane %v718_v26, 7  ;;  %v400_v1 = vmul.f32 %v6313_v56, %v7654_v16 }
  0x70   : > { %v735_v8 = vshrl.u32 %v6224_v31, 16  ;;  %v738_v12 = vshll.u32 %v6224_v31, 16  ;;  %v7415_v20 = vld [vmem:[#allocation2 + $0x60] sm:$0xff]   ;;  %v743_v24 = vshrl.u32 %v6225_v41, 16  ;;  %v746_v42 = vshll.u32 %v6225_v41, 16 }
  0x71   : > { %6915 = vmatpush3.bf16.msra.mxu0 %v7417_v63  ;;  %v8002_v63 = vrot.slane %v726_v54, 7  ;;  %v7418_v50 = vld [vmem:[#allocation2 + $0x60] sm:$0xff]   ;;  %v723_v35 = vor.u32 %v721_v44, %v720_v60  ;;  %v724_v7 = vrot.slane %v720_v60, 4  ;;  %v3250_v26 = vld [vmem:[#allocation2 + $0x2c] sm:$0x1]  ;;  %v439_v41 = vadd.f32 %v7659_v19, %v400_v1 }
  0x72   : > { %6948 = vmatprep.subr.bf16.mxu0 %v7958_v4  ;;  %v737_v2 = vrot.slane %v735_v8, 7  ;;  %v970_v54 = vld [vmem:[#allocation2 + $0x78] sm:$0xf]  ;;  %v3357_v21 = vrot.slane %v3250_v26, 5  ;;  %6692 = vmatprep.mubr.bf16.mxu1 %v7418_v50  ;;  %v8014_v44 = vrot.slane %v743_v24, 7  ;;  %v5981_v1 = vrot.slane %v3251_v17, 9 }
  0x73   : > { %6881 = vmatmul.mubr.bf16.gmra.mrb[12].mxu0 %v7415_v20  ;;  %v731_v31 = vor.u32 %v729_v40, %v8002_v63  ;;  %v964_v56 = vsel %vm7726_vm6, %v723_v35, %v963_v48  ;;  %v3252_v60 = vld [vmem:[#allocation2 + $0x34] sm:$0xf]  ;;  %v8021_v20 = vmax.f32 %v438_v51, 0.0  ;;  %v7432_v48 = vld [vmem:[%s9043_s3 + $0x138] sm:$0xff]   ;;  %v8032_v19 = vmax.f32 %v439_v41, 0.0 }
  0x74   : > { %6916 = vmatprep.mubr.bf16.mxu0 %v6010_v13  ;;  %v740_v45 = vor.u32 %v738_v12, %v737_v2  ;;  %v741_v43 = vrot.slane %v737_v2, 4  ;;  %965 = vst [vmem:[#allocation2 + $0x6c] sm:$0xf] %v964_v56  ;;  %v3358_v40 = vsel %vm7908_vm10, %v3356_v62, %v3357_v21  ;;  %v3253_v13 = vld [vmem:[#allocation2 + $0x38] sm:$0x1]  ;;  %v6011_v12 = vcombine.low %v7973_v32, %v7994_v57  ;;  %v8039_v32 = vld [vmem:[%s9043_s3 + $0x40] sm:$0xff]  }
  0x75   : > { %v732_v8 = vsel %vm7716_vm5, %v724_v7, %v731_v31  ;;  %v748_v50 = vor.u32 %v746_v42, %v8014_v44  ;;  %v6012_v21 = vcombine.low %v8006_v9, %v3358_v40  ;;  %v6226_v62 = vpack.c.bf16 %v8021_v20, %v8021_v20  ;;  %v939_v7 = vld [vmem:[#allocation2 + $0x44] sm:$0x1]  ;;  %6722 = vmatprep.subr.bf16.mxu1 %v7432_v48  ;;  %v7425_v9 = vld [vmem:[%s9043_s3 + $0x188] sm:$0xff]   ;;  %v3254_v26 = vld [vmem:[#allocation2 + $0x3c] sm:$0xe] }
  0x76   : > { %966 = vst [vmem:[#allocation2 + $0x70] sm:$0xf] %v732_v8  ;;  %v971_v35 = vsel %vm7726_vm6, %v740_v45, %v970_v54  ;;  %v3361_v51 = vrot.slane %v3252_v60, 5  ;;  %9068 = vst [vmem:[#allocation9_spill] sm:$0xff] %v8039_v32  ;;  %v3364_v57 = vrot.slane %v3253_v13, 5  ;;  %v6317_v2 = vunpack.c.h.bf16 %v8000_v5  ;;  %6723 = vmatpush3.bf16.msra.mxu1 %v7432_v48 }
  0x77   : > { %972 = vst [vmem:[#allocation2 + $0x78] sm:$0xf] %v971_v35  ;;  %v749_v42 = vsel %vm7716_vm5, %v741_v43, %v748_v50  ;;  %v401_v24 = vmul.f32 %v6316_v39, %v7654_v16  ;;  %v6227_v31 = vpack.c.bf16 %v8032_v19, %v8032_v19  ;;  %v752_v54 = vshrl.u32 %v6226_v62, 16  ;;  %v3255_v43 = vld [vmem:[#allocation2 + $0x40] sm:$0xf]  ;;  %6756 = vmatprep.subr.bf16.mxu1 %v8039_v32 }
  0x78   : > { %973 = vst [vmem:[#allocation2 + $0x7c] sm:$0xf] %v749_v42  ;;  %v755_v56 = vshll.u32 %v6226_v62, 16  ;;  %v8052_v45 = vsel %vm7908_vm10, %v5981_v1, %v3361_v51  ;;  %v3363_v17 = vrot.slane %v3361_v51, 4  ;;  %v8058_v16 = vld [vmem:[%s9041_s1] ss:$0 sm:$0xff]  ;;  %v940_v8 = vsel %vm7734_vm7, %v665_v6, %v939_v7 }
  0x79   : > { %v402_v39 = vmul.f32 %v8058_v16, %v6317_v2  ;;  %v8064_v5 = vld [vmem:[%s9042_s2] ss:$0 sm:$0xff]  ;;  %v754_v40 = vrot.slane %v752_v54, 7  ;;  %v760_v41 = vshrl.u32 %v6227_v31, 16  ;;  %v763_v13 = vshll.u32 %v6227_v31, 16 }
  0x7a   : > { %v440_v60 = vadd.f32 %v8064_v5, %v401_v24  ;;  %v977_v48 = vld [vmem:[#allocation2 + $0x84] sm:$0xf]  ;;  %941 = vst [vmem:[#allocation2 + $0x44] sm:$0x1] %v940_v8  ;;  %v5982_v50 = vrot.slane %v3254_v26, 9  ;;  %v3365_v35 = vsel %vm7908_vm10, %v3363_v17, %v3364_v57  ;;  %v3368_v18 = vrot.slane %v3255_v43, 5 }
  0x7b   : > { %6917 = vmatmul.mubr.bf16.vlgmr.msra.gmra.mrb[0].mxu0 %v6011_v12  ;;  %v441_v62 = vadd.f32 %v8064_v5, %v402_v39  ;;  %v6425_v51 = vld [vmem:[%s7601_s27 + $0x60] sm:$0xff]   ;;  %v946_v6 = vld [vmem:[#allocation2 + $0x50] sm:$0x1]  ;;  %v757_v2 = vor.u32 %v755_v56, %v754_v40  ;;  %v6013_v57 = vcombine.low %v8052_v45, %v3365_v35  ;;  %v3257_v54 = vld [vmem:[#allocation2 + $0x48] sm:$0xe] }
  0x7c   : > { %6949 = vmatpush3.bf16.msra.mxu0 %v7958_v4  ;;  %6920 = vmatprep.mubr.bf16.mxu0 %v6012_v21  ;;  %v8075_v1 = vmax.f32 %v440_v60, 0.0  ;;  %v7429_v12 = vld [vmem:[%s9043_s3 + $0x190] sm:$0xff]   ;;  %v758_v4 = vrot.slane %v754_v40, 4  ;;  %v8082_v21 = vrot.slane %v760_v41, 7  ;;  %v3369_v31 = vsel %vm7908_vm10, %v5982_v50, %v3368_v18  ;;  %v3258_v60 = vld [vmem:[#allocation2 + $0x4c] sm:$0xf] }
  0x7d   : > { %v7419_v42 = vld [vmem:[#allocation2 + $0x6c] sm:$0xff]   ;;  %6950 = vmatprep.subr.bf16.mxu0 %v7425_v9  ;;  %v8085_v24 = vmax.f32 %v441_v62, 0.0  ;;  %v978_v56 = vsel %vm7726_vm6, %v757_v2, %v977_v48  ;;  %v3370_v17 = vrot.slane %v3368_v18, 4  ;;  %v6320_v39 = vunpack.c.l.bf16 %v6425_v51 }
  0x7e   : > { %v6228_v26 = vpack.c.bf16 %v8075_v1, %v8075_v1  ;;  %6693 = vmatmul.mubr.bf16.gmra.mrb[16].mxu1 %v7419_v42  ;;  %v765_v43 = vor.u32 %v763_v13, %v8082_v21  ;;  %979 = vst [vmem:[#allocation2 + $0x84] sm:$0xf] %v978_v56  ;;  %v6321_v35 = vunpack.c.h.bf16 %v6425_v51  ;;  %v6426_v50 = vld [vmem:[%s7601_s27 + $0x68] sm:$0xff]   ;;  %v9069_v48 = vrot.slane %v7871_v49, 4  ;;  %v984_v49 = vld [vmem:[#allocation2 + $0x90] sm:$0xf] }
  0x7f   : > { %v7422_v45 = vld [vmem:[#allocation2 + $0x78] sm:$0xff]   ;;  %v6229_v8 = vpack.c.bf16 %v8085_v24, %v8085_v24  ;;  %v403_v13 = vmul.f32 %v8058_v16, %v6320_v39  ;;  %v5983_v42 = vrot.slane %v3257_v54, 9  ;;  %v3375_v54 = vrot.slane %v3258_v60, 5  ;;  %v3266_v27 = vld [vmem:[#allocation2 + $0x6c] sm:$0xe] }
  0x80   : > { %6951 = vmatpush3.bf16.msra.mxu0 %v7425_v9  ;;  %v769_v40 = vshrl.u32 %v6228_v26, 16  ;;  %v772_v41 = vshll.u32 %v6228_v26, 16  ;;  %v766_v62 = vsel %vm7716_vm5, %v758_v4, %v765_v43  ;;  %v947_v18 = vsel %vm7734_vm7, %v9069_v48, %v946_v6  ;;  %v7433_v9 = vld [vmem:[%s9043_s3 + $0x198] sm:$0xff]   ;;  %6696 = vmatprep.mubr.bf16.mxu1 %v7422_v45 }
  0x81   : > { %6952 = vmatprep.subr.bf16.mxu0 %v7429_v12  ;;  %980 = vst [vmem:[#allocation2 + $0x88] sm:$0xf] %v766_v62  ;;  %v777_v2 = vshrl.u32 %v6229_v8, 16  ;;  %v780_v26 = vshll.u32 %v6229_v8, 16  ;;  %v3256_v56 = vld [vmem:[#allocation2 + $0x44] sm:$0x1]  ;;  %v404_v4 = vmul.f32 %v8058_v16, %v6321_v35  ;;  %v442_v6 = vadd.f32 %v8064_v5, %v403_v13 }
  0x82   : > { %v771_v51 = vrot.slane %v769_v40, 7  ;;  %948 = vst [vmem:[#allocation2 + $0x50] sm:$0x1] %v947_v18  ;;  %v3371_v43 = vrot.slane %v3256_v56, 5  ;;  %v6324_v39 = vunpack.c.l.bf16 %v6426_v50  ;;  %v953_v40 = vld [vmem:[#allocation2 + $0x5c] sm:$0x1] }
  0x83   : > { %6921 = vmatmul.mubr.bf16.gmra.mrb[4].mxu0 %v6013_v57  ;;  %v8109_v3 = vrot.slane %v777_v2, 7  ;;  %v443_v45 = vadd.f32 %v8064_v5, %v404_v4  ;;  %v8114_v35 = vmax.f32 %v442_v6, 0.0  ;;  %v7435_v57 = vld [vmem:[%s9043_s3 + $0x1a0] sm:$0xff]   ;;  %v8123_v13 = vld [vmem:[#allocation2 + $0x54] sm:$0xe] }
  0x84   : > { %v774_v48 = vor.u32 %v772_v41, %v771_v51  ;;  %v775_v7 = vrot.slane %v771_v51, 4  ;;  %6953 = vmatpush3.bf16.msra.mxu0 %v7429_v12  ;;  %v3372_v8 = vsel %vm7908_vm10, %v3370_v17, %v3371_v43  ;;  %v6325_v51 = vunpack.c.h.bf16 %v6426_v50  ;;  %v3261_v56 = vld [vmem:[#allocation2 + $0x58] sm:$0xf]  ;;  %v6427_v4 = vld [vmem:[%s7601_s27 + $0x70] sm:$0xff]  }
  0x85   : > { %6954 = vmatprep.subr.bf16.mxu0 %v7433_v9  ;;  %v782_v41 = vor.u32 %v780_v26, %v8109_v3  ;;  %v6014_v12 = vcombine.low %v3369_v31, %v3372_v8  ;;  %v8125_v18 = vmax.f32 %v443_v45, 0.0  ;;  %v6230_v17 = vpack.c.bf16 %v8114_v35, %v8114_v35 }
  0x86   : > { %v985_v62 = vsel %vm7726_vm6, %v774_v48, %v984_v49  ;;  %v405_v2 = vmul.f32 %v8058_v16, %v6324_v39  ;;  %v3376_v31 = vsel %vm7908_vm10, %v5983_v42, %v3375_v54  ;;  %v3377_v49 = vrot.slane %v3375_v54, 4  ;;  %v7437_v42 = vld [vmem:[%s9043_s3 + $0x1a8] sm:$0xff]  }
  0x87   : > { %986 = vst [vmem:[#allocation2 + $0x90] sm:$0xf] %v985_v62  ;;  %v783_v26 = vsel %vm7716_vm5, %v775_v7, %v782_v41  ;;  %6924 = vmatprep.mubr.bf16.mxu0 %v6014_v12  ;;  %v9070_v43 = vrot.slane %v7891_v11, 4  ;;  %v6231_v50 = vpack.c.bf16 %v8125_v18, %v8125_v18  ;;  %v786_v39 = vshrl.u32 %v6230_v17, 16 }
  0x88   : > { %6955 = vmatpush3.bf16.msra.mxu0 %v7433_v9  ;;  %v7423_v48 = vld [vmem:[#allocation2 + $0x84] sm:$0xff]   ;;  %987 = vst [vmem:[#allocation2 + $0x94] sm:$0xf] %v783_v26  ;;  %v789_v45 = vshll.u32 %v6230_v17, 16  ;;  %v406_v7 = vmul.f32 %v8058_v16, %v6325_v51  ;;  %v444_v54 = vadd.f32 %v8064_v5, %v405_v2  ;;  %v5984_v9 = vrot.slane %v8123_v13, 9 }
  0x89   : > { %v954_v6 = vsel %vm7734_vm7, %v9070_v43, %v953_v40  ;;  %6956 = vmatprep.subr.bf16.mxu0 %v7435_v57  ;;  %v3259_v11 = vld [vmem:[#allocation2 + $0x50] sm:$0x1]  ;;  %v3382_v40 = vrot.slane %v3261_v56, 5  ;;  %v6328_v8 = vunpack.c.l.bf16 %v6427_v4  ;;  %6697 = vmatmul.mubr.bf16.gmra.mrb[20].mxu1 %v7423_v48  ;;  %v788_v41 = vrot.slane %v786_v39, 7  ;;  %v991_v26 = vld [vmem:[#allocation2 + $0x9c] sm:$0xf] }
  0x8a   : > { %955 = vst [vmem:[#allocation2 + $0x5c] sm:$0x1] %v954_v6  ;;  %v794_v62 = vshrl.u32 %v6231_v50, 16  ;;  %v797_v12 = vshll.u32 %v6231_v50, 16  ;;  %v3378_v17 = vrot.slane %v3259_v11, 5  ;;  %v445_v51 = vadd.f32 %v8064_v5, %v406_v7 }
  0x8b   : > { %v8148_v43 = vmax.f32 %v444_v54, 0.0  ;;  %v6329_v6 = vunpack.c.h.bf16 %v6427_v4  ;;  %v407_v60 = vmul.f32 %v8058_v16, %v6328_v8  ;;  %v791_v52 = vor.u32 %v789_v45, %v788_v41  ;;  %v960_v4 = vld [vmem:[#allocation2 + $0x68] sm:$0x1]  ;;  %v8167_v11 = vld [vmem:[#allocation2 + $0x64] sm:$0xf] }
  0x8c   : > { %6957 = vmatpush3.bf16.msra.mxu0 %v7435_v57  ;;  %v792_v2 = vrot.slane %v788_v41, 4  ;;  %v8151_v28 = vrot.slane %v794_v62, 7  ;;  %v3379_v13 = vsel %vm7908_vm10, %v3377_v49, %v3378_v17  ;;  %v8155_v48 = vmax.f32 %v445_v51, 0.0  ;;  %v7439_v57 = vld [vmem:[%s9043_s3 + $0x1b0] sm:$0xff]   ;;  %v998_v51 = vld [vmem:[#allocation2 + $0xa8] sm:$0xf] }
  0x8d   : > { %6958 = vmatprep.subr.bf16.mxu0 %v7437_v42  ;;  %v6015_v56 = vcombine.low %v3376_v31, %v3379_v13  ;;  %v6232_v50 = vpack.c.bf16 %v8148_v43, %v8148_v43  ;;  %v408_v39 = vmul.f32 %v8058_v16, %v6329_v6  ;;  %v992_v7 = vsel %vm7726_vm6, %v791_v52, %v991_v26 }
  0x8e   : > { %v799_v45 = vor.u32 %v797_v12, %v8151_v28  ;;  %v3384_v49 = vrot.slane %v3382_v40, 4  ;;  %v446_v31 = vadd.f32 %v8064_v5, %v407_v60  ;;  %993 = vst [vmem:[#allocation2 + $0x9c] sm:$0xf] %v992_v7  ;;  %v6233_v8 = vpack.c.bf16 %v8155_v48, %v8155_v48 }
  0x8f   : > { %v7426_v54 = vld [vmem:[#allocation2 + $0x90] sm:$0xff]   ;;  %6925 = vmatmul.mubr.bf16.gmra.mrb[8].mxu0 %v6015_v56  ;;  %v803_v41 = vshrl.u32 %v6232_v50, 16  ;;  %v806_v62 = vshll.u32 %v6232_v50, 16  ;;  %v447_v17 = vadd.f32 %v8064_v5, %v408_v39  ;;  %v3383_v60 = vsel %vm7908_vm10, %v5984_v9, %v3382_v40  ;;  %v3263_v56 = vld [vmem:[#allocation2 + $0x60] sm:$0xe]  ;;  %v7441_v50 = vld [vmem:[%s9043_s3 + $0x1b8] sm:$0xff]  }
  0x90   : > { %v800_v12 = vsel %vm7716_vm5, %v792_v2, %v799_v45  ;;  %v8176_v26 = vmax.f32 %v446_v31, 0.0  ;;  %v9071_v6 = vrot.slane %v7919_v58, 4  ;;  %6959 = vmatpush3.bf16.msra.mxu0 %v7437_v42  ;;  %6700 = vmatprep.mubr.bf16.mxu1 %v7426_v54  ;;  %v811_v39 = vshrl.u32 %v6233_v8, 16  ;;  %v967_v42 = vld [vmem:[#allocation2 + $0x74] sm:$0x1] }
  0x91   : > { %v3262_v52 = vld [vmem:[#allocation2 + $0x5c] sm:$0x1]  ;;  %994 = vst [vmem:[#allocation2 + $0xa0] sm:$0xf] %v800_v12  ;;  %v805_v2 = vrot.slane %v803_v41, 7  ;;  %v814_v45 = vshll.u32 %v6233_v8, 16  ;;  %6960 = vmatprep.subr.bf16.mxu0 %v7439_v57 }
  0x92   : > { %v961_v13 = vsel %vm7734_vm7, %v9071_v6, %v960_v4  ;;  %v3385_v7 = vrot.slane %v3262_v52, 5  ;;  %v8185_v9 = vmax.f32 %v447_v17, 0.0  ;;  %v6234_v58 = vpack.c.bf16 %v8176_v26, %v8176_v26  ;;  %v8196_v52 = vld [vmem:[#allocation2 + $0x70] sm:$0xf] }
  0x93   : > { %962 = vst [vmem:[#allocation2 + $0x68] sm:$0x1] %v961_v13  ;;  %v3389_v40 = vrot.slane %v8167_v11, 5  ;;  %v808_v4 = vor.u32 %v806_v62, %v805_v2  ;;  %v809_v31 = vrot.slane %v805_v2, 4  ;;  %v8190_v6 = vrot.slane %v811_v39, 7 }
  0x94   : > { %v3386_v54 = vsel %vm7908_vm10, %v3384_v49, %v3385_v7  ;;  %v6235_v8 = vpack.c.bf16 %v8185_v9, %v8185_v9  ;;  %v820_v12 = vshrl.u32 %v6234_v58, 16  ;;  %v823_v17 = vshll.u32 %v6234_v58, 16  ;;  %v974_v13 = vld [vmem:[#allocation2 + $0x80] sm:$0x1]  ;;  %6961 = vmatpush3.bf16.msra.mxu0 %v7439_v57  ;;  %v1005_v2 = vld [vmem:[#allocation2 + $0xb4] sm:$0xf] }
  0x95   : > { %v6016_v41 = vcombine.low %v3383_v60, %v3386_v54  ;;  %v816_v11 = vor.u32 %v814_v45, %v8190_v6  ;;  %v999_v62 = vsel %vm7726_vm6, %v808_v4, %v998_v51  ;;  %v5985_v39 = vrot.slane %v3263_v56, 9  ;;  %6962 = vmatprep.subr.bf16.mxu0 %v7441_v50  ;;  %v8204_v49 = vld [vmem:[%s9043_s3 + $0x1c0] sm:$0xff]   ;;  %v3269_v45 = vld [vmem:[#allocation2 + $0x78] sm:$0xe]  ;;  %v3270_v54 = vld [vmem:[#allocation2 + $0x7c] sm:$0xf] }
  0x96   : > { %v767_v60 = vrot.slane %v8082_v21, 4  ;;  %1000 = vst [vmem:[#allocation2 + $0xa8] sm:$0xf] %v999_v62  ;;  %v822_v7 = vrot.slane %v820_v12, 7  ;;  %v828_v57 = vshrl.u32 %v6235_v8, 16  ;;  %v831_v58 = vshll.u32 %v6235_v8, 16 }
  0x97   : > { %6928 = vmatprep.mubr.bf16.mxu0 %v6016_v41  ;;  %v817_v51 = vsel %vm7716_vm5, %v809_v31, %v816_v11  ;;  %v9072_v56 = vrot.slane %v8002_v63, 4  ;;  %v3391_v41 = vrot.slane %v3389_v40, 4  ;;  %v3272_v8 = vld [vmem:[#allocation2 + $0x84] sm:$0xe]  ;;  %v988_v12 = vld [vmem:[#allocation2 + $0x98] sm:$0x1]  ;;  %v3390_v63 = vsel %vm7908_vm10, %v5985_v39, %v3389_v40 }
  0x98   : > { %v7427_v38 = vld [vmem:[#allocation2 + $0x9c] sm:$0xff]   ;;  %1001 = vst [vmem:[#allocation2 + $0xac] sm:$0xf] %v817_v51  ;;  %v825_v32 = vor.u32 %v823_v17, %v822_v7  ;;  %v826_v21 = vrot.slane %v822_v7, 4  ;;  %v8213_v62 = vrot.slane %v828_v57, 7  ;;  %6963 = vmatpush3.bf16.msra.mxu0 %v7441_v50  ;;  %v784_v31 = vrot.slane %v8109_v3, 4 }
  0x99   : > { %v968_v4 = vsel %vm7734_vm7, %v9072_v56, %v967_v42  ;;  %v3396_v42 = vrot.slane %v8196_v52, 5  ;;  %v9073_v56 = vrot.slane %v8014_v44, 4  ;;  %v3273_v7 = vld [vmem:[#allocation2 + $0x88] sm:$0xf]  ;;  %v8223_v57 = vld [vmem:[#allocation2 + $0x94] sm:$0xf]  ;;  %6996 = vmatprep.subr.bf16.mxu0 %v8204_v49  ;;  %6701 = vmatmul.mubr.bf16.gmra.mrb[24].mxu1 %v7427_v38 }
  0x9a   : > { %969 = vst [vmem:[#allocation2 + $0x74] sm:$0x1] %v968_v4  ;;  %v3265_v11 = vld [vmem:[#allocation2 + $0x68] sm:$0x1]  ;;  %v833_v50 = vor.u32 %v831_v58, %v8213_v62  ;;  %v1006_v3 = vsel %vm7726_vm6, %v825_v32, %v1005_v2  ;;  %v5986_v40 = vrot.slane %v3266_v27, 9  ;;  %v801_v44 = vrot.slane %v8151_v28, 4 }
  0x9b   : > { %v975_v17 = vsel %vm7734_vm7, %v9073_v56, %v974_v13  ;;  %v3392_v51 = vrot.slane %v3265_v11, 5  ;;  %v995_v52 = vld [vmem:[#allocation2 + $0xa4] sm:$0x1]  ;;  %1007 = vst [vmem:[#allocation2 + $0xb4] sm:$0xf] %v1006_v3  ;;  %v482_v13 = vpack.c.bf16 %v7682_v34, %v7680_v33  ;;  %v5987_v39 = vrot.slane %v3269_v45, 9 }
  0x9c   : > { %976 = vst [vmem:[#allocation2 + $0x80] sm:$0x1] %v975_v17  ;;  %v982_v4 = vsel %vm7734_vm7, %v767_v60, %v981_v61  ;;  %v3275_v38 = vld [vmem:[#allocation2 + $0x90] sm:$0xe]  ;;  %v818_v58 = vrot.slane %v8190_v6, 4  ;;  %v834_v32 = vsel %vm7716_vm5, %v826_v21, %v833_v50  ;;  %v3403_v2 = vrot.slane %v3270_v54, 5 }
  0x9d   : > { %v3393_v27 = vsel %vm7908_vm10, %v3391_v41, %v3392_v51  ;;  %983 = vst [vmem:[#allocation2 + $0x8c] sm:$0x1] %v982_v4  ;;  %v3278_v28 = vld [vmem:[#allocation2 + $0x9c] sm:$0xe]  ;;  %v1002_v11 = vld [vmem:[#allocation2 + $0xb0] sm:$0x1]  ;;  %v989_v61 = vsel %vm7734_vm7, %v784_v31, %v988_v12  ;;  %v3397_v6 = vsel %vm7908_vm10, %v5986_v40, %v3396_v42 }
  0x9e   : > { %1008 = vst [vmem:[#allocation2 + $0xb8] sm:$0xf] %v834_v32  ;;  %v6017_v56 = vcombine.low %v3390_v63, %v3393_v27  ;;  %v3398_v17 = vrot.slane %v3396_v42, 4  ;;  %v5988_v45 = vrot.slane %v3272_v8, 9  ;;  %v3279_v60 = vld [vmem:[#allocation2 + $0xa0] sm:$0xf]  ;;  %v3404_v12 = vsel %vm7908_vm10, %v5987_v39, %v3403_v2 }
  0x9f   : > { %v3410_v41 = vrot.slane %v3273_v7, 5  ;;  %990 = vst [vmem:[#allocation2 + $0x98] sm:$0x1] %v989_v61  ;;  %v3417_v54 = vrot.slane %v8223_v57, 5  ;;  %v3281_v50 = vld [vmem:[#allocation2 + $0xa8] sm:$0xe]  ;;  %v996_v42 = vsel %vm7734_vm7, %v801_v44, %v995_v52  ;;  %v1003_v39 = vsel %vm7734_vm7, %v818_v58, %v1002_v11 }
  0xa0   : > { %v1009_v3 = vld [vmem:[#allocation2 + $0xbc] sm:$0x1]  ;;  %v7430_v63 = vld [vmem:[#allocation2 + $0xa8] sm:$0xff]   ;;  %v835_v8 = vrot.slane %v8213_v62, 4  ;;  %6929 = vmatmul.mubr.bf16.gmra.mrb[12].mxu0 %v6017_v56  ;;  %v3405_v4 = vrot.slane %v3403_v2, 4  ;;  %v5989_v57 = vrot.slane %v3275_v38, 9 }
  0xa1   : > { %v3268_v51 = vld [vmem:[#allocation2 + $0x74] sm:$0x1]  ;;  %v6428_v7 = vld [vmem:[%s7601_s27 + $0x78] sm:$0xff]   ;;  %997 = vst [vmem:[#allocation2 + $0xa4] sm:$0x1] %v996_v42  ;;  %v3424_v32 = vrot.slane %v3279_v60, 5  ;;  %6704 = vmatprep.mubr.bf16.mxu1 %v7430_v63  ;;  %v3411_v56 = vsel %vm7908_vm10, %v5988_v45, %v3410_v41 }
  0xa2   : > { %v3399_v40 = vrot.slane %v3268_v51, 5  ;;  %v3282_v27 = vld [vmem:[#allocation2 + $0xac] sm:$0xf]  ;;  %v5990_v61 = vrot.slane %v3278_v28, 9  ;;  %v5991_v31 = vrot.slane %v3281_v50, 9  ;;  %v3412_v51 = vrot.slane %v3410_v41, 4 }
  0xa3   : > { %v3271_v62 = vld [vmem:[#allocation2 + $0x80] sm:$0x1]  ;;  %v3419_v2 = vrot.slane %v3417_v54, 4  ;;  %1004 = vst [vmem:[#allocation2 + $0xb0] sm:$0x1] %v1003_v39  ;;  %v3426_v42 = vrot.slane %v3424_v32, 4  ;;  %v1010_v21 = vsel %vm7734_vm7, %v835_v8, %v1009_v3  ;;  %v8266_v11 = vsel %vm7908_vm10, %v5989_v57, %v3417_v54 }
  0xa4   : > { %v3400_v52 = vsel %vm7908_vm10, %v3398_v17, %v3399_v40  ;;  %v3406_v44 = vrot.slane %v3271_v62, 5  ;;  %v3274_v60 = vld [vmem:[#allocation2 + $0x8c] sm:$0x1]  ;;  %v3431_v63 = vrot.slane %v3282_v27, 5  ;;  %1011 = vst [vmem:[#allocation2 + $0xbc] sm:$0x1] %v1010_v21  ;;  %v6332_v41 = vunpack.c.l.bf16 %v6428_v7 }
  0xa5   : > { %v6018_v38 = vcombine.low %v3397_v6, %v3400_v52  ;;  %v7431_v45 = vld [vmem:[#allocation2 + $0xb4] sm:$0xff]   ;;  %v3413_v58 = vrot.slane %v3274_v60, 5  ;;  %v8270_v40 = vsel %vm7908_vm10, %v5990_v61, %v3424_v32 }
  0xa6   : > { %v3407_v28 = vsel %vm7908_vm10, %v3405_v4, %v3406_v44  ;;  %v3285_v17 = vld [vmem:[#allocation2 + $0xb8] sm:$0xf]  ;;  %v8274_v3 = vsel %vm7908_vm10, %v5991_v31, %v3431_v63  ;;  %v3284_v8 = vld [vmem:[#allocation2 + $0xb4] sm:$0xe]  ;;  %v6333_v4 = vunpack.c.h.bf16 %v6428_v7  ;;  %6705 = vmatmul.mubr.bf16.gmra.mrb[28].mxu1 %v7431_v45  ;;  %v409_v57 = vmul.f32 %v8058_v16, %v6332_v41 }
  0xa7   : > { %6932 = vmatprep.mubr.bf16.mxu0 %v6018_v38  ;;  %v6019_v6 = vcombine.low %v3404_v12, %v3407_v28  ;;  %v3277_v50 = vld [vmem:[#allocation2 + $0x98] sm:$0x1]  ;;  %v3414_v54 = vsel %vm7908_vm10, %v3412_v51, %v3413_v58  ;;  %v490_v12 = vpack.c.bf16 %v7969_v53, %v7953_v55  ;;  %6724 = vmatprep.mubr.bf16.mxu1 %v482_v13  ;;  %v3433_v27 = vrot.slane %v3431_v63, 4 }
  0xa8   : > { %v3420_v21 = vrot.slane %v3277_v50, 5  ;;  %v6020_v32 = vcombine.low %v3411_v56, %v3414_v54  ;;  %v3280_v31 = vld [vmem:[#allocation2 + $0xa4] sm:$0x1]  ;;  %v3438_v62 = vrot.slane %v3285_v17, 5  ;;  %v410_v7 = vmul.f32 %v8058_v16, %v6333_v4  ;;  %v1598_v54 = vld [vmem:[#allocation2] sm:$0xf] }
  0xa9   : > { %6933 = vmatmul.mubr.bf16.gmra.mrb[16].mxu0 %v6019_v6  ;;  %v3427_v61 = vrot.slane %v3280_v31, 5  ;;  %v5992_v39 = vrot.slane %v3284_v8, 9  ;;  %v448_v52 = vadd.f32 %v8064_v5, %v409_v57  ;;  %v491_v44 = vpack.c.bf16 %v7987_v37, %v7978_v25 }
  0xaa   : > { %6936 = vmatprep.mubr.bf16.mxu0 %v6020_v32  ;;  %v3421_v51 = vsel %vm7908_vm10, %v3419_v2, %v3420_v21  ;;  %v3283_v33 = vld [vmem:[#allocation2 + $0xb0] sm:$0x1]  ;;  %v449_v34 = vadd.f32 %v8064_v5, %v410_v7  ;;  %v492_v13 = vpack.c.bf16 %v8032_v19, %v8021_v20  ;;  %v493_v16 = vpack.c.bf16 %v8085_v24, %v8075_v1  ;;  %v1600_v7 = vld [vmem:[#allocation2 + $0x8] sm:$0x1]  ;;  %v1619_v20 = vld [vmem:[#allocation2 + $0x54] sm:$0xf] }
  0xab   : > { %v3428_v56 = vsel %vm7908_vm10, %v3426_v42, %v3427_v61  ;;  %v3434_v38 = vrot.slane %v3283_v33, 5  ;;  %v8297_v60 = vmax.f32 %v448_v52, 0.0  ;;  %v494_v63 = vpack.c.bf16 %v8125_v18, %v8114_v35  ;;  %v3286_v45 = vld [vmem:[#allocation2 + $0xbc] sm:$0x1]  ;;  %v7436_v42 = vld [vmem:[%s9043_s3 + $0x48] sm:$0xff]  }
  0xac   : > { %v3440_v2 = vrot.slane %v3438_v62, 4  ;;  %v8301_v28 = vmax.f32 %v449_v34, 0.0  ;;  %v495_v5 = vpack.c.bf16 %v8155_v48, %v8148_v43  ;;  %v496_v58 = vpack.c.bf16 %v8185_v9, %v8176_v26  ;;  %v9075_v61 = vld [vmem:[#allocation9_spill] sm:$0xff]  ;;  %v1012_v52 = vld [vmem:[#allocation2 + $0xc0] sm:$0xf]  ;;  %v7469_v43 = vld [vmem:[%s9043_s3 + $0x1f0] sm:$0xff]  }
  0xad   : > { %v6021_v17 = vcombine.low %v8266_v11, %v3421_v51  ;;  %v8313_v41 = vsel %vm7908_vm10, %v3433_v27, %v3434_v38  ;;  %v3441_v6 = vrot.slane %v3286_v45, 5  ;;  %v6236_v50 = vpack.c.bf16 %v8297_v60, %v8297_v60  ;;  %v1599_v27 = vld [vmem:[#allocation2 + $0x4] sm:$0xf]  ;;  %v1620_v19 = vld [vmem:[#allocation2 + $0x58] sm:$0xf] }
  0xae   : > { %v6022_v8 = vcombine.low %v8270_v40, %v3428_v56  ;;  %v6237_v4 = vpack.c.bf16 %v8301_v28, %v8301_v28  ;;  %v9074_v21 = vpack.c.bf16 %v7699_v47, %v7697_v46  ;;  %v485_v11 = vpack.c.bf16 %v7756_v30, %v7754_v29  ;;  %v4162_v26 = vld [vmem:[#allocation2 + $0x24] sm:$0xf] }
  0xaf   : > { %v486_v57 = vpack.c.bf16 %v7801_v36, %v7791_v22  ;;  %v837_v32 = vshrl.u32 %v6236_v50, 16  ;;  %v840_v31 = vshll.u32 %v6236_v50, 16  ;;  %v9076_v40 = vpack.c.bf16 %v7741_v15, %v7739_v14  ;;  %v7438_v22 = vld [vmem:[%s9043_s3 + $0x50] sm:$0xff]   ;;  %v1016_v15 = vld [vmem:[#allocation2 + $0xc8] sm:$0x1] }
  0xb0   : > { %6725 = vmatmul.mubr.bf16.vlgmr.msra.gmra.mrb[0].mxu1 %v9074_v21  ;;  %v6023_v46 = vcombine.low %v8274_v3, %v8313_v41  ;;  %v3439_v47 = vsel %vm7908_vm10, %v5992_v39, %v3438_v62  ;;  %v845_v29 = vshrl.u32 %v6237_v4, 16  ;;  %v848_v30 = vshll.u32 %v6237_v4, 16  ;;  %v1601_v41 = vld [vmem:[#allocation2 + $0xc] sm:$0xf] }
  0xb1   : > { %6757 = vmatpush3.bf16.msra.mxu1 %v9075_v61  ;;  %6728 = vmatprep.mubr.bf16.mxu1 %v9076_v40  ;;  %v3442_v36 = vsel %vm7908_vm10, %v3440_v2, %v3441_v6  ;;  %v839_v14 = vrot.slane %v837_v32, 7  ;;  %v1650_v51 = vshrl.u32 %v1598_v54, 16  ;;  %v1653_v33 = vshll.u32 %v1598_v54, 16  ;;  %v1602_v6 = vld [vmem:[#allocation2 + $0x10] sm:$0xf] }
  0xb2   : > { %6758 = vmatprep.subr.bf16.mxu1 %v7436_v42  ;;  %6937 = vmatmul.mubr.bf16.gmra.mrb[20].mxu0 %v6021_v17  ;;  %v847_v3 = vrot.slane %v845_v29, 7  ;;  %v1659_v34 = vshll.u32 %v1599_v27, 16  ;;  %v1663_v62 = vshrl.u32 %v1599_v27, 16  ;;  %v1669_v39 = vshll.u32 %v1600_v7, 16  ;;  %v1603_v27 = vld [vmem:[#allocation2 + $0x14] sm:$0x1] }
  0xb3   : > { %6940 = vmatprep.mubr.bf16.mxu0 %v6022_v8  ;;  %v842_v56 = vor.u32 %v840_v31, %v839_v14  ;;  %v843_v38 = vrot.slane %v839_v14, 4  ;;  %v1652_v45 = vrot.slane %v1650_v51, 4  ;;  %v1655_v17 = vrot.slane %v1653_v33, 5  ;;  %v7440_v8 = vld [vmem:[%s9043_s3 + $0x58] sm:$0xff]  }
  0xb4   : > { %v850_v50 = vor.u32 %v848_v30, %v847_v3  ;;  %v852_v4 = vrot.slane %v847_v3, 4  ;;  %v8340_v21 = vrot.slane %v1659_v34, 5  ;;  %v1665_v2 = vrot.slane %v1663_v62, 4  ;;  %v1604_v51 = vld [vmem:[#allocation2 + $0x18] sm:$0xf]  ;;  %v9078_v3 = vld [vmem:[#allocation4_spill] sm:$0xff] }
  0xb5   : > { %6759 = vmatpush3.bf16.msra.mxu1 %v7436_v42  ;;  %v6024_v32 = vcombine.low %v3439_v47, %v3442_v36  ;;  %v1013_v54 = vsel %vm7726_vm6, %v842_v56, %v1012_v52  ;;  %v1656_v31 = vor.u32 %v1655_v17, %v1652_v45  ;;  %v1674_v7 = vshrl.u32 %v1601_v41, 16  ;;  %v9077_v33 = vld [vmem:[#allocation3_spill] sm:$0xff]  ;;  %v1606_v56 = vld [vmem:[#allocation2 + $0x20] sm:$0x1]  ;;  %v9080_v45 = vld [vmem:[#allocation6_spill] sm:$0xff] }
  0xb6   : > { %6760 = vmatprep.subr.bf16.mxu1 %v7438_v22  ;;  %v851_v42 = vsel %vm7716_vm5, %v843_v38, %v850_v50  ;;  %1014 = vst [vmem:[#allocation2 + $0xc0] sm:$0xf] %v1013_v54  ;;  %v1017_v61 = vsel %vm7734_vm7, %v852_v4, %v1016_v15  ;;  %v1666_v40 = vor.u32 %v1665_v2, %v8340_v21  ;;  %v1677_v47 = vshll.u32 %v1601_v41, 16 }
  0xb7   : > { %1015 = vst [vmem:[#allocation2 + $0xc4] sm:$0xf] %v851_v42  ;;  %1018 = vst [vmem:[#allocation2 + $0xc8] sm:$0x1] %v1017_v61  ;;  %v1676_v29 = vrot.slane %v1674_v7, 4  ;;  %v1683_v30 = vshll.u32 %v1602_v6, 16  ;;  %v487_v34 = vpack.c.bf16 %v9078_v3, %v9077_v33 }
  0xb8   : > { %6729 = vmatmul.mubr.bf16.gmra.mrb[4].mxu1 %v485_v11  ;;  %v1687_v59 = vshrl.u32 %v1602_v6, 16  ;;  %v8355_v52 = vrot.slane %v1656_v31, 4  ;;  %v8357_v10 = vrot.slane %v1669_v39, 5  ;;  %v1679_v36 = vrot.slane %v1677_v47, 5  ;;  %v9079_v39 = vld [vmem:[#allocation5_spill] sm:$0xff]  ;;  %v9081_v33 = vld [vmem:[#allocation7_spill] sm:$0xff] }
  0xb9   : > { %6732 = vmatprep.mubr.bf16.mxu1 %v486_v57  ;;  %6761 = vmatpush3.bf16.msra.mxu1 %v7438_v22  ;;  %v1693_v14 = vshll.u32 %v1603_v27, 16  ;;  %v8359_v11 = vrot.slane %v1683_v30, 5  ;;  %v8363_v62 = vrot.slane %v1666_v40, 4  ;;  %v1605_v22 = vld [vmem:[#allocation2 + $0x1c] sm:$0xf]  ;;  %v1698_v38 = vshrl.u32 %v1604_v51, 16 }
  0xba   : > { %6941 = vmatmul.mubr.bf16.gmra.mrb[24].mxu0 %v6023_v46  ;;  %6762 = vmatprep.subr.bf16.mxu1 %v7440_v8  ;;  %v1689_v15 = vrot.slane %v1687_v59, 4  ;;  %v1680_v57 = vor.u32 %v1679_v36, %v1676_v29  ;;  %v488_v17 = vpack.c.bf16 %v9080_v45, %v9079_v39  ;;  %v7447_v46 = vld [vmem:[%s9043_s3 + $0x68] sm:$0xff]   ;;  %v1701_v50 = vshll.u32 %v1604_v51, 16  ;;  %v1607_v31 = vld [vmem:[#allocation2 + $0x24] sm:$0xf]  ;;  %v7442_v45 = vld [vmem:[#allocation2 + $0x18] sm:$0xff]  }
  0xbb   : > { %6944 = vmatprep.mubr.bf16.mxu0 %v6024_v32  ;;  %v1707_v4 = vshll.u32 %v1605_v22, 16  ;;  %v8373_v6 = vrot.slane %v1693_v14, 5  ;;  %v1700_v32 = vrot.slane %v1698_v38, 4  ;;  %v1711_v54 = vshrl.u32 %v1605_v22, 16  ;;  %v1608_v51 = vld [vmem:[#allocation2 + $0x28] sm:$0xf] }
  0xbc   : > { %v1690_v41 = vor.u32 %v1689_v15, %v8359_v11  ;;  %v8371_v2 = vrot.slane %v1680_v57, 4  ;;  %v1703_v7 = vrot.slane %v1701_v50, 5  ;;  %v1717_v61 = vshll.u32 %v1606_v56, 16  ;;  %v9082_v3 = vld [vmem:[#allocation8_spill] sm:$0xff]  ;;  %v1609_v56 = vld [vmem:[#allocation2 + $0x2c] sm:$0x1] }
  0xbd   : > { %6763 = vmatpush3.bf16.msra.mxu1 %v7440_v8  ;;  %v3287_v27 = vld [vmem:[#allocation2 + $0xc0] sm:$0xe]  ;;  %v8375_v42 = vrot.slane %v1707_v4, 5  ;;  %v1722_v40 = vshrl.u32 %v1607_v31, 16  ;;  %v1713_v59 = vrot.slane %v1711_v54, 4  ;;  %v489_v57 = vpack.c.bf16 %v9082_v3, %v9081_v33 }
  0xbe   : > { %6764 = vmatprep.subr.bf16.mxu1 %v7443_v0  ;;  %v3288_v47 = vld [vmem:[#allocation2 + $0xc4] sm:$0xf]  ;;  %v3289_v29 = vld [vmem:[#allocation2 + $0xc8] sm:$0x1]  ;;  %v5993_v30 = vrot.slane %v3287_v27, 9  ;;  %v8377_v15 = vrot.slane %v1690_v41, 4  ;;  %v1704_v14 = vor.u32 %v1703_v7, %v1700_v32  ;;  %v497_v7 = vpack.c.bf16 %v8301_v28, %v8297_v60 }
  0xbf   : > { %v3445_v8 = vrot.slane %v3288_v47, 5  ;;  %v3448_v36 = vrot.slane %v3289_v29, 5  ;;  %v1714_v22 = vor.u32 %v1713_v59, %v8375_v42  ;;  %v1725_v41 = vshll.u32 %v1607_v31, 16  ;;  %v7455_v47 = vld [vmem:[%s9043_s3 + $0x78] sm:$0xff]   ;;  %v8563_v28 = vld [vmem:[%s9043_s3 + $0x200] sm:$0xff]  }
  0xc0   : > { %6733 = vmatmul.mubr.bf16.gmra.mrb[8].mxu1 %v487_v34  ;;  %v7451_v34 = vld [vmem:[%s9043_s3 + $0x70] sm:$0xff]   ;;  %v8395_v50 = vrot.slane %v1704_v14, 4  ;;  %v1724_v4 = vrot.slane %v1722_v40, 4  ;;  %v1731_v32 = vshll.u32 %v1608_v51, 16  ;;  %v1735_v54 = vshrl.u32 %v1608_v51, 16 }
  0xc1   : > { %6736 = vmatprep.mubr.bf16.mxu1 %v488_v17  ;;  %6765 = vmatpush3.bf16.msra.mxu1 %v7443_v0  ;;  %v3446_v38 = vsel %vm7908_vm10, %v5993_v30, %v3445_v8  ;;  %v3447_v39 = vrot.slane %v3445_v8, 4  ;;  %v8393_v0 = vrot.slane %v1717_v61, 5  ;;  %v8404_v29 = vrot.slane %v1714_v22, 4  ;;  %v1610_v8 = vld [vmem:[#allocation2 + $0x30] sm:$0xf] }
  0xc2   : > { %6766 = vmatprep.subr.bf16.mxu1 %v7447_v46  ;;  %v1727_v61 = vrot.slane %v1725_v41, 5  ;;  %v1662_v31 = vsel %vm8389_vm13, %v8355_v52, %v8340_v21  ;;  %v8410_v40 = vrot.slane %v1731_v32, 5  ;;  %v1737_v59 = vrot.slane %v1735_v54, 4  ;;  %v1612_v33 = vld [vmem:[#allocation2 + $0x38] sm:$0x1] }
  0xc3   : > { %v3449_v27 = vsel %vm7908_vm10, %v3447_v39, %v3448_v36  ;;  %v1611_v36 = vld [vmem:[#allocation2 + $0x34] sm:$0xf]  ;;  %v1672_v14 = vsel %vm8389_vm13, %v8363_v62, %v8357_v10  ;;  %v1741_v51 = vshll.u32 %v1609_v56, 16  ;;  %v1746_v3 = vshrl.u32 %v1610_v8, 16  ;;  %v1613_v56 = vld [vmem:[#allocation2 + $0x3c] sm:$0xf] }
  0xc4   : > { %v6025_v30 = vcombine.low %v3446_v38, %v3449_v27  ;;  %v1728_v21 = vor.u32 %v1727_v61, %v1724_v4  ;;  %v1749_v52 = vshll.u32 %v1610_v8, 16  ;;  %v1755_v22 = vshll.u32 %v1611_v36, 16  ;;  %v7446_v4 = vld [vmem:[#allocation2 + $0x30] sm:$0xff]  }
  0xc5   : > { %6767 = vmatpush3.bf16.msra.mxu1 %v7447_v46  ;;  %v1686_v46 = vsel %vm8389_vm13, %v8371_v2, %v8359_v11  ;;  %v1759_v38 = vshrl.u32 %v1611_v36, 16  ;;  %v1696_v10 = vsel %vm8389_vm13, %v8377_v15, %v8373_v6  ;;  %v1710_v11 = vsel %vm8389_vm13, %v8395_v50, %v8375_v42  ;;  %v1614_v15 = vld [vmem:[#allocation2 + $0x40] sm:$0xf]  ;;  %v7525_v17 = vld [vmem:[#allocation2 + $0x74] sm:$0x1] }
  0xc6   : > { %6768 = vmatprep.subr.bf16.mxu1 %v7451_v34  ;;  %6945 = vmatmul.mubr.bf16.gmra.mrb[28].mxu0 %v6025_v30  ;;  %v1738_v62 = vor.u32 %v1737_v59, %v8410_v40  ;;  %v1748_v2 = vrot.slane %v1746_v3, 4  ;;  %v1751_v39 = vrot.slane %v1749_v52, 5  ;;  %v1765_v6 = vshll.u32 %v1612_v33, 16  ;;  %v8437_v42 = vld [vmem:[%s9043_s3 + $0x80] sm:$0xff]   ;;  %v7449_v30 = vld [vmem:[%s9043_s3 + $0x1c8] sm:$0xff]  }
  0xc7   : > { %6964 = vmatprep.mubr.bf16.mxu0 %v7442_v45  ;;  %v8432_v45 = vrot.slane %v1755_v22, 5  ;;  %v1761_v41 = vrot.slane %v1759_v38, 4  ;;  %v1720_v55 = vsel %vm8389_vm13, %v8404_v29, %v8393_v0  ;;  %v8443_v53 = vrot.slane %v1741_v51, 5 }
  0xc8   : > { %6737 = vmatmul.mubr.bf16.gmra.mrb[12].mxu1 %v489_v57  ;;  %v7444_v57 = vld [vmem:[#allocation2 + $0x24] sm:$0xff]   ;;  %v1773_v50 = vshll.u32 %v1613_v56, 16  ;;  %v8445_v32 = vrot.slane %v1728_v21, 4  ;;  %v1752_v54 = vor.u32 %v1751_v39, %v1748_v2  ;;  %v1779_v61 = vshll.u32 %v1614_v15, 16  ;;  %v1617_v39 = vld [vmem:[#allocation2 + $0x4c] sm:$0xf] }
  0xc9   : > { %6740 = vmatprep.mubr.bf16.mxu1 %v490_v12  ;;  %6769 = vmatpush3.bf16.msra.mxu1 %v7451_v34  ;;  %v1615_v12 = vld [vmem:[#allocation2 + $0x44] sm:$0x1]  ;;  %v1770_v34 = vshrl.u32 %v1613_v56, 16  ;;  %v1762_v27 = vor.u32 %v1761_v41, %v8432_v45  ;;  %v8451_v59 = vrot.slane %v1738_v62, 4  ;;  %v1783_v29 = vshrl.u32 %v1614_v15, 16  ;;  %v7453_v62 = vld [vmem:[%s9043_s3 + $0x1d0] sm:$0xff]  }
  0xca   : > { %6770 = vmatprep.subr.bf16.mxu1 %v7455_v47  ;;  %v1775_v0 = vrot.slane %v1773_v50, 5  ;;  %v8453_v36 = vrot.slane %v1752_v54, 4  ;;  %v8455_v51 = vrot.slane %v1765_v6, 5  ;;  %v8457_v33 = vrot.slane %v1779_v61, 5  ;;  %v1616_v56 = vld [vmem:[#allocation2 + $0x48] sm:$0xf] }
  0xcb   : > { %v1772_v8 = vrot.slane %v1770_v34, 4  ;;  %v1789_v3 = vshll.u32 %v1615_v12, 16  ;;  %v8459_v21 = vcombine.low %v1662_v31, %v1672_v14  ;;  %v1763_v52 = vrot.slane %v1762_v27, 4 }
  0xcc   : > { %v1785_v38 = vrot.slane %v1783_v29, 4  ;;  %v8467_v2 = vcombine.low %v1710_v11, %v1720_v55  ;;  %v1734_v31 = vsel %vm8389_vm13, %v8445_v32, %v8410_v40  ;;  %v1794_v41 = vshrl.u32 %v1616_v56, 16  ;;  %v7448_v40 = vld [vmem:[#allocation2 + $0x3c] sm:$0xff]  }
  0xcd   : > { %6771 = vmatpush3.bf16.msra.mxu1 %v7455_v47  ;;  %v1776_v22 = vor.u32 %v1775_v0, %v1772_v8  ;;  %v8465_v47 = vcombine.low %v1686_v46, %v1696_v10  ;;  %v1791_v14 = vrot.slane %v1789_v3, 5  ;;  %v1744_v46 = vsel %vm8389_vm13, %v8451_v59, %v8443_v53  ;;  %v1621_v32 = vld [vmem:[#allocation2 + $0x5c] sm:$0x1] }
  0xce   : > { %6804 = vmatprep.subr.bf16.mxu1 %v8437_v42  ;;  %6965 = vmatmul.mubr.bf16.vlgmr.msra.gmra.mrb[0].mxu0 %v7444_v57  ;;  %v1786_v11 = vor.u32 %v1785_v38, %v8457_v33  ;;  %v1618_v57 = vld [vmem:[#allocation2 + $0x50] sm:$0x1]  ;;  %v1797_v25 = vshll.u32 %v1616_v56, 16  ;;  %v1803_v37 = vshll.u32 %v1617_v39, 16  ;;  %v1758_v6 = vsel %vm8389_vm13, %v8453_v36, %v8432_v45  ;;  %v7457_v59 = vld [vmem:[%s9043_s3 + $0x1d8] sm:$0xff]  }
  0xcf   : > { %6997 = vmatpush3.bf16.msra.mxu0 %v8204_v49  ;;  %v1777_v10 = vrot.slane %v1776_v22, 4  ;;  %6968 = vmatprep.mubr.bf16.mxu0 %v7446_v4  ;;  %v1813_v49 = vshll.u32 %v1618_v57, 16  ;;  %v1768_v15 = vsel %vm8389_vm13, %v1763_v52, %v8455_v51  ;;  %v1796_v53 = vrot.slane %v1794_v41, 4  ;;  %v1622_v57 = vld [vmem:[#allocation2 + $0x60] sm:$0xf] }
  0xd0   : > { %6741 = vmatmul.mubr.bf16.gmra.mrb[16].mxu1 %v491_v44  ;;  %v1807_v44 = vshrl.u32 %v1617_v39, 16  ;;  %6998 = vmatprep.subr.bf16.mxu0 %v7449_v30  ;;  %v1787_v55 = vrot.slane %v1786_v11, 4  ;;  %v1799_v34 = vrot.slane %v1797_v25, 5  ;;  %v1805_v50 = vrot.slane %v1803_v37, 5  ;;  %v1624_v41 = vld [vmem:[#allocation2 + $0x68] sm:$0x1] }
  0xd1   : > { %6744 = vmatprep.mubr.bf16.mxu1 %v492_v13  ;;  %v7450_v13 = vld [vmem:[#allocation2 + $0x48] sm:$0xff]   ;;  %v1782_v12 = vsel %vm8389_vm13, %v1777_v10, %v8457_v33  ;;  %v1815_v54 = vrot.slane %v1813_v49, 5  ;;  %v1818_v45 = vshrl.u32 %v1619_v20, 16  ;;  %v1821_v27 = vshll.u32 %v1619_v20, 16  ;;  %v7461_v25 = vld [vmem:[%s9043_s3 + $0x1e0] sm:$0xff]  }
  0xd2   : > { %v1809_v4 = vrot.slane %v1807_v44, 4  ;;  %v1827_v61 = vshll.u32 %v1620_v19, 16  ;;  %v1792_v8 = vsel %vm8389_vm13, %v1787_v55, %v1791_v14  ;;  %v1800_v0 = vor.u32 %v1799_v34, %v1796_v53  ;;  %v4160_v55 = vld [vmem:[#allocation2 + $0x1c] sm:$0xf]  ;;  %v7454_v53 = vld [vmem:[#allocation2 + $0x60] sm:$0xff]  }
  0xd3   : > { %6999 = vmatpush3.bf16.msra.mxu0 %v7449_v30  ;;  %v1831_v36 = vshrl.u32 %v1620_v19, 16  ;;  %v1820_v51 = vrot.slane %v1818_v45, 4  ;;  %v1823_v33 = vrot.slane %v1821_v27, 5  ;;  %v1837_v52 = vshll.u32 %v1621_v32, 16  ;;  %v1625_v45 = vld [vmem:[#allocation2 + $0x6c] sm:$0xf] }
  0xd4   : > { %7000 = vmatprep.subr.bf16.mxu0 %v7453_v62  ;;  %v1810_v29 = vor.u32 %v1809_v4, %v1805_v50  ;;  %v1829_v3 = vrot.slane %v1827_v61, 5  ;;  %v8500_v30 = vcombine.low %v1734_v31, %v1744_v46  ;;  %v1801_v22 = vrot.slane %v1800_v0, 4  ;;  %v7452_v31 = vld [vmem:[#allocation2 + $0x54] sm:$0xff]   ;;  %v7465_v27 = vld [vmem:[%s9043_s3 + $0x1e8] sm:$0xff]  }
  0xd5   : > { %v1833_v56 = vrot.slane %v1831_v36, 4  ;;  %v8505_v39 = vcombine.low %v1758_v6, %v1768_v15  ;;  %v8507_v14 = vcombine.low %v1782_v12, %v1792_v8  ;;  %v1824_v10 = vor.u32 %v1823_v33, %v1820_v51  ;;  %v4161_v12 = vld [vmem:[#allocation2 + $0x20] sm:$0x1]  ;;  %v1626_v36 = vld [vmem:[#allocation2 + $0x70] sm:$0xf] }
  0xd6   : > { %6969 = vmatmul.mubr.bf16.gmra.mrb[4].mxu0 %v7448_v40  ;;  %v1811_v38 = vrot.slane %v1810_v29, 4  ;;  %v1839_v11 = vrot.slane %v1837_v52, 5  ;;  %v1806_v46 = vsel %vm8389_vm13, %v1801_v22, %v1805_v50  ;;  %v1842_v40 = vshrl.u32 %v1622_v57, 16 }
  0xd7   : > { %6972 = vmatprep.mubr.bf16.mxu0 %v7450_v13  ;;  %7001 = vmatpush3.bf16.msra.mxu0 %v7453_v62  ;;  %v1834_v24 = vor.u32 %v1833_v56, %v1829_v3  ;;  %v1825_v35 = vrot.slane %v1824_v10, 4  ;;  %v1845_v18 = vshll.u32 %v1622_v57, 16  ;;  %v4159_v62 = vld [vmem:[#allocation2 + $0x18] sm:$0xf]  ;;  %v1861_v15 = vshll.u32 %v1624_v41, 16  ;;  %v7456_v10 = vld [vmem:[#allocation2 + $0x6c] sm:$0xff]  }
  0xd8   : > { %6745 = vmatmul.mubr.bf16.gmra.mrb[20].mxu1 %v493_v16  ;;  %v1816_v1 = vsel %vm8389_vm13, %v1811_v38, %v1815_v54  ;;  %v1623_v16 = vld [vmem:[#allocation2 + $0x64] sm:$0xf]  ;;  %7002 = vmatprep.subr.bf16.mxu0 %v7457_v59  ;;  %v1844_v49 = vrot.slane %v1842_v40, 4  ;;  %v4208_v34 = vshrl.u32 %v4159_v62, 16  ;;  %v4211_v54 = vshll.u32 %v4159_v62, 16 }
  0xd9   : > { %6748 = vmatprep.mubr.bf16.mxu1 %v494_v63  ;;  %v8519_v37 = vcombine.low %v1806_v46, %v1816_v1  ;;  %v1851_v63 = vshll.u32 %v1623_v16, 16  ;;  %v1835_v44 = vrot.slane %v1834_v24, 4  ;;  %v1855_v6 = vshrl.u32 %v1623_v16, 16  ;;  %v1627_v1 = vld [vmem:[#allocation2 + $0x74] sm:$0x1] }
  0xda   : > { %v1830_v20 = vsel %vm8389_vm13, %v1825_v35, %v1829_v3  ;;  %v1847_v19 = vrot.slane %v1845_v18, 5  ;;  %v1863_v32 = vrot.slane %v1861_v15, 5  ;;  %v4210_v0 = vrot.slane %v4208_v34, 4  ;;  %v7458_v35 = vld [vmem:[#allocation2 + $0x78] sm:$0xff]  }
  0xdb   : > { %v1853_v13 = vrot.slane %v1851_v63, 5  ;;  %7003 = vmatpush3.bf16.msra.mxu0 %v7457_v59  ;;  %v1840_v50 = vsel %vm8389_vm13, %v1835_v44, %v1839_v11  ;;  %v1857_v4 = vrot.slane %v1855_v6, 4  ;;  %v4217_v29 = vshll.u32 %v4160_v55, 16 }
  0xdc   : > { %7004 = vmatprep.subr.bf16.mxu0 %v7461_v25  ;;  %v8528_v61 = vcombine.low %v1830_v20, %v1840_v50  ;;  %v1848_v8 = vor.u32 %v1847_v19, %v1844_v49  ;;  %v4213_v51 = vrot.slane %v4211_v54, 5  ;;  %v4221_v33 = vshrl.u32 %v4160_v55, 16  ;;  %v7473_v49 = vld [vmem:[%s9043_s3 + $0x1f8] sm:$0xff]  }
  0xdd   : > { %v1858_v59 = vor.u32 %v1857_v4, %v1853_v13  ;;  %v4227_v3 = vshll.u32 %v4161_v12, 16  ;;  %v4219_v22 = vrot.slane %v4217_v29, 5  ;;  %v1866_v38 = vshrl.u32 %v1625_v45, 16  ;;  %v1628_v50 = vld [vmem:[#allocation2 + $0x78] sm:$0xf] }
  0xde   : > { %6973 = vmatmul.mubr.bf16.gmra.mrb[8].mxu0 %v7452_v31  ;;  %v1849_v52 = vrot.slane %v1848_v8, 4  ;;  %v1869_v56 = vshll.u32 %v1625_v45, 16  ;;  %v4214_v57 = vor.u32 %v4213_v51, %v4210_v0  ;;  %v4223_v31 = vrot.slane %v4221_v33, 4  ;;  %v7460_v51 = vld [vmem:[#allocation2 + $0x84] sm:$0xff]  }
  0xdf   : > { %6976 = vmatprep.mubr.bf16.mxu0 %v7454_v53  ;;  %7005 = vmatpush3.bf16.msra.mxu0 %v7461_v25  ;;  %v1859_v11 = vrot.slane %v1858_v59, 4  ;;  %v4229_v46 = vrot.slane %v4227_v3, 5  ;;  %v1875_v16 = vshll.u32 %v1626_v36, 16  ;;  %v1879_v40 = vshrl.u32 %v1626_v36, 16  ;;  %v4163_v25 = vld [vmem:[#allocation2 + $0x28] sm:$0xf] }
  0xe0   : > { %6749 = vmatmul.mubr.bf16.gmra.mrb[24].mxu1 %v495_v5  ;;  %7006 = vmatprep.subr.bf16.mxu0 %v7465_v27  ;;  %v1854_v48 = vsel %vm8389_vm13, %v1849_v52, %v1853_v13  ;;  %v1868_v5 = vrot.slane %v1866_v38, 4  ;;  %v1871_v24 = vrot.slane %v1869_v56, 5  ;;  %v4224_v41 = vor.u32 %v4223_v31, %v4219_v22  ;;  %v4164_v53 = vld [vmem:[#allocation2 + $0x2c] sm:$0x1]  ;;  %v1630_v59 = vld [vmem:[#allocation2 + $0x80] sm:$0x1] }
  0xe1   : > { %6752 = vmatprep.mubr.bf16.mxu1 %v496_v58  ;;  %v1864_v9 = vsel %vm8389_vm13, %v1859_v11, %v1863_v32  ;;  %v4215_v58 = vrot.slane %v4214_v57, 4  ;;  %v1877_v62 = vrot.slane %v1875_v16, 5  ;;  %v1885_v44 = vshll.u32 %v1627_v1, 16  ;;  %v4165_v38 = vld [vmem:[#allocation2 + $0x30] sm:$0xf] }
  0xe2   : > { %v8543_v18 = vcombine.low %v1854_v48, %v1864_v9  ;;  %v1872_v63 = vor.u32 %v1871_v24, %v1868_v5  ;;  %v4225_v15 = vrot.slane %v4224_v41, 4  ;;  %v1881_v55 = vrot.slane %v1879_v40, 4  ;;  %v4166_v11 = vld [vmem:[#allocation2 + $0x34] sm:$0xf]  ;;  %v4167_v41 = vld [vmem:[#allocation2 + $0x38] sm:$0x1] }
  0xe3   : > { %7007 = vmatpush3.bf16.msra.mxu0 %v7465_v27  ;;  %v4220_v6 = vsel %vm8389_vm13, %v4215_v58, %v4219_v22  ;;  %v4232_v20 = vshrl.u32 %v4162_v26, 16  ;;  %v1887_v13 = vrot.slane %v1885_v44, 5  ;;  %v4235_v12 = vshll.u32 %v4162_v26, 16  ;;  %v1629_v27 = vld [vmem:[#allocation2 + $0x7c] sm:$0xf]  ;;  %v7462_v1 = vld [vmem:[#allocation2 + $0x90] sm:$0xff]  }
  0xe4   : > { %7008 = vmatprep.subr.bf16.mxu0 %v7469_v43  ;;  %v1873_v19 = vrot.slane %v1872_v63, 4  ;;  %v4241_v34 = vshll.u32 %v4163_v25, 16  ;;  %v4230_v4 = vsel %vm8389_vm13, %v4225_v15, %v4229_v46  ;;  %v1882_v32 = vor.u32 %v1881_v55, %v1877_v62  ;;  %v1631_v44 = vld [vmem:[#allocation2 + $0x84] sm:$0xf] }
  0xe5   : > { %v4234_v54 = vrot.slane %v4232_v20, 4  ;;  %v4245_v45 = vshrl.u32 %v4163_v25, 16  ;;  %v8555_v8 = vcombine.low %v4220_v6, %v4230_v4  ;;  %v4237_v29 = vrot.slane %v4235_v12, 5 }
  0xe6   : > { %6977 = vmatmul.mubr.bf16.gmra.mrb[12].mxu0 %v7456_v10  ;;  %v1878_v0 = vsel %vm8389_vm13, %v1873_v19, %v1877_v62  ;;  %v4243_v36 = vrot.slane %v4241_v34, 5  ;;  %v1883_v33 = vrot.slane %v1882_v32, 4  ;;  %v4251_v52 = vshll.u32 %v4164_v53, 16  ;;  %v1632_v53 = vld [vmem:[#allocation2 + $0x88] sm:$0xf]  ;;  %v7467_v34 = vld [vmem:[%s9043_s3 + $0x90] sm:$0xff]  }
  0xe7   : > { %6980 = vmatprep.mubr.bf16.mxu0 %v7458_v35  ;;  %7009 = vmatpush3.bf16.msra.mxu0 %v7469_v43  ;;  %v4247_v3 = vrot.slane %v4245_v45, 4  ;;  %v1890_v22 = vshrl.u32 %v1628_v50, 16  ;;  %v4238_v60 = vor.u32 %v4237_v29, %v4234_v54  ;;  %v1899_v56 = vshll.u32 %v1629_v27, 16  ;;  %v7463_v43 = vld [vmem:[%s9043_s3 + $0x88] sm:$0xff]  }
  0xe8   : > { %6753 = vmatmul.mubr.bf16.gmra.mrb[28].mxu1 %v497_v7  ;;  %7010 = vmatprep.subr.bf16.mxu0 %v7473_v49  ;;  %v1893_v7 = vshll.u32 %v1628_v50, 16  ;;  %v1903_v10 = vshrl.u32 %v1629_v27, 16  ;;  %v4253_v31 = vrot.slane %v4251_v52, 5  ;;  %v1909_v58 = vshll.u32 %v1630_v59, 16  ;;  %v1633_v27 = vld [vmem:[#allocation2 + $0x8c] sm:$0x1] }
  0xe9   : > { %6772 = vmatprep.mubr.bf16.mxu1 %v8459_v21  ;;  %v1888_v21 = vsel %vm8389_vm13, %v1883_v33, %v1887_v13  ;;  %v4248_v57 = vor.u32 %v4247_v3, %v4243_v36  ;;  %v1892_v46 = vrot.slane %v1890_v22, 4  ;;  %v4239_v5 = vrot.slane %v4238_v60, 4  ;;  %v4169_v3 = vld [vmem:[#allocation2 + $0x40] sm:$0xf]  ;;  %v7466_v52 = vld [vmem:[#allocation2 + $0xa8] sm:$0xff]  }
  0xea   : > { %v8570_v48 = vcombine.low %v1878_v0, %v1888_v21  ;;  %v1895_v24 = vrot.slane %v1893_v7, 5  ;;  %v1901_v16 = vrot.slane %v1899_v56, 5  ;;  %v1905_v9 = vrot.slane %v1903_v10, 4  ;;  %v7471_v56 = vld [vmem:[%s9043_s3 + $0x98] sm:$0xff]  }
  0xeb   : > { %7011 = vmatpush3.bf16.msra.mxu0 %v7473_v49  ;;  %v4249_v26 = vrot.slane %v4248_v57, 4  ;;  %v4256_v40 = vshrl.u32 %v4165_v38, 16  ;;  %v4244_v25 = vsel %vm8389_vm13, %v4239_v5, %v4243_v36  ;;  %v4259_v63 = vshll.u32 %v4165_v38, 16  ;;  %v4168_v36 = vld [vmem:[#allocation2 + $0x3c] sm:$0xf] }
  0xec   : > { %7044 = vmatprep.subr.bf16.mxu0 %v8563_v28  ;;  %v1896_v35 = vor.u32 %v1895_v24, %v1892_v46  ;;  %v4265_v62 = vshll.u32 %v4166_v11, 16  ;;  %v1906_v15 = vor.u32 %v1905_v9, %v1901_v16  ;;  %v1911_v49 = vrot.slane %v1909_v58, 5  ;;  %v4170_v57 = vld [vmem:[#allocation2 + $0x44] sm:$0x1] }
  0xed   : > { %v4254_v6 = vsel %vm8389_vm13, %v4249_v26, %v4253_v31  ;;  %v4258_v55 = vrot.slane %v4256_v40, 4  ;;  %v4261_v13 = vrot.slane %v4259_v63, 5  ;;  %v4269_v4 = vshrl.u32 %v4166_v11, 16  ;;  %v1635_v63 = vld [vmem:[#allocation2 + $0x94] sm:$0xf] }
  0xee   : > { %6981 = vmatmul.mubr.bf16.gmra.mrb[16].mxu0 %v7460_v51  ;;  %v8578_v20 = vcombine.low %v4244_v25, %v4254_v6  ;;  %v1897_v19 = vrot.slane %v1896_v35, 4  ;;  %v4267_v12 = vrot.slane %v4265_v62, 5  ;;  %v1907_v50 = vrot.slane %v1906_v15, 4  ;;  %v1636_v15 = vld [vmem:[#allocation2 + $0x98] sm:$0x1] }
  0xef   : > { %6984 = vmatprep.mubr.bf16.mxu0 %v7462_v1  ;;  %v4275_v32 = vshll.u32 %v4167_v41, 16  ;;  %v1914_v54 = vshrl.u32 %v1631_v44, 16  ;;  %v4262_v45 = vor.u32 %v4261_v13, %v4258_v55  ;;  %v1917_v0 = vshll.u32 %v1631_v44, 16  ;;  %v4171_v55 = vld [vmem:[#allocation2 + $0x48] sm:$0xf] }
  0xf0   : > { %6773 = vmatmul.mubr.bf16.vlgmr.msra.gmra.mrb[0].mxu1 %v8465_v47  ;;  %v1902_v47 = vsel %vm8389_vm13, %v1897_v19, %v1901_v16  ;;  %v1923_v29 = vshll.u32 %v1632_v53, 16  ;;  %v4271_v59 = vrot.slane %v4269_v4, 4  ;;  %v1927_v11 = vshrl.u32 %v1632_v53, 16  ;;  %v1634_v16 = vld [vmem:[#allocation2 + $0x90] sm:$0xf] }
  0xf1   : > { %6805 = vmatpush3.bf16.msra.mxu1 %v8437_v42  ;;  %6776 = vmatprep.mubr.bf16.mxu1 %v8467_v2  ;;  %v7464_v42 = vld [vmem:[#allocation2 + $0x9c] sm:$0xff]   ;;  %v1912_v2 = vsel %vm8389_vm13, %v1907_v50, %v1911_v49  ;;  %v4277_v51 = vrot.slane %v4275_v32, 5  ;;  %v1916_v33 = vrot.slane %v1914_v54, 4  ;;  %v4263_v38 = vrot.slane %v4262_v45, 4 }
  0xf2   : > { %6806 = vmatprep.subr.bf16.mxu1 %v7463_v43  ;;  %v8589_v22 = vcombine.low %v1902_v47, %v1912_v2  ;;  %v1919_v60 = vrot.slane %v1917_v0, 5  ;;  %v1925_v7 = vrot.slane %v1923_v29, 5  ;;  %v4272_v10 = vor.u32 %v4271_v59, %v4267_v12  ;;  %v7470_v54 = vld [vmem:[#allocation2 + $0xc0] sm:$0xff]   ;;  %v4172_v2 = vld [vmem:[#allocation2 + $0x4c] sm:$0xf] }
  0xf3   : > { %v1933_v21 = vshll.u32 %v1633_v27, 16  ;;  %v4280_v31 = vshrl.u32 %v4168_v36, 16  ;;  %v4268_v46 = vsel %vm8389_vm13, %v4263_v38, %v4267_v12  ;;  %v4283_v5 = vshll.u32 %v4168_v36, 16  ;;  %v7468_v12 = vld [vmem:[#allocation2 + $0xb4] sm:$0xff]  }
  0xf4   : > { %v1920_v1 = vor.u32 %v1919_v60, %v1916_v33  ;;  %v4289_v24 = vshll.u32 %v4169_v3, 16  ;;  %v4273_v26 = vrot.slane %v4272_v10, 4  ;;  %v4293_v35 = vshrl.u32 %v4169_v3, 16  ;;  %v7476_v33 = vld [vmem:[%s9043_s3 + $0xa8] sm:$0xff]   ;;  %v4173_v60 = vld [vmem:[#allocation2 + $0x50] sm:$0x1] }
  0xf5   : > { %6807 = vmatpush3.bf16.msra.mxu1 %v7463_v43  ;;  %v1929_v43 = vrot.slane %v1927_v11, 4  ;;  %v1935_v9 = vrot.slane %v1933_v21, 5  ;;  %v4282_v58 = vrot.slane %v4280_v31, 4  ;;  %v4285_v40 = vrot.slane %v4283_v5, 5  ;;  %v1637_v21 = vld [vmem:[#allocation2 + $0x9c] sm:$0xf] }
  0xf6   : > { %6808 = vmatprep.subr.bf16.mxu1 %v7467_v34  ;;  %6985 = vmatmul.mubr.bf16.gmra.mrb[20].mxu0 %v7464_v42  ;;  %v1921_v41 = vrot.slane %v1920_v1, 4  ;;  %v4291_v25 = vrot.slane %v4289_v24, 5  ;;  %v4278_v62 = vsel %vm8389_vm13, %v4273_v26, %v4277_v51  ;;  %v4299_v6 = vshll.u32 %v4170_v57, 16  ;;  %v7478_v5 = vld [vmem:[%s9043_s3 + $0xb0] sm:$0xff]  }
  0xf7   : > { %6988 = vmatprep.mubr.bf16.mxu0 %v7466_v52  ;;  %v1930_v44 = vor.u32 %v1929_v43, %v1925_v7  ;;  %v1938_v49 = vshrl.u32 %v1634_v16, 16  ;;  %v8603_v53 = vcombine.low %v4268_v46, %v4278_v62  ;;  %v4295_v13 = vrot.slane %v4293_v35, 4  ;;  %v7472_v35 = vld [vmem:[#allocation2 + $0xcc] sm:$0xff]  }
  0xf8   : > { %6777 = vmatmul.mubr.bf16.gmra.mrb[4].mxu1 %v8500_v30  ;;  %v7474_v30 = vld [vmem:[%s9043_s3 + $0xa0] sm:$0xff]   ;;  %v1926_v19 = vsel %vm8389_vm13, %v1921_v41, %v1925_v7  ;;  %v4301_v50 = vrot.slane %v4299_v6, 5  ;;  %v1941_v32 = vshll.u32 %v1634_v16, 16  ;;  %v1947_v27 = vshll.u32 %v1635_v63, 16 }
  0xf9   : > { %6780 = vmatprep.mubr.bf16.mxu1 %v8505_v39  ;;  %6809 = vmatpush3.bf16.msra.mxu1 %v7467_v34  ;;  %v4286_v39 = vor.u32 %v4285_v40, %v4282_v58  ;;  %v1931_v34 = vrot.slane %v1930_v44, 4  ;;  %v1940_v4 = vrot.slane %v1938_v49, 4  ;;  %v4296_v45 = vor.u32 %v4295_v13, %v4291_v25 }
  0xfa   : > { %6810 = vmatprep.subr.bf16.mxu1 %v7471_v56  ;;  %v1951_v0 = vshrl.u32 %v1635_v63, 16  ;;  %v1943_v36 = vrot.slane %v1941_v32, 5  ;;  %v1957_v42 = vshll.u32 %v1636_v15, 16  ;;  %v4304_v59 = vshrl.u32 %v4171_v55, 16 }
  0xfb   : > { %v4287_v47 = vrot.slane %v4286_v39, 4  ;;  %v1936_v29 = vsel %vm8389_vm13, %v1931_v34, %v1935_v9  ;;  %v4297_v52 = vrot.slane %v4296_v45, 4  ;;  %v1949_v38 = vrot.slane %v1947_v27, 5  ;;  %v1639_v9 = vld [vmem:[#allocation2 + $0xa4] sm:$0x1]  ;;  %v7480_v45 = vld [vmem:[%s9043_s3 + $0xb8] sm:$0xff]  }
  0xfc   : > { %v8609_v51 = vcombine.low %v1926_v19, %v1936_v29  ;;  %v1944_v7 = vor.u32 %v1943_v36, %v1940_v4  ;;  %v1959_v10 = vrot.slane %v1957_v42, 5  ;;  %v4306_v11 = vrot.slane %v4304_v59, 4  ;;  %v4175_v19 = vld [vmem:[#allocation2 + $0x58] sm:$0xf] }
  0xfd   : > { %6811 = vmatpush3.bf16.msra.mxu1 %v7471_v56  ;;  %v4292_v3 = vsel %vm8389_vm13, %v4287_v47, %v4291_v25  ;;  %v1953_v56 = vrot.slane %v1951_v0, 4  ;;  %v4302_v57 = vsel %vm8389_vm13, %v4297_v52, %v4301_v50  ;;  %v4307_v31 = vshll.u32 %v4171_v55, 16  ;;  %v4176_v50 = vld [vmem:[#allocation2 + $0x5c] sm:$0x1] }
  0xfe   : > { %6812 = vmatprep.subr.bf16.mxu1 %v7474_v30  ;;  %6989 = vmatmul.mubr.bf16.gmra.mrb[24].mxu0 %v7468_v12  ;;  %v4313_v46 = vshll.u32 %v4172_v2, 16  ;;  %v4317_v1 = vshrl.u32 %v4172_v2, 16  ;;  %v8623_v24 = vcombine.low %v4292_v3, %v4302_v57  ;;  %v1945_v16 = vrot.slane %v1944_v7, 4  ;;  %v1640_v3 = vld [vmem:[#allocation2 + $0xa8] sm:$0xf] }
  0xff   : > { %6992 = vmatprep.mubr.bf16.mxu0 %v7470_v54  ;;  %v1954_v26 = vor.u32 %v1953_v56, %v1949_v38  ;;  %v4323_v43 = vshll.u32 %v4173_v60, 16  ;;  %v4309_v58 = vrot.slane %v4307_v31, 5  ;;  %v1962_v25 = vshrl.u32 %v1637_v21, 16  ;;  %v8645_v31 = vld [vmem:[#allocation2 + $0xb0] sm:$0x1] }
 0x100   : > { %6781 = vmatmul.mubr.bf16.gmra.mrb[8].mxu1 %v8507_v14  ;;  %v1638_v14 = vld [vmem:[#allocation2 + $0xa0] sm:$0xf]  ;;  %v4315_v41 = vrot.slane %v4313_v46, 5  ;;  %v4319_v40 = vrot.slane %v4317_v1, 4  ;;  %v1950_v63 = vsel %vm8389_vm13, %v1945_v16, %v1949_v38  ;;  %v1981_v34 = vshll.u32 %v1639_v9, 16 }
 0x101   : > { %6784 = vmatprep.mubr.bf16.mxu1 %v8519_v37  ;;  %6813 = vmatpush3.bf16.msra.mxu1 %v7474_v30  ;;  %v1955_v62 = vrot.slane %v1954_v26, 4  ;;  %v4325_v44 = vrot.slane %v4323_v43, 5  ;;  %v1965_v37 = vshll.u32 %v1637_v21, 16  ;;  %v4310_v6 = vor.u32 %v4309_v58, %v4306_v11  ;;  %v4174_v30 = vld [vmem:[#allocation2 + $0x54] sm:$0xf] }
 0x102   : > { %6814 = vmatprep.subr.bf16.mxu1 %v7476_v33  ;;  %v4320_v15 = vor.u32 %v4319_v40, %v4315_v41  ;;  %v1964_v49 = vrot.slane %v1962_v25, 4  ;;  %v1971_v55 = vshll.u32 %v1638_v14, 16  ;;  %v1975_v12 = vshrl.u32 %v1638_v14, 16  ;;  %v4177_v14 = vld [vmem:[#allocation2 + $0x60] sm:$0xf] }
 0x103   : > { %v1960_v39 = vsel %vm8389_vm13, %v1955_v62, %v1959_v10  ;;  %v1967_v13 = vrot.slane %v1965_v37, 5  ;;  %v4311_v32 = vrot.slane %v4310_v6, 4  ;;  %v1983_v29 = vrot.slane %v1981_v34, 5  ;;  %v8652_v25 = vld [vmem:[#allocation2 + $0x64] sm:$0xf] }
 0x104   : > { %v8629_v4 = vcombine.low %v1950_v63, %v1960_v39  ;;  %v4321_v54 = vrot.slane %v4320_v15, 4  ;;  %v1973_v47 = vrot.slane %v1971_v55, 5  ;;  %v1977_v0 = vrot.slane %v1975_v12, 4  ;;  %v8659_v37 = vld [vmem:[%s9043_s3 + $0xc0] sm:$0xff]   ;;  %v8668_v39 = vld [vmem:[#allocation2 + $0x68] sm:$0x1] }
 0x105   : > { %6815 = vmatpush3.bf16.msra.mxu1 %v7476_v33  ;;  %v1968_v27 = vor.u32 %v1967_v13, %v1964_v49  ;;  %v4328_v36 = vshrl.u32 %v4174_v30, 16  ;;  %v4316_v42 = vsel %vm8389_vm13, %v4311_v32, %v4315_v41  ;;  %v4331_v59 = vshll.u32 %v4174_v30, 16  ;;  %v1643_v32 = vld [vmem:[#allocation2 + $0xb4] sm:$0xf] }
 0x106   : > { %6816 = vmatprep.subr.bf16.mxu1 %v7478_v5  ;;  %6993 = vmatmul.mubr.bf16.gmra.mrb[28].mxu0 %v7472_v35  ;;  %v4326_v2 = vsel %vm8389_vm13, %v4321_v54, %v4325_v44  ;;  %v4337_v33 = vshll.u32 %v4175_v19, 16  ;;  %v1978_v60 = vor.u32 %v1977_v0, %v1973_v47  ;;  %v4341_v10 = vshrl.u32 %v4175_v19, 16 }
 0x107   : > { %7012 = vmatprep.mubr.bf16.mxu0 %v8555_v8  ;;  %v8641_v52 = vcombine.low %v4316_v42, %v4326_v2  ;;  %v1969_v38 = vrot.slane %v1968_v27, 4  ;;  %v4330_v7 = vrot.slane %v4328_v36, 4  ;;  %v4333_v56 = vrot.slane %v4331_v59, 5  ;;  %v8686_v42 = vld [vmem:[#allocation2 + $0xbc] sm:$0x1] }
 0x108   : > { %6785 = vmatmul.mubr.bf16.gmra.mrb[12].mxu1 %v8528_v61  ;;  %v1641_v61 = vld [vmem:[#allocation2 + $0xac] sm:$0xf]  ;;  %v4339_v8 = vrot.slane %v4337_v33, 5  ;;  %v4347_v11 = vshll.u32 %v4176_v50, 16  ;;  %v1979_v57 = vrot.slane %v1978_v60, 4  ;;  %v1986_v46 = vshrl.u32 %v1640_v3, 16 }
 0x109   : > { %6788 = vmatprep.mubr.bf16.mxu1 %v8543_v18  ;;  %6817 = vmatpush3.bf16.msra.mxu1 %v7478_v5  ;;  %v1974_v21 = vsel %vm8389_vm13, %v1969_v38, %v1973_v47  ;;  %v1989_v18 = vshll.u32 %v1640_v3, 16  ;;  %v4334_v1 = vor.u32 %v4333_v56, %v4330_v7  ;;  %v4343_v16 = vrot.slane %v4341_v10, 4  ;;  %v7477_v5 = vld [vmem:[%s9043_s3 + $0x208] sm:$0xff]   ;;  %v7481_v10 = vld [vmem:[%s9043_s3 + $0x218] sm:$0xff]  }
 0x10a   : > { %6818 = vmatprep.subr.bf16.mxu1 %v7480_v45  ;;  %v4349_v26 = vrot.slane %v4347_v11, 5  ;;  %v1995_v43 = vshll.u32 %v1641_v61, 16  ;;  %v1984_v9 = vsel %vm8389_vm13, %v1979_v57, %v1983_v29  ;;  %v1988_v58 = vrot.slane %v1986_v46, 4  ;;  %v4180_v38 = vld [vmem:[#allocation2 + $0x6c] sm:$0xf] }
 0x10b   : > { %v1991_v41 = vrot.slane %v1989_v18, 5  ;;  %v1999_v40 = vshrl.u32 %v1641_v61, 16  ;;  %v8654_v35 = vcombine.low %v1974_v21, %v1984_v9  ;;  %v4335_v63 = vrot.slane %v4334_v1, 4 }
 0x10c   : > { %v4344_v62 = vor.u32 %v4343_v16, %v4339_v8  ;;  %v1997_v44 = vrot.slane %v1995_v43, 5  ;;  %v2005_v49 = vshll.u32 %v8645_v31, 16  ;;  %v4352_v55 = vshrl.u32 %v4177_v14, 16 }
 0x10d   : > { %6819 = vmatpush3.bf16.msra.mxu1 %v7480_v45  ;;  %v1992_v6 = vor.u32 %v1991_v41, %v1988_v58  ;;  %v2001_v15 = vrot.slane %v1999_v40, 4  ;;  %v4340_v30 = vsel %vm8389_vm13, %v4335_v63, %v4339_v8  ;;  %v4355_v13 = vshll.u32 %v4177_v14, 16  ;;  %v8692_v8 = vld [vmem:[#allocation2 + $0x70] sm:$0xf]  ;;  %v8706_v40 = vld [vmem:[#allocation2 + $0x74] sm:$0x1] }
 0x10e   : > { %7092 = vmatprep.subr.bf16.mxu1 %v8659_v37  ;;  %7013 = vmatmul.mubr.bf16.vlgmr.msra.gmra.mrb[0].mxu0 %v8578_v20  ;;  %v4345_v19 = vrot.slane %v4344_v62, 4  ;;  %v4361_v12 = vshll.u32 %v8652_v25, 16  ;;  %v7479_v20 = vld [vmem:[%s9043_s3 + $0x210] sm:$0xff]   ;;  %v4354_v50 = vrot.slane %v4352_v55, 4  ;;  %v4365_v27 = vshrl.u32 %v8652_v25, 16 }
 0x10f   : > { %7045 = vmatpush3.bf16.msra.mxu0 %v8563_v28  ;;  %7016 = vmatprep.mubr.bf16.mxu0 %v8603_v53  ;;  %v2002_v34 = vor.u32 %v2001_v15, %v1997_v44  ;;  %v2007_v28 = vrot.slane %v2005_v49, 5  ;;  %v4357_v47 = vrot.slane %v4355_v13, 5  ;;  %v4371_v36 = vshll.u32 %v8668_v39, 16  ;;  %v2355_v62 = vld [vmem:[#allocation2] sm:$0xe] }
 0x110   : > { %6789 = vmatmul.mubr.bf16.gmra.mrb[16].mxu1 %v8570_v48  ;;  %v1993_v48 = vrot.slane %v1992_v6, 4  ;;  %7046 = vmatprep.subr.bf16.mxu0 %v7477_v5  ;;  %v4350_v54 = vsel %vm8389_vm13, %v4345_v19, %v4349_v26  ;;  %v4363_v45 = vrot.slane %v4361_v12, 5  ;;  %v4367_v59 = vrot.slane %v4365_v27, 4  ;;  %v8723_v27 = vld [vmem:[#allocation2 + $0x7c] sm:$0xf] }
 0x111   : > { %6792 = vmatprep.mubr.bf16.mxu1 %v8589_v22  ;;  %v8679_v22 = vld [vmem:[#allocation2 + $0xb8] sm:$0xf]  ;;  %v8681_v53 = vcombine.low %v4340_v30, %v4350_v54  ;;  %v2003_v29 = vrot.slane %v2002_v34, 4  ;;  %v4358_v2 = vor.u32 %v4357_v47, %v4354_v50  ;;  %v2010_v33 = vshrl.u32 %v1643_v32, 16  ;;  %v7483_v34 = vld [vmem:[%s9043_s3 + $0x228] sm:$0xff]  }
 0x112   : > { %v1998_v0 = vsel %vm8389_vm13, %v1993_v48, %v1997_v44  ;;  %v2013_v3 = vshll.u32 %v1643_v32, 16  ;;  %v4373_v7 = vrot.slane %v4371_v36, 5  ;;  %v2019_v61 = vshll.u32 %v8679_v22, 16  ;;  %v4183_v48 = vld [vmem:[#allocation2 + $0x78] sm:$0xf] }
 0x113   : > { %7047 = vmatpush3.bf16.msra.mxu0 %v7477_v5  ;;  %v2008_v60 = vsel %vm8389_vm13, %v2003_v29, %v2007_v28  ;;  %v2023_v56 = vshrl.u32 %v8679_v22, 16  ;;  %v4359_v21 = vrot.slane %v4358_v2, 4  ;;  %v4368_v57 = vor.u32 %v4367_v59, %v4363_v45  ;;  %v7497_v32 = vld [vmem:[#allocation2 + $0x4] sm:$0xf]  ;;  %v7498_v47 = vld [vmem:[#allocation2 + $0x8] sm:$0x1] }
 0x114   : > { %7048 = vmatprep.subr.bf16.mxu0 %v7479_v20  ;;  %v8697_v11 = vcombine.low %v1998_v0, %v2008_v60  ;;  %v2012_v46 = vrot.slane %v2010_v33, 4  ;;  %v2015_v18 = vrot.slane %v2013_v3, 5  ;;  %v2021_v1 = vrot.slane %v2019_v61, 5  ;;  %v8725_v59 = vld [vmem:[#allocation2 + $0x80] sm:$0x1] }
 0x115   : > { %v2025_v16 = vrot.slane %v2023_v56, 4  ;;  %v2029_v26 = vshll.u32 %v8686_v42, 16  ;;  %v4364_v43 = vsel %vm8389_vm13, %v4359_v21, %v4363_v45  ;;  %v4369_v14 = vrot.slane %v4368_v57, 4  ;;  %v2356_v21 = vld [vmem:[#allocation2 + $0xc] sm:$0xe] }
 0x116   : > { %7017 = vmatmul.mubr.bf16.gmra.mrb[4].mxu0 %v8623_v24  ;;  %v4376_v5 = vshrl.u32 %v4180_v38, 16  ;;  %v4379_v9 = vshll.u32 %v4180_v38, 16  ;;  %v2016_v58 = vor.u32 %v2015_v18, %v2012_v46  ;;  %v4385_v63 = vshll.u32 %v8692_v8, 16 }
 0x117   : > { %7020 = vmatprep.mubr.bf16.mxu0 %v8641_v52  ;;  %7049 = vmatpush3.bf16.msra.mxu0 %v7479_v20  ;;  %v2026_v24 = vor.u32 %v2025_v16, %v2021_v1  ;;  %v2031_v41 = vrot.slane %v2029_v26, 5  ;;  %v4389_v6 = vshrl.u32 %v8692_v8, 16  ;;  %v4395_v12 = vshll.u32 %v8706_v40, 16 }
 0x118   : > { %6793 = vmatmul.mubr.bf16.gmra.mrb[20].mxu1 %v8609_v51  ;;  %v4374_v51 = vsel %vm8389_vm13, %v4369_v14, %v4373_v7  ;;  %v4378_v52 = vrot.slane %v4376_v5, 4  ;;  %v4381_v44 = vrot.slane %v4379_v9, 5  ;;  %7050 = vmatprep.subr.bf16.mxu0 %v7481_v10  ;;  %v2017_v49 = vrot.slane %v2016_v58, 4  ;;  %v8741_v14 = vld [vmem:[#allocation2 + $0x88] sm:$0xf] }
 0x119   : > { %6796 = vmatprep.mubr.bf16.mxu1 %v8629_v4  ;;  %v7482_v4 = vld [vmem:[%s9043_s3 + $0x220] sm:$0xff]   ;;  %v6096_v15 = vcombine.low %v4364_v43, %v4374_v51  ;;  %v2027_v55 = vrot.slane %v2026_v24, 4  ;;  %v4387_v30 = vrot.slane %v4385_v63, 5  ;;  %v4391_v13 = vrot.slane %v4389_v6, 4  ;;  %v2357_v63 = vld [vmem:[#allocation2 + $0x18] sm:$0xe] }
 0x11a   : > { %v4382_v19 = vor.u32 %v4381_v44, %v4378_v52  ;;  %v5882_v20 = vrot.slane %v2355_v62, 9  ;;  %v2022_v28 = vsel %vm8389_vm13, %v2017_v49, %v2021_v1  ;;  %v2424_v54 = vrot.slane %v7497_v32, 5  ;;  %v7499_v51 = vld [vmem:[#allocation2 + $0x10] sm:$0xf]  ;;  %v7500_v44 = vld [vmem:[#allocation2 + $0x14] sm:$0x1] }
 0x11b   : > { %v2032_v50 = vsel %vm8389_vm13, %v2027_v55, %v2031_v41  ;;  %7051 = vmatpush3.bf16.msra.mxu0 %v7481_v10  ;;  %v2427_v45 = vrot.slane %v7498_v47, 5  ;;  %v4392_v36 = vor.u32 %v4391_v13, %v4387_v30  ;;  %v4397_v2 = vrot.slane %v4395_v12, 5  ;;  %v8746_v41 = vld [vmem:[#allocation2 + $0x8c] sm:$0x1]  ;;  %v7485_v47 = vld [vmem:[%s9043_s3 + $0x238] sm:$0xff]  }
 0x11c   : > { %v5873_v0 = vcombine.low %v2022_v28, %v2032_v50  ;;  %v4383_v29 = vrot.slane %v4382_v19, 4  ;;  %7052 = vmatprep.subr.bf16.mxu0 %v7482_v4  ;;  %v2425_v33 = vsel %vm7908_vm10, %v5882_v20, %v2424_v54  ;;  %v2426_v3 = vrot.slane %v2424_v54, 4  ;;  %v4189_v54 = vld [vmem:[#allocation2 + $0x90] sm:$0xf] }
 0x11d   : > { %v4400_v38 = vshrl.u32 %v4183_v48, 16  ;;  %v4403_v60 = vshll.u32 %v4183_v48, 16  ;;  %v4393_v61 = vrot.slane %v4392_v36, 4  ;;  %v4409_v56 = vshll.u32 %v8723_v27, 16 }
 0x11e   : > { %7021 = vmatmul.mubr.bf16.gmra.mrb[8].mxu0 %v8681_v53  ;;  %v4388_v7 = vsel %vm8389_vm13, %v4383_v29, %v4387_v30  ;;  %v4413_v10 = vshrl.u32 %v8723_v27, 16  ;;  %v2428_v53 = vsel %vm7908_vm10, %v2426_v3, %v2427_v45  ;;  %v4419_v18 = vshll.u32 %v8725_v59, 16 }
 0x11f   : > { %7024 = vmatprep.mubr.bf16.mxu0 %v6096_v15  ;;  %v4402_v57 = vrot.slane %v4400_v38, 4  ;;  %v4405_v46 = vrot.slane %v4403_v60, 5  ;;  %7053 = vmatpush3.bf16.msra.mxu0 %v7482_v4  ;;  %v4398_v1 = vsel %vm8389_vm13, %v4393_v61, %v4397_v2  ;;  %v5914_v16 = vcombine.low %v2425_v33, %v2428_v53  ;;  %v8762_v2 = vld [vmem:[#allocation2 + $0x94] sm:$0xf]  ;;  %v7501_v61 = vld [vmem:[#allocation2 + $0x1c] sm:$0xf] }
 0x120   : > { %6797 = vmatmul.mubr.bf16.gmra.mrb[24].mxu1 %v8654_v35  ;;  %v4186_v35 = vld [vmem:[#allocation2 + $0x84] sm:$0xf]  ;;  %v4411_v26 = vrot.slane %v4409_v56, 5  ;;  %v4415_v43 = vrot.slane %v4413_v10, 4  ;;  %7054 = vmatprep.subr.bf16.mxu0 %v7483_v34  ;;  %v6097_v5 = vcombine.low %v4388_v7, %v4398_v1  ;;  %v4421_v58 = vrot.slane %v4419_v18, 5 }
 0x121   : > { %6800 = vmatprep.mubr.bf16.mxu1 %v8697_v11  ;;  %v7484_v11 = vld [vmem:[%s9043_s3 + $0x230] sm:$0xff]   ;;  %v4406_v9 = vor.u32 %v4405_v46, %v4402_v57  ;;  %v5883_v24 = vrot.slane %v2356_v21, 9  ;;  %v2431_v52 = vrot.slane %v7499_v51, 5  ;;  %v2434_v6 = vrot.slane %v7500_v44, 5  ;;  %v8764_v46 = vld [vmem:[#allocation2 + $0x98] sm:$0x1] }
 0x122   : > { %v4416_v62 = vor.u32 %v4415_v43, %v4411_v26  ;;  %v4424_v4 = vshrl.u32 %v4186_v35, 16  ;;  %v4427_v49 = vshll.u32 %v4186_v35, 16  ;;  %v4433_v55 = vshll.u32 %v8741_v14, 16 }
 0x123   : > { %v4407_v15 = vrot.slane %v4406_v9, 4  ;;  %v4437_v30 = vshrl.u32 %v8741_v14, 16  ;;  %7055 = vmatpush3.bf16.msra.mxu0 %v7483_v34  ;;  %v2432_v13 = vsel %vm7908_vm10, %v5883_v24, %v2431_v52  ;;  %v2433_v12 = vrot.slane %v2431_v52, 4 }
 0x124   : > { %v4417_v19 = vrot.slane %v4416_v62, 4  ;;  %v4426_v20 = vrot.slane %v4424_v4, 4  ;;  %7056 = vmatprep.subr.bf16.mxu0 %v7484_v11  ;;  %v4429_v28 = vrot.slane %v4427_v49, 5  ;;  %v4435_v50 = vrot.slane %v4433_v55, 5  ;;  %v7503_v49 = vld [vmem:[#allocation2 + $0x28] sm:$0xf] }
 0x125   : > { %v4412_v48 = vsel %vm8389_vm13, %v4407_v15, %v4411_v26  ;;  %v4439_v32 = vrot.slane %v4437_v30, 4  ;;  %v2435_v45 = vsel %vm7908_vm10, %v2433_v12, %v2434_v6  ;;  %v4443_v29 = vshll.u32 %v8746_v41, 16  ;;  %v8777_v30 = vld [vmem:[#allocation2 + $0xa0] sm:$0xf] }
 0x126   : > { %7025 = vmatmul.mubr.bf16.gmra.mrb[12].mxu0 %v6097_v5  ;;  %v4422_v34 = vsel %vm8389_vm13, %v4417_v19, %v4421_v58  ;;  %v5884_v36 = vrot.slane %v2357_v63, 9  ;;  %v5915_v3 = vcombine.low %v2432_v13, %v2435_v45  ;;  %v4430_v38 = vor.u32 %v4429_v28, %v4426_v20  ;;  %v2358_v5 = vld [vmem:[#allocation2 + $0x24] sm:$0xe]  ;;  %v4192_v63 = vld [vmem:[#allocation2 + $0x9c] sm:$0xf] }
 0x127   : > { %v6098_v33 = vcombine.low %v4412_v48, %v4422_v34  ;;  %v4440_v60 = vor.u32 %v4439_v32, %v4435_v50  ;;  %v4445_v7 = vrot.slane %v4443_v29, 5  ;;  %v2438_v56 = vrot.slane %v7501_v61, 5  ;;  %7057 = vmatpush3.bf16.msra.mxu0 %v7484_v11  ;;  %v8779_v19 = vld [vmem:[#allocation2 + $0xa4] sm:$0x1]  ;;  %v7504_v20 = vld [vmem:[#allocation2 + $0x2c] sm:$0x1] }
 0x128   : > { %6801 = vmatmul.mubr.bf16.gmra.mrb[28].mxu1 %v5873_v0  ;;  %v7502_v0 = vld [vmem:[#allocation2 + $0x20] sm:$0x1]  ;;  %v4448_v21 = vshrl.u32 %v4189_v54, 16  ;;  %v4431_v53 = vrot.slane %v4430_v38, 4  ;;  %v4451_v18 = vshll.u32 %v4189_v54, 16  ;;  %v4457_v35 = vshll.u32 %v8762_v2, 16  ;;  %7058 = vmatprep.subr.bf16.mxu0 %v7485_v47 }
 0x129   : > { %6820 = vmatprep.mubr.bf16.mxu1 %v5914_v16  ;;  %v2441_v10 = vrot.slane %v7502_v0, 5  ;;  %7028 = vmatprep.mubr.bf16.mxu0 %v6098_v33  ;;  %v4441_v57 = vrot.slane %v4440_v60, 4  ;;  %v2439_v1 = vsel %vm7908_vm10, %v5884_v36, %v2438_v56  ;;  %v2440_v16 = vrot.slane %v2438_v56, 4  ;;  %v7505_v29 = vld [vmem:[%s9043_s3 + $0xc8] sm:$0xff]  }
 0x12a   : > { %v4450_v26 = vrot.slane %v4448_v21, 4  ;;  %v4461_v43 = vshrl.u32 %v8762_v2, 16  ;;  %v4436_v11 = vsel %vm8389_vm13, %v4431_v53, %v4435_v50  ;;  %v4453_v58 = vrot.slane %v4451_v18, 5  ;;  %v2359_v50 = vld [vmem:[#allocation2 + $0x30] sm:$0xe] }
 0x12b   : > { %v4446_v9 = vsel %vm8389_vm13, %v4441_v57, %v4445_v7  ;;  %v4459_v24 = vrot.slane %v4457_v35, 5  ;;  %v2442_v51 = vsel %vm7908_vm10, %v2440_v16, %v2441_v10  ;;  %v4467_v44 = vshll.u32 %v8764_v46, 16  ;;  %7059 = vmatpush3.bf16.msra.mxu0 %v7485_v47  ;;  %v4195_v38 = vld [vmem:[#allocation2 + $0xa8] sm:$0xf]  ;;  %v8796_v53 = vld [vmem:[#allocation2 + $0xac] sm:$0xf] }
 0x12c   : > { %v6099_v62 = vcombine.low %v4436_v11, %v4446_v9  ;;  %v4463_v52 = vrot.slane %v4461_v43, 4  ;;  %v5916_v6 = vcombine.low %v2439_v1, %v2442_v51  ;;  %v4454_v4 = vor.u32 %v4453_v58, %v4450_v26  ;;  %v8798_v16 = vld [vmem:[#allocation2 + $0xb0] sm:$0x1]  ;;  %v2360_v26 = vld [vmem:[#allocation2 + $0x3c] sm:$0xe] }
 0x12d   : > { %v5885_v15 = vrot.slane %v2358_v5, 9  ;;  %v2445_v55 = vrot.slane %v7503_v49, 5  ;;  %v4469_v12 = vrot.slane %v4467_v44, 5  ;;  %v2448_v48 = vrot.slane %v7504_v20, 5  ;;  %v7506_v5 = vld [vmem:[#allocation2 + $0x34] sm:$0xf] }
 0x12e   : > { %7029 = vmatmul.mubr.bf16.gmra.mrb[16].mxu0 %v6099_v62  ;;  %v4464_v13 = vor.u32 %v4463_v52, %v4459_v24  ;;  %v4472_v28 = vshrl.u32 %v4192_v63, 16  ;;  %v4455_v32 = vrot.slane %v4454_v4, 4  ;;  %v4475_v34 = vshll.u32 %v4192_v63, 16  ;;  %v7507_v9 = vld [vmem:[#allocation2 + $0x38] sm:$0x1]  ;;  %v7508_v63 = vld [vmem:[%s9043_s3 + $0xd0] sm:$0xff]  }
 0x12f   : > { %v2446_v54 = vsel %vm7908_vm10, %v5885_v15, %v2445_v55  ;;  %v2447_v47 = vrot.slane %v2445_v55, 4  ;;  %v4481_v33 = vshll.u32 %v8777_v30, 16  ;;  %v4491_v61 = vshll.u32 %v8779_v19, 16  ;;  %v4198_v55 = vld [vmem:[#allocation2 + $0xb4] sm:$0xf] }
 0x130   : > { %6821 = vmatmul.mubr.bf16.vlgmr.msra.gmra.mrb[0].mxu1 %v5915_v3  ;;  %v4465_v45 = vrot.slane %v4464_v13, 4  ;;  %v4474_v36 = vrot.slane %v4472_v28, 4  ;;  %v4485_v3 = vshrl.u32 %v8777_v30, 16  ;;  %v4477_v7 = vrot.slane %v4475_v34, 5  ;;  %v7509_v34 = vld [vmem:[%s9043_s3 + $0xd8] sm:$0xff]  }
 0x131   : > { %7100 = vmatpush3.bf16.msra.mxu1 %v8659_v37  ;;  %6824 = vmatprep.mubr.bf16.mxu1 %v5916_v6  ;;  %v4460_v37 = vsel %vm8389_vm13, %v4455_v32, %v4459_v24  ;;  %v2449_v60 = vsel %vm7908_vm10, %v2447_v47, %v2448_v48  ;;  %v4483_v10 = vrot.slane %v4481_v33, 5  ;;  %v4493_v35 = vrot.slane %v4491_v61, 5  ;;  %v8814_v47 = vld [vmem:[#allocation2 + $0xb8] sm:$0xf] }
 0x132   : > { %7093 = vmatprep.subr.bf16.mxu1 %v7505_v29  ;;  %v4470_v56 = vsel %vm8389_vm13, %v4465_v45, %v4469_v12  ;;  %v5917_v0 = vcombine.low %v2446_v54, %v2449_v60  ;;  %v4487_v21 = vrot.slane %v4485_v3, 4  ;;  %v4478_v18 = vor.u32 %v4477_v7, %v4474_v36  ;;  %v8819_v3 = vld [vmem:[#allocation2 + $0xbc] sm:$0x1]  ;;  %v7511_v7 = vld [vmem:[#allocation2 + $0x44] sm:$0x1] }
 0x133   : > { %v6100_v57 = vcombine.low %v4460_v37, %v4470_v56  ;;  %v5886_v1 = vrot.slane %v2359_v50, 9  ;;  %v2452_v11 = vrot.slane %v7506_v5, 5  ;;  %v2455_v58 = vrot.slane %v7507_v9, 5  ;;  %v7510_v37 = vld [vmem:[#allocation2 + $0x40] sm:$0xf] }
 0x134   : > { %v4488_v43 = vor.u32 %v4487_v21, %v4483_v10  ;;  %v4496_v24 = vshrl.u32 %v4195_v38, 16  ;;  %v4479_v62 = vrot.slane %v4478_v18, 4  ;;  %v4499_v51 = vshll.u32 %v4195_v38, 16  ;;  %v4201_v5 = vld [vmem:[#allocation2 + $0xc0] sm:$0xf] }
 0x135   : > { %7101 = vmatpush3.bf16.msra.mxu1 %v7505_v29  ;;  %7032 = vmatprep.mubr.bf16.mxu0 %v6100_v57  ;;  %v4505_v52 = vshll.u32 %v8796_v53, 16  ;;  %v4509_v44 = vshrl.u32 %v8796_v53, 16  ;;  %v2453_v4 = vsel %vm7908_vm10, %v5886_v1, %v2452_v11  ;;  %v2454_v15 = vrot.slane %v2452_v11, 4 }
 0x136   : > { %7094 = vmatprep.subr.bf16.mxu1 %v7508_v63  ;;  %v4489_v6 = vrot.slane %v4488_v43, 4  ;;  %v4498_v49 = vrot.slane %v4496_v24, 4  ;;  %v4484_v13 = vsel %vm8389_vm13, %v4479_v62, %v4483_v10  ;;  %v4501_v12 = vrot.slane %v4499_v51, 5 }
 0x137   : > { %v4507_v20 = vrot.slane %v4505_v52, 5  ;;  %v4511_v48 = vrot.slane %v4509_v44, 4  ;;  %v2456_v50 = vsel %vm7908_vm10, %v2454_v15, %v2455_v58  ;;  %v4515_v32 = vshll.u32 %v8798_v16, 16 }
 0x138   : > { %6825 = vmatmul.mubr.bf16.gmra.mrb[4].mxu1 %v5917_v0  ;;  %v4494_v28 = vsel %vm8389_vm13, %v4489_v6, %v4493_v35  ;;  %v5887_v54 = vrot.slane %v2360_v26, 9  ;;  %v5918_v29 = vcombine.low %v2453_v4, %v2456_v50  ;;  %v4502_v36 = vor.u32 %v4501_v12, %v4498_v49  ;;  %v2361_v0 = vld [vmem:[#allocation2 + $0x48] sm:$0xe]  ;;  %v7513_v49 = vld [vmem:[#allocation2 + $0x4c] sm:$0xf] }
 0x139   : > { %7102 = vmatpush3.bf16.msra.mxu1 %v7508_v63  ;;  %v6101_v45 = vcombine.low %v4484_v13, %v4494_v28  ;;  %v4512_v33 = vor.u32 %v4511_v48, %v4507_v20  ;;  %v4517_v38 = vrot.slane %v4515_v32, 5  ;;  %v2459_v60 = vrot.slane %v7510_v37, 5  ;;  %v7512_v63 = vld [vmem:[%s9043_s3 + $0xe0] sm:$0xff]   ;;  %v7514_v48 = vld [vmem:[#allocation2 + $0x50] sm:$0x1] }
 0x13a   : > { %7095 = vmatprep.subr.bf16.mxu1 %v7509_v34  ;;  %v2462_v61 = vrot.slane %v7511_v7, 5  ;;  %v4520_v56 = vshrl.u32 %v4198_v55, 16  ;;  %6828 = vmatprep.mubr.bf16.mxu1 %v5918_v29  ;;  %v4503_v10 = vrot.slane %v4502_v36, 4  ;;  %v4523_v57 = vshll.u32 %v4198_v55, 16  ;;  %v8835_v13 = vld [vmem:[#allocation2 + $0xc4] sm:$0xf] }
 0x13b   : > { %7033 = vmatmul.mubr.bf16.gmra.mrb[20].mxu0 %v6101_v45  ;;  %v4513_v21 = vrot.slane %v4512_v33, 4  ;;  %v4529_v18 = vshll.u32 %v8814_v47, 16  ;;  %v2460_v35 = vsel %vm7908_vm10, %v5887_v54, %v2459_v60  ;;  %v2461_v1 = vrot.slane %v2459_v60, 4  ;;  %v8837_v50 = vld [vmem:[#allocation2 + $0xc8] sm:$0x1] }
 0x13c   : > { %v4522_v26 = vrot.slane %v4520_v56, 4  ;;  %v4533_v43 = vshrl.u32 %v8814_v47, 16  ;;  %v4508_v11 = vsel %vm8389_vm13, %v4503_v10, %v4507_v20  ;;  %v4525_v58 = vrot.slane %v4523_v57, 5  ;;  %v7515_v36 = vld [vmem:[%s9043_s3 + $0xe8] sm:$0xff]   ;;  %v2362_v7 = vld [vmem:[#allocation2 + $0x54] sm:$0xe] }
 0x13d   : > { %7103 = vmatpush3.bf16.msra.mxu1 %v7509_v34  ;;  %v4518_v9 = vsel %vm8389_vm13, %v4513_v21, %v4517_v38  ;;  %v4531_v24 = vrot.slane %v4529_v18, 5  ;;  %v2463_v51 = vsel %vm7908_vm10, %v2461_v1, %v2462_v61  ;;  %v4539_v44 = vshll.u32 %v8819_v3, 16  ;;  %v4204_v21 = vld [vmem:[#allocation2 + $0xcc] sm:$0xf] }
 0x13e   : > { %7096 = vmatprep.subr.bf16.mxu1 %v7512_v63  ;;  %v6102_v62 = vcombine.low %v4508_v11, %v4518_v9  ;;  %v4535_v52 = vrot.slane %v4533_v43, 4  ;;  %v5919_v6 = vcombine.low %v2460_v35, %v2463_v51  ;;  %v4526_v4 = vor.u32 %v4525_v58, %v4522_v26  ;;  %v8853_v26 = vld [vmem:[#allocation2 + $0xd0] sm:$0xf]  ;;  %v7518_v51 = vld [vmem:[#allocation2 + $0x5c] sm:$0x1] }
 0x13f   : > { %v5888_v15 = vrot.slane %v2361_v0, 9  ;;  %v2466_v55 = vrot.slane %v7513_v49, 5  ;;  %v4541_v20 = vrot.slane %v4539_v44, 5  ;;  %v2469_v28 = vrot.slane %v7514_v48, 5  ;;  %v7516_v58 = vld [vmem:[%s9043_s3 + $0xf0] sm:$0xff]  }
 0x140   : > { %7036 = vmatprep.mubr.bf16.mxu0 %v6102_v62  ;;  %v4536_v12 = vor.u32 %v4535_v52, %v4531_v24  ;;  %v4544_v32 = vshrl.u32 %v4201_v5, 16  ;;  %6829 = vmatmul.mubr.bf16.gmra.mrb[8].mxu1 %v5919_v6  ;;  %v4527_v54 = vrot.slane %v4526_v4, 4  ;;  %v4547_v29 = vshll.u32 %v4201_v5, 16  ;;  %v8858_v44 = vld [vmem:[#allocation2 + $0xd4] sm:$0x1] }
 0x141   : > { %7104 = vmatpush3.bf16.msra.mxu1 %v7512_v63  ;;  %v2467_v34 = vsel %vm7908_vm10, %v5888_v15, %v2466_v55  ;;  %v2468_v45 = vrot.slane %v2466_v55, 4  ;;  %v4553_v37 = vshll.u32 %v8835_v13, 16  ;;  %v4557_v60 = vshrl.u32 %v8835_v13, 16  ;;  %v7517_v63 = vld [vmem:[#allocation2 + $0x58] sm:$0xf] }
 0x142   : > { %7097 = vmatprep.subr.bf16.mxu1 %v7515_v36  ;;  %v4537_v33 = vrot.slane %v4536_v12, 4  ;;  %v4546_v38 = vrot.slane %v4544_v32, 4  ;;  %v4532_v61 = vsel %vm8389_vm13, %v4527_v54, %v4531_v24  ;;  %v4549_v0 = vrot.slane %v4547_v29, 5  ;;  %v2363_v12 = vld [vmem:[#allocation2 + $0x60] sm:$0xe] }
 0x143   : > { %v2470_v56 = vsel %vm7908_vm10, %v2468_v45, %v2469_v28  ;;  %v4563_v10 = vshll.u32 %v8837_v50, 16  ;;  %v4555_v35 = vrot.slane %v4553_v37, 5  ;;  %v4559_v1 = vrot.slane %v4557_v60, 4 }
 0x144   : > { %v4542_v57 = vsel %vm8389_vm13, %v4537_v33, %v4541_v20  ;;  %v5920_v18 = vcombine.low %v2467_v34, %v2470_v56  ;;  %v4550_v5 = vor.u32 %v4549_v0, %v4546_v38  ;;  %v5889_v9 = vrot.slane %v2362_v7, 9  ;;  %v7519_v33 = vld [vmem:[%s9043_s3 + $0xf8] sm:$0xff]  }
 0x145   : > { %7105 = vmatpush3.bf16.msra.mxu1 %v7515_v36  ;;  %v6103_v43 = vcombine.low %v4532_v61, %v4542_v57  ;;  %v4565_v11 = vrot.slane %v4563_v10, 5  ;;  %v4560_v24 = vor.u32 %v4559_v1, %v4555_v35  ;;  %v2473_v62 = vrot.slane %v7517_v63, 5  ;;  %v4913_v36 = vld [vmem:[#allocation2 + $0x18] sm:$0xe]  ;;  %v7521_v1 = vld [vmem:[#allocation2 + $0x68] sm:$0x1] }
 0x146   : > { %7098 = vmatprep.subr.bf16.mxu1 %v7516_v58  ;;  %6832 = vmatprep.mubr.bf16.mxu1 %v5920_v18  ;;  %v2476_v52 = vrot.slane %v7518_v51, 5  ;;  %v4568_v6 = vshrl.u32 %v4204_v21, 16  ;;  %v4551_v4 = vrot.slane %v4550_v5, 4  ;;  %v4571_v15 = vshll.u32 %v4204_v21, 16  ;;  %v2364_v21 = vld [vmem:[#allocation2 + $0x6c] sm:$0xe] }
 0x147   : > { %7037 = vmatmul.mubr.bf16.gmra.mrb[24].mxu0 %v6103_v43  ;;  %v4577_v49 = vshll.u32 %v8853_v26, 16  ;;  %v4581_v55 = vshrl.u32 %v8853_v26, 16  ;;  %v4561_v20 = vrot.slane %v4560_v24, 4  ;;  %v2474_v48 = vsel %vm7908_vm10, %v5889_v9, %v2473_v62  ;;  %v7520_v18 = vld [vmem:[#allocation2 + $0x64] sm:$0xf] }
 0x148   : > { %v2475_v28 = vrot.slane %v2473_v62, 4  ;;  %v4570_v32 = vrot.slane %v4568_v6, 4  ;;  %v4556_v54 = vsel %vm8389_vm13, %v4551_v4, %v4555_v35  ;;  %v4573_v34 = vrot.slane %v4571_v15, 5  ;;  %v7523_v63 = vld [vmem:[#allocation2 + $0x20] sm:$0x1] }
 0x149   : > { %7106 = vmatpush3.bf16.msra.mxu1 %v7516_v58  ;;  %v4579_v45 = vrot.slane %v4577_v49, 5  ;;  %v4583_v29 = vrot.slane %v4581_v55, 4  ;;  %v4566_v38 = vsel %vm8389_vm13, %v4561_v20, %v4565_v11  ;;  %v4587_v60 = vshll.u32 %v8858_v44, 16  ;;  %v7522_v58 = vld [vmem:[#allocation2 + $0x1c] sm:$0xf] }
 0x14a   : > { %7099 = vmatprep.subr.bf16.mxu1 %v7519_v33  ;;  %v2477_v37 = vsel %vm7908_vm10, %v2475_v28, %v2476_v52  ;;  %v5890_v7 = vrot.slane %v2363_v12, 9  ;;  %v6104_v61 = vcombine.low %v4556_v54, %v4566_v38  ;;  %v4574_v0 = vor.u32 %v4573_v34, %v4570_v32  ;;  %v7524_v4 = vld [vmem:[#allocation2 + $0x70] sm:$0xf]  ;;  %v4914_v49 = vld [vmem:[#allocation2 + $0x24] sm:$0xe] }
 0x14b   : > { %v5921_v56 = vcombine.low %v2474_v48, %v2477_v37  ;;  %v4584_v10 = vor.u32 %v4583_v29, %v4579_v45  ;;  %v4589_v57 = vrot.slane %v4587_v60, 5  ;;  %v2480_v35 = vrot.slane %v7520_v18, 5  ;;  %v2365_v28 = vld [vmem:[#allocation2 + $0x78] sm:$0xe]  ;;  %v7528_v18 = vld [vmem:[#allocation2 + $0x7c] sm:$0xf] }
 0x14c   : > { %v2483_v43 = vrot.slane %v7521_v1, 5  ;;  %v6114_v5 = vrot.slane %v4913_v36, 9  ;;  %7040 = vmatprep.mubr.bf16.mxu0 %v6104_v61  ;;  %v4575_v11 = vrot.slane %v4574_v0, 4  ;;  %v4979_v24 = vrot.slane %v7522_v58, 5  ;;  %v4915_v36 = vld [vmem:[#allocation2 + $0x30] sm:$0xe] }
 0x14d   : > { %7107 = vmatpush3.bf16.msra.mxu1 %v7519_v33  ;;  %v4585_v9 = vrot.slane %v4584_v10, 4  ;;  %v4982_v62 = vrot.slane %v7523_v63, 5  ;;  %v2481_v51 = vsel %vm7908_vm10, %v5890_v7, %v2480_v35  ;;  %v2482_v52 = vrot.slane %v2480_v35, 4  ;;  %v7526_v7 = vld [vmem:[#allocation2 + $0x28] sm:$0xf] }
 0x14e   : > { %6833 = vmatmul.mubr.bf16.gmra.mrb[12].mxu1 %v5921_v56  ;;  %v5891_v6 = vrot.slane %v2364_v21, 9  ;;  %v2487_v15 = vrot.slane %v7524_v4, 5  ;;  %v4580_v55 = vsel %vm8389_vm13, %v4575_v11, %v4579_v45  ;;  %v4980_v20 = vsel %vm7908_vm10, %v6114_v5, %v4979_v24  ;;  %v7527_v56 = vld [vmem:[#allocation2 + $0x2c] sm:$0x1]  ;;  %v2366_v21 = vld [vmem:[#allocation2 + $0x84] sm:$0xe] }
 0x14f   : > { %v4590_v12 = vsel %vm8389_vm13, %v4585_v9, %v4589_v57  ;;  %v4981_v48 = vrot.slane %v4979_v24, 4  ;;  %v2484_v54 = vsel %vm7908_vm10, %v2482_v52, %v2483_v43  ;;  %v2490_v38 = vrot.slane %v7525_v17, 5  ;;  %v7529_v1 = vld [vmem:[#allocation2 + $0x80] sm:$0x1]  ;;  %v7530_v24 = vld [vmem:[#allocation2 + $0x34] sm:$0xf] }
 0x150   : > { %v6105_v32 = vcombine.low %v4580_v55, %v4590_v12  ;;  %v2488_v34 = vsel %vm7908_vm10, %v5891_v6, %v2487_v15  ;;  %v2489_v29 = vrot.slane %v2487_v15, 4  ;;  %v5922_v33 = vcombine.low %v2481_v51, %v2484_v54  ;;  %v7531_v6 = vld [vmem:[#allocation2 + $0x38] sm:$0x1] }
 0x151   : > { %v4983_v45 = vsel %vm7908_vm10, %v4981_v48, %v4982_v62  ;;  %v6115_v37 = vrot.slane %v4914_v49, 9  ;;  %v4986_v61 = vrot.slane %v7526_v7, 5  ;;  %v4989_v0 = vrot.slane %v7527_v56, 5  ;;  %v4916_v62 = vld [vmem:[#allocation2 + $0x3c] sm:$0xe] }
 0x152   : > { %7041 = vmatmul.mubr.bf16.gmra.mrb[28].mxu0 %v6105_v32  ;;  %v6146_v60 = vcombine.low %v4980_v20, %v4983_v45  ;;  %v5892_v10 = vrot.slane %v2365_v28, 9  ;;  %6836 = vmatprep.mubr.bf16.mxu1 %v5922_v33  ;;  %v2491_v57 = vsel %vm7908_vm10, %v2489_v29, %v2490_v38  ;;  %v2494_v35 = vrot.slane %v7528_v18, 5  ;;  %v7532_v20 = vld [vmem:[#allocation2 + $0x88] sm:$0xf]  ;;  %v2367_v28 = vld [vmem:[#allocation2 + $0x90] sm:$0xe] }
 0x153   : > { %v2497_v43 = vrot.slane %v7529_v1, 5  ;;  %v6116_v5 = vrot.slane %v4915_v36, 9  ;;  %v5923_v11 = vcombine.low %v2488_v34, %v2491_v57  ;;  %v4987_v9 = vsel %vm7908_vm10, %v6115_v37, %v4986_v61  ;;  %v7533_v34 = vld [vmem:[#allocation2 + $0x8c] sm:$0x1]  ;;  %v4917_v33 = vld [vmem:[#allocation2 + $0x48] sm:$0xe] }
 0x154   : > { %7060 = vmatprep.mubr.bf16.mxu0 %v6146_v60  ;;  %v4988_v58 = vrot.slane %v4986_v61, 4  ;;  %v4993_v63 = vrot.slane %v7530_v24, 5  ;;  %v2495_v51 = vsel %vm7908_vm10, %v5892_v10, %v2494_v35  ;;  %v2496_v52 = vrot.slane %v2494_v35, 4  ;;  %v7534_v7 = vld [vmem:[#allocation2 + $0x40] sm:$0xf] }
 0x155   : > { %v4996_v4 = vrot.slane %v7531_v6, 5  ;;  %v5893_v15 = vrot.slane %v2366_v21, 9  ;;  %v2501_v48 = vrot.slane %v7532_v20, 5  ;;  %v2504_v29 = vrot.slane %v7533_v34, 5  ;;  %v7535_v56 = vld [vmem:[#allocation2 + $0x44] sm:$0x1] }
 0x156   : > { %6837 = vmatmul.mubr.bf16.gmra.mrb[16].mxu1 %v5923_v11  ;;  %v4990_v49 = vsel %vm7908_vm10, %v4988_v58, %v4989_v0  ;;  %v4994_v55 = vsel %vm7908_vm10, %v6116_v5, %v4993_v63  ;;  %v4995_v12 = vrot.slane %v4993_v63, 4  ;;  %v2498_v54 = vsel %vm7908_vm10, %v2496_v52, %v2497_v43  ;;  %v2368_v21 = vld [vmem:[#allocation2 + $0x9c] sm:$0xe]  ;;  %v7536_v18 = vld [vmem:[#allocation2 + $0x94] sm:$0xf] }
 0x157   : > { %v6147_v32 = vcombine.low %v4987_v9, %v4990_v49  ;;  %v6117_v36 = vrot.slane %v4916_v62, 9  ;;  %v5924_v45 = vcombine.low %v2495_v51, %v2498_v54  ;;  %v2502_v38 = vsel %vm7908_vm10, %v5893_v15, %v2501_v48  ;;  %v7537_v1 = vld [vmem:[#allocation2 + $0x98] sm:$0x1]  ;;  %v7538_v24 = vld [vmem:[#allocation2 + $0x4c] sm:$0xf] }
 0x158   : > { %v4997_v17 = vsel %vm7908_vm10, %v4995_v12, %v4996_v4  ;;  %v2503_v37 = vrot.slane %v2501_v48, 4  ;;  %v5000_v61 = vrot.slane %v7534_v7, 5  ;;  %v5003_v0 = vrot.slane %v7535_v56, 5  ;;  %v4918_v62 = vld [vmem:[#allocation2 + $0x54] sm:$0xe] }
 0x159   : > { %v6148_v60 = vcombine.low %v4994_v55, %v4997_v17  ;;  %v5894_v10 = vrot.slane %v2367_v28, 9  ;;  %6840 = vmatprep.mubr.bf16.mxu1 %v5924_v45  ;;  %v2508_v35 = vrot.slane %v7536_v18, 5  ;;  %v2511_v43 = vrot.slane %v7537_v1, 5  ;;  %v7539_v6 = vld [vmem:[#allocation2 + $0x50] sm:$0x1] }
 0x15a   : > { %7061 = vmatmul.mubr.bf16.vlgmr.msra.gmra.mrb[0].mxu0 %v6147_v32  ;;  %v2505_v57 = vsel %vm7908_vm10, %v2503_v37, %v2504_v29  ;;  %v6118_v5 = vrot.slane %v4917_v33, 9  ;;  %v5001_v9 = vsel %vm7908_vm10, %v6117_v36, %v5000_v61  ;;  %v5002_v58 = vrot.slane %v5000_v61, 4  ;;  %v7540_v20 = vld [vmem:[#allocation2 + $0xa0] sm:$0xf]  ;;  %v2369_v28 = vld [vmem:[#allocation2 + $0xa8] sm:$0xe] }
 0x15b   : > { %7064 = vmatprep.mubr.bf16.mxu0 %v6148_v60  ;;  %v5925_v11 = vcombine.low %v2502_v38, %v2505_v57  ;;  %v5007_v63 = vrot.slane %v7538_v24, 5  ;;  %v2509_v51 = vsel %vm7908_vm10, %v5894_v10, %v2508_v35  ;;  %v2510_v52 = vrot.slane %v2508_v35, 4  ;;  %v7541_v34 = vld [vmem:[#allocation2 + $0xa4] sm:$0x1]  ;;  %v4919_v33 = vld [vmem:[#allocation2 + $0x60] sm:$0xe] }
 0x15c   : > { %v5010_v4 = vrot.slane %v7539_v6, 5  ;;  %v5895_v15 = vrot.slane %v2368_v21, 9  ;;  %v5004_v49 = vsel %vm7908_vm10, %v5002_v58, %v5003_v0  ;;  %v2515_v48 = vrot.slane %v7540_v20, 5  ;;  %v7542_v7 = vld [vmem:[#allocation2 + $0x58] sm:$0xf] }
 0x15d   : > { %v5008_v55 = vsel %vm7908_vm10, %v6118_v5, %v5007_v63  ;;  %v5009_v12 = vrot.slane %v5007_v63, 4  ;;  %v6149_v32 = vcombine.low %v5001_v9, %v5004_v49  ;;  %v2512_v54 = vsel %vm7908_vm10, %v2510_v52, %v2511_v43  ;;  %v7543_v56 = vld [vmem:[#allocation2 + $0x5c] sm:$0x1]  ;;  %v2370_v21 = vld [vmem:[#allocation2 + $0xb4] sm:$0xe] }
 0x15e   : > { %6841 = vmatmul.mubr.bf16.gmra.mrb[20].mxu1 %v5925_v11  ;;  %v2518_v29 = vrot.slane %v7541_v34, 5  ;;  %v6119_v36 = vrot.slane %v4918_v62, 9  ;;  %v5926_v45 = vcombine.low %v2509_v51, %v2512_v54  ;;  %v2516_v38 = vsel %vm7908_vm10, %v5895_v15, %v2515_v48  ;;  %v7544_v18 = vld [vmem:[#allocation2 + $0xac] sm:$0xf]  ;;  %v4921_v49 = vld [vmem:[#allocation2 + $0x78] sm:$0xe] }
 0x15f   : > { %v5011_v17 = vsel %vm7908_vm10, %v5009_v12, %v5010_v4  ;;  %v2517_v37 = vrot.slane %v2515_v48, 4  ;;  %v5014_v61 = vrot.slane %v7542_v7, 5  ;;  %v5017_v0 = vrot.slane %v7543_v56, 5  ;;  %v4920_v24 = vld [vmem:[#allocation2 + $0x6c] sm:$0xe] }
 0x160   : > { %v6150_v60 = vcombine.low %v5008_v55, %v5011_v17  ;;  %v5896_v10 = vrot.slane %v2369_v28, 9  ;;  %6844 = vmatprep.mubr.bf16.mxu1 %v5926_v45  ;;  %v2522_v35 = vrot.slane %v7544_v18, 5  ;;  %v2525_v1 = vrot.slane %v8645_v31, 5  ;;  %v4922_v54 = vld [vmem:[#allocation2 + $0x84] sm:$0xe] }
 0x161   : > { %v2519_v57 = vsel %vm7908_vm10, %v2517_v37, %v2518_v29  ;;  %v6120_v43 = vrot.slane %v4919_v33, 9  ;;  %v5015_v11 = vsel %vm7908_vm10, %v6119_v36, %v5014_v61  ;;  %v5016_v9 = vrot.slane %v5014_v61, 4  ;;  %v4923_v17 = vld [vmem:[#allocation2 + $0x90] sm:$0xe]  ;;  %v4924_v61 = vld [vmem:[#allocation2 + $0x9c] sm:$0xe] }
 0x162   : > { %7065 = vmatmul.mubr.bf16.gmra.mrb[4].mxu0 %v6149_v32  ;;  %v5927_v5 = vcombine.low %v2516_v38, %v2519_v57  ;;  %v5021_v58 = vrot.slane %v8652_v25, 5  ;;  %v2523_v63 = vsel %vm7908_vm10, %v5896_v10, %v2522_v35  ;;  %v2524_v62 = vrot.slane %v2522_v35, 4  ;;  %v4925_v57 = vld [vmem:[#allocation2 + $0xa8] sm:$0xe] }
 0x163   : > { %7068 = vmatprep.mubr.bf16.mxu0 %v6150_v60  ;;  %v5024_v51 = vrot.slane %v8668_v39, 5  ;;  %v5897_v52 = vrot.slane %v2370_v21, 9  ;;  %v5018_v31 = vsel %vm7908_vm10, %v5016_v9, %v5017_v0  ;;  %v2529_v15 = vrot.slane %v8679_v22, 5 }
 0x164   : > { %v5022_v6 = vsel %vm7908_vm10, %v6120_v43, %v5021_v58  ;;  %v5023_v4 = vrot.slane %v5021_v58, 4  ;;  %v6151_v25 = vcombine.low %v5015_v11, %v5018_v31  ;;  %v2526_v55 = vsel %vm7908_vm10, %v2524_v62, %v2525_v1  ;;  %v4926_v43 = vld [vmem:[#allocation2 + $0xb4] sm:$0xe]  ;;  %v4927_v62 = vld [vmem:[#allocation2 + $0xc0] sm:$0xe] }
 0x165   : > { %v2532_v12 = vrot.slane %v8686_v42, 5  ;;  %v6121_v20 = vrot.slane %v4920_v24, 9  ;;  %v5928_v39 = vcombine.low %v2523_v63, %v2526_v55  ;;  %v2530_v28 = vsel %vm7908_vm10, %v5897_v52, %v2529_v15 }
 0x166   : > { %6845 = vmatmul.mubr.bf16.gmra.mrb[24].mxu1 %v5927_v5  ;;  %v5025_v48 = vsel %vm7908_vm10, %v5023_v4, %v5024_v51  ;;  %v2531_v32 = vrot.slane %v2529_v15, 4  ;;  %v5028_v22 = vrot.slane %v8692_v8, 5  ;;  %v5031_v29 = vrot.slane %v8706_v40, 5  ;;  %v4928_v15 = vld [vmem:[#allocation2 + $0xcc] sm:$0xe] }
 0x167   : > { %v6152_v34 = vcombine.low %v5022_v6, %v5025_v48  ;;  %v6122_v36 = vrot.slane %v4921_v49, 9  ;;  %6848 = vmatprep.mubr.bf16.mxu1 %v5928_v39  ;;  %v5035_v33 = vrot.slane %v8723_v27, 5  ;;  %v5038_v45 = vrot.slane %v8725_v59, 5  ;;  %v7486_v59 = vld [vmem:[#allocation2 + $0x6c] sm:$0xff]  }
 0x168   : > { %v2533_v42 = vsel %vm7908_vm10, %v2531_v32, %v2532_v12  ;;  %v5030_v37 = vrot.slane %v5028_v22, 4  ;;  %v6123_v60 = vrot.slane %v4922_v54, 9  ;;  %v5042_v7 = vrot.slane %v8741_v14, 5 }
 0x169   : > { %v5929_v38 = vcombine.low %v2530_v28, %v2533_v42  ;;  %v5029_v8 = vsel %vm7908_vm10, %v6121_v20, %v5028_v22  ;;  %v5036_v40 = vsel %vm7908_vm10, %v6122_v36, %v5035_v33  ;;  %v5037_v56 = vrot.slane %v5035_v33, 4 }
 0x16a   : > { %7069 = vmatmul.mubr.bf16.gmra.mrb[8].mxu0 %v6151_v25  ;;  %v5045_v0 = vrot.slane %v8746_v41, 5  ;;  %v5032_v27 = vsel %vm7908_vm10, %v5030_v37, %v5031_v29  ;;  %v5044_v10 = vrot.slane %v5042_v7, 4  ;;  %v6124_v21 = vrot.slane %v4923_v17, 9 }
 0x16b   : > { %7072 = vmatprep.mubr.bf16.mxu0 %v6152_v34  ;;  %v5049_v14 = vrot.slane %v8762_v2, 5  ;;  %v5039_v18 = vsel %vm7908_vm10, %v5037_v56, %v5038_v45  ;;  %v5052_v35 = vrot.slane %v8764_v46, 5  ;;  %v6125_v1 = vrot.slane %v4924_v61, 9  ;;  %v7489_v61 = vld [vmem:[#allocation2 + $0x90] sm:$0xff]   ;;  %v7493_v56 = vld [vmem:[#allocation2 + $0xc0] sm:$0xff]  }
 0x16c   : > { %v6153_v5 = vcombine.low %v5029_v8, %v5032_v27  ;;  %v6154_v11 = vcombine.low %v5036_v40, %v5039_v18  ;;  %v5043_v41 = vsel %vm7908_vm10, %v6123_v60, %v5042_v7  ;;  %v5046_v58 = vsel %vm7908_vm10, %v5044_v10, %v5045_v0  ;;  %v7491_v8 = vld [vmem:[#allocation2 + $0xa8] sm:$0xff]   ;;  %v7492_v40 = vld [vmem:[#allocation2 + $0xb4] sm:$0xff]  }
 0x16d   : > { %v5051_v9 = vrot.slane %v5049_v14, 4  ;;  %v5056_v2 = vrot.slane %v8777_v30, 5  ;;  %v5059_v24 = vrot.slane %v8779_v19, 5  ;;  %v6126_v63 = vrot.slane %v4925_v57, 9 }
 0x16e   : > { %6849 = vmatmul.mubr.bf16.gmra.mrb[28].mxu1 %v5929_v38  ;;  %v5050_v46 = vsel %vm7908_vm10, %v6124_v21, %v5049_v14  ;;  %v5063_v51 = vrot.slane %v8796_v53, 5  ;;  %v5066_v52 = vrot.slane %v8798_v16, 5  ;;  %v6127_v31 = vrot.slane %v4926_v43, 9  ;;  %v7487_v16 = vld [vmem:[#allocation2 + $0x78] sm:$0xff]  }
 0x16f   : > { %6884 = vmatprep.mubr.bf16.mxu1 %v7486_v59  ;;  %v5053_v6 = vsel %vm7908_vm10, %v5051_v9, %v5052_v35  ;;  %v5057_v4 = vsel %vm7908_vm10, %v6125_v1, %v5056_v2  ;;  %v5058_v30 = vrot.slane %v5056_v2, 4  ;;  %v5070_v19 = vrot.slane %v8814_v47, 5  ;;  %v7488_v47 = vld [vmem:[#allocation2 + $0x84] sm:$0xff]  }
 0x170   : > { %v5064_v49 = vsel %vm7908_vm10, %v6126_v63, %v5063_v51  ;;  %v5065_v25 = vrot.slane %v5063_v51, 4  ;;  %v5073_v55 = vrot.slane %v8819_v3, 5  ;;  %v6128_v53 = vrot.slane %v4927_v62, 9 }
 0x171   : > { %v5060_v12 = vsel %vm7908_vm10, %v5058_v30, %v5059_v24  ;;  %v5071_v20 = vsel %vm7908_vm10, %v6127_v31, %v5070_v19  ;;  %v5072_v39 = vrot.slane %v5070_v19, 4  ;;  %v5077_v48 = vrot.slane %v8835_v13, 5 }
 0x172   : > { %7073 = vmatmul.mubr.bf16.gmra.mrb[12].mxu0 %v6153_v5  ;;  %v6157_v28 = vcombine.low %v5057_v4, %v5060_v12  ;;  %v5067_v32 = vsel %vm7908_vm10, %v5065_v25, %v5066_v52  ;;  %v5080_v3 = vrot.slane %v8837_v50, 5  ;;  %v6129_v54 = vrot.slane %v4928_v15, 9 }
 0x173   : > { %7076 = vmatprep.mubr.bf16.mxu0 %v6154_v11  ;;  %v6158_v34 = vcombine.low %v5064_v49, %v5067_v32  ;;  %v5074_v22 = vsel %vm7908_vm10, %v5072_v39, %v5073_v55  ;;  %v5078_v29 = vsel %vm7908_vm10, %v6128_v53, %v5077_v48  ;;  %v5079_v36 = vrot.slane %v5077_v48, 4 }
 0x174   : > { %v6159_v42 = vcombine.low %v5071_v20, %v5074_v22  ;;  %v5084_v13 = vrot.slane %v8853_v26, 5  ;;  %v5087_v33 = vrot.slane %v8858_v44, 5  ;;  %v6155_v45 = vcombine.low %v5043_v41, %v5046_v58  ;;  %v7490_v44 = vld [vmem:[#allocation2 + $0x9c] sm:$0xff]  }
 0x175   : > { %v5081_v17 = vsel %vm7908_vm10, %v5079_v36, %v5080_v3  ;;  %v6156_v50 = vcombine.low %v5050_v46, %v5053_v6 }
 0x176   : > { %6885 = vmatmul.mubr.bf16.vlgmr.msra.gmra.mrb[16].mxu1 %v7487_v16  ;;  %v6160_v38 = vcombine.low %v5078_v29, %v5081_v17  ;;  %v5085_v37 = vsel %vm7908_vm10, %v6129_v54, %v5084_v13  ;;  %v5086_v60 = vrot.slane %v5084_v13, 4 }
 0x177   : > { %6888 = vmatprep.mubr.bf16.mxu1 %v7488_v47 }
 0x178   : > { %v5088_v7 = vsel %vm7908_vm10, %v5086_v60, %v5087_v33 }
 0x179   : > { %v6161_v26 = vcombine.low %v5085_v37, %v5088_v7 }
 0x17a   : > { %7077 = vmatmul.mubr.bf16.gmra.mrb[16].mxu0 %v6155_v45 }
 0x17b   : > { %7080 = vmatprep.mubr.bf16.mxu0 %v6156_v50 }
 0x17e   : > { %6889 = vmatmul.mubr.bf16.gmra.mrb[20].mxu1 %v7489_v61 }
 0x17f   : > { %6892 = vmatprep.mubr.bf16.mxu1 %v7490_v44 }
 0x182   : > { %7081 = vmatmul.mubr.bf16.gmra.mrb[20].mxu0 %v6157_v28 }
 0x183   : > { %7084 = vmatprep.mubr.bf16.mxu0 %v6158_v34 }
 0x186   : > { %6893 = vmatmul.mubr.bf16.gmra.mrb[24].mxu1 %v7491_v8 }
 0x187   : > { %6896 = vmatprep.mubr.bf16.mxu1 %v7492_v40 }
 0x18a   : > { %7085 = vmatmul.mubr.bf16.gmra.mrb[24].mxu0 %v6159_v42 }
 0x18b   : > { %7088 = vmatprep.mubr.bf16.mxu0 %v6160_v38 }
 0x18e   : > { %6897 = vmatmul.mubr.bf16.gmra.mrb[28].mxu1 %v7493_v56 }
 0x192   : > { %7089 = vmatmul.mubr.bf16.gmra.mrb[28].mxu0 %v6161_v26 }
 0x203   : > { %v6822_v23 = vpop.f32.mrb[0].mxu1 }
 0x204   : > { %v2697_v0 = vpop.f32.mrb[1].mxu1 }
 0x205   : > { %v6823_v27 = vpop.f32.mrb[2].mxu1 }
 0x206   : > { %v2700_v59 = vpop.f32.mrb[3].mxu1 }
 0x20b   : > { %v6826_v10 = vpop.f32.mrb[4].mxu1 }
 0x20c   : > { %v2713_v21 = vpop.f32.mrb[5].mxu1 }
 0x20d   : > { %v6827_v14 = vpop.f32.mrb[6].mxu1 }
 0x20e   : > { %v2716_v57 = vpop.f32.mrb[7].mxu1 }
 0x213   : > { %v6830_v18 = vpop.f32.mrb[8].mxu1 }
 0x214   : > { %v2729_v35 = vpop.f32.mrb[9].mxu1 }
 0x215   : > { %v6831_v1 = vpop.f32.mrb[10].mxu1 }
 0x216   : > { %v2732_v43 = vpop.f32.mrb[11].mxu1 }
 0x221   : > { %v8997_v5 = vpop.f32.mrb[12].mxu1 }
 0x222   : > { %v8999_v11 = vpop.f32.mrb[13].mxu1 }
 0x223   : > { %v9001_v41 = vpop.f32.mrb[14].mxu1 }
 0x224   : > { %v9003_v9 = vpop.f32.mrb[15].mxu1 }
 0x22d   : > { %v7062_v58 = vpop.f32.mrb[0].mxu0 }
 0x22e   : > { %v7108_v2 = vadd.f32 %v7062_v58, %v6822_v23  ;;  %v5252_v24 = vpop.f32.mrb[1].mxu0 }
 0x22f   : > { %v7109_v63 = vadd.f32 %v5252_v24, %v2697_v0  ;;  %v7063_v62 = vpop.f32.mrb[2].mxu0 }
 0x230   : > { %v7110_v46 = vadd.f32 %v7063_v62, %v6823_v27  ;;  %v5255_v51 = vpop.f32.mrb[3].mxu0  ;;  %v5614_v15 = vmul.f32 %v7108_v2, %v7108_v2 }
 0x231   : > { %v7111_v52 = vadd.f32 %v5255_v51, %v2700_v59  ;;  %v5612_v6 = vmul.f32 %v7109_v63, %v7109_v63 }
 0x232   : > { %v6342_v31 = vpack.c.bf16 %v7110_v46, %v7108_v2  ;;  %v5615_v12 = vmul.f32 %v7110_v46, %v7110_v46 }
 0x233   : > { %v6337_v4 = vpack.c.bf16 %v7111_v52, %v7109_v63  ;;  %v5572_v30 = vadd.f32 %v7111_v52, %v7109_v63  ;;  %v5613_v19 = vmul.f32 %v7111_v52, %v7111_v52 }
 0x234   : > { %6429 = vst [vmem:[%s7606_s30 + $0x8] sm:$0xff] %v6342_v31  }
 0x235   : > { %6338 = vst [vmem:[%s7606_s30] sm:$0xff] %v6337_v4   ;;  %v5573_v49 = vadd.f32 %v7108_v2, %v5572_v30  ;;  %v5644_v25 = vadd.f32 %v5613_v19, %v5612_v6  ;;  %v7066_v55 = vpop.f32.mrb[4].mxu0 }
 0x236   : > { %v7112_v53 = vadd.f32 %v7066_v55, %v6826_v10  ;;  %v5268_v16 = vpop.f32.mrb[5].mxu0 }
 0x237   : > { %v5645_v20 = vadd.f32 %v5644_v25, %v5614_v15  ;;  %v7113_v39 = vadd.f32 %v5268_v16, %v2713_v21  ;;  %v5574_v48 = vadd.f32 %v7110_v46, %v5573_v49  ;;  %v7067_v47 = vpop.f32.mrb[6].mxu0 }
 0x238   : > { %v7114_v28 = vadd.f32 %v7067_v47, %v6827_v14  ;;  %v5271_v32 = vpop.f32.mrb[7].mxu0  ;;  %v5618_v45 = vmul.f32 %v7112_v53, %v7112_v53 }
 0x239   : > { %v5575_v3 = vadd.f32 %v7113_v39, %v5574_v48  ;;  %v5616_v54 = vmul.f32 %v7113_v39, %v7113_v39  ;;  %v5646_v34 = vadd.f32 %v5645_v20, %v5615_v12  ;;  %v7115_v22 = vadd.f32 %v5271_v32, %v2716_v57 }
 0x23a   : > { %v6352_v29 = vpack.c.bf16 %v7114_v28, %v7112_v53  ;;  %v5619_v7 = vmul.f32 %v7114_v28, %v7114_v28 }
 0x23b   : > { %v5647_v36 = vadd.f32 %v5646_v34, %v5616_v54  ;;  %v6347_v42 = vpack.c.bf16 %v7115_v22, %v7113_v39  ;;  %v5576_v13 = vadd.f32 %v7115_v22, %v5575_v3  ;;  %v5617_v33 = vmul.f32 %v7115_v22, %v7115_v22 }
 0x23c   : > { %6431 = vst [vmem:[%s7606_s30 + $0x18] sm:$0xff] %v6352_v29  }
 0x23d   : > { %6430 = vst [vmem:[%s7606_s30 + $0x10] sm:$0xff] %v6347_v42   ;;  %v5577_v17 = vadd.f32 %v7112_v53, %v5576_v13  ;;  %v5648_v50 = vadd.f32 %v5647_v36, %v5617_v33  ;;  %v7070_v38 = vpop.f32.mrb[8].mxu0 }
 0x23e   : > { %v7116_v37 = vadd.f32 %v7070_v38, %v6830_v18  ;;  %v5284_v60 = vpop.f32.mrb[9].mxu0 }
 0x23f   : > { %v5649_v61 = vadd.f32 %v5648_v50, %v5618_v45  ;;  %v7117_v26 = vadd.f32 %v5284_v60, %v2729_v35  ;;  %v5578_v44 = vadd.f32 %v7114_v28, %v5577_v17  ;;  %v7071_v8 = vpop.f32.mrb[10].mxu0 }
 0x240   : > { %v7118_v40 = vadd.f32 %v7071_v8, %v6831_v1  ;;  %v5287_v56 = vpop.f32.mrb[11].mxu0  ;;  %v5622_v18 = vmul.f32 %v7116_v37, %v7116_v37 }
 0x241   : > { %v5579_v23 = vadd.f32 %v7117_v26, %v5578_v44  ;;  %v5620_v0 = vmul.f32 %v7117_v26, %v7117_v26  ;;  %v5650_v27 = vadd.f32 %v5649_v61, %v5619_v7  ;;  %v7119_v59 = vadd.f32 %v5287_v56, %v2732_v43 }
 0x242   : > { %v6362_v10 = vpack.c.bf16 %v7118_v40, %v7116_v37  ;;  %v5623_v1 = vmul.f32 %v7118_v40, %v7118_v40 }
 0x243   : > { %v5651_v21 = vadd.f32 %v5650_v27, %v5620_v0  ;;  %v6357_v14 = vpack.c.bf16 %v7119_v59, %v7117_v26  ;;  %v5580_v57 = vadd.f32 %v7119_v59, %v5579_v23  ;;  %v5621_v58 = vmul.f32 %v7119_v59, %v7119_v59 }
 0x244   : > { %6433 = vst [vmem:[%s7606_s30 + $0x28] sm:$0xff] %v6362_v10  }
 0x245   : > { %6432 = vst [vmem:[%s7606_s30 + $0x20] sm:$0xff] %v6357_v14   ;;  %v5581_v2 = vadd.f32 %v7116_v37, %v5580_v57  ;;  %v5652_v24 = vadd.f32 %v5651_v21, %v5621_v58  ;;  %v7074_v35 = vpop.f32.mrb[12].mxu0 }
 0x246   : > { %v7120_v63 = vadd.f32 %v7074_v35, %v8997_v5  ;;  %v5300_v62 = vpop.f32.mrb[13].mxu0 }
 0x247   : > { %v5653_v46 = vadd.f32 %v5652_v24, %v5622_v18  ;;  %v7121_v51 = vadd.f32 %v5300_v62, %v8999_v11  ;;  %v5582_v52 = vadd.f32 %v7118_v40, %v5581_v2  ;;  %v7075_v43 = vpop.f32.mrb[14].mxu0 }
 0x248   : > { %v7122_v31 = vadd.f32 %v7075_v43, %v9001_v41  ;;  %v5303_v6 = vpop.f32.mrb[15].mxu0  ;;  %v5626_v39 = vmul.f32 %v7120_v63, %v7120_v63 }
 0x249   : > { %v5583_v4 = vadd.f32 %v7121_v51, %v5582_v52  ;;  %v5624_v30 = vmul.f32 %v7121_v51, %v7121_v51  ;;  %v5654_v19 = vadd.f32 %v5653_v46, %v5623_v1  ;;  %v7123_v15 = vadd.f32 %v5303_v6, %v9003_v9  ;;  %v6886_v49 = vpop.f32.mrb[16].mxu1 }
 0x24a   : > { %v6372_v25 = vpack.c.bf16 %v7122_v31, %v7120_v63  ;;  %v3147_v5 = vpop.f32.mrb[17].mxu1  ;;  %v5627_v3 = vmul.f32 %v7122_v31, %v7122_v31 }
 0x24b   : > { %v5655_v55 = vadd.f32 %v5654_v19, %v5624_v30  ;;  %v6367_v53 = vpack.c.bf16 %v7123_v15, %v7121_v51  ;;  %v5584_v16 = vadd.f32 %v7123_v15, %v5583_v4  ;;  %v5625_v12 = vmul.f32 %v7123_v15, %v7123_v15  ;;  %v6887_v11 = vpop.f32.mrb[18].mxu1 }
 0x24c   : > { %6435 = vst [vmem:[%s7606_s30 + $0x38] sm:$0xff] %v6372_v25   ;;  %v3150_v20 = vpop.f32.mrb[19].mxu1 }
 0x24d   : > { %6434 = vst [vmem:[%s7606_s30 + $0x30] sm:$0xff] %v6367_v53   ;;  %v5585_v41 = vadd.f32 %v7120_v63, %v5584_v16  ;;  %v5656_v48 = vadd.f32 %v5655_v55, %v5625_v12  ;;  %v7078_v47 = vpop.f32.mrb[16].mxu0 }
 0x24e   : > { %v7124_v28 = vadd.f32 %v7078_v47, %v6886_v49  ;;  %v5316_v32 = vpop.f32.mrb[17].mxu0 }
 0x24f   : > { %v5657_v54 = vadd.f32 %v5656_v48, %v5626_v39  ;;  %v7125_v9 = vadd.f32 %v5316_v32, %v3147_v5  ;;  %v5586_v34 = vadd.f32 %v7122_v31, %v5585_v41  ;;  %v7079_v22 = vpop.f32.mrb[18].mxu0 }
 0x250   : > { %v7126_v29 = vadd.f32 %v7079_v22, %v6887_v11  ;;  %v5319_v36 = vpop.f32.mrb[19].mxu0  ;;  %v5630_v8 = vmul.f32 %v7124_v28, %v7124_v28 }
 0x251   : > { %v5587_v42 = vadd.f32 %v7125_v9, %v5586_v34  ;;  %v5628_v13 = vmul.f32 %v7125_v9, %v7125_v9  ;;  %v5658_v33 = vadd.f32 %v5657_v54, %v5627_v3  ;;  %v7127_v45 = vadd.f32 %v5319_v36, %v3150_v20  ;;  %v6890_v17 = vpop.f32.mrb[20].mxu1 }
 0x252   : > { %v6382_v50 = vpack.c.bf16 %v7126_v29, %v7124_v28  ;;  %v3163_v38 = vpop.f32.mrb[21].mxu1  ;;  %v5631_v59 = vmul.f32 %v7126_v29, %v7126_v29 }
 0x253   : > { %v5659_v37 = vadd.f32 %v5658_v33, %v5628_v13  ;;  %v6377_v60 = vpack.c.bf16 %v7127_v45, %v7125_v9  ;;  %v5588_v7 = vadd.f32 %v7127_v45, %v5587_v42  ;;  %v5629_v61 = vmul.f32 %v7127_v45, %v7127_v45  ;;  %v6891_v26 = vpop.f32.mrb[22].mxu1 }
 0x254   : > { %6437 = vst [vmem:[%s7606_s30 + $0x48] sm:$0xff] %v6382_v50   ;;  %v3166_v44 = vpop.f32.mrb[23].mxu1 }
 0x255   : > { %6436 = vst [vmem:[%s7606_s30 + $0x40] sm:$0xff] %v6377_v60   ;;  %v5589_v40 = vadd.f32 %v7124_v28, %v5588_v7  ;;  %v5660_v56 = vadd.f32 %v5659_v37, %v5629_v61  ;;  %v7082_v23 = vpop.f32.mrb[20].mxu0 }
 0x256   : > { %v7128_v0 = vadd.f32 %v7082_v23, %v6890_v17  ;;  %v5332_v27 = vpop.f32.mrb[21].mxu0 }
 0x257   : > { %v5661_v10 = vadd.f32 %v5660_v56, %v5630_v8  ;;  %v7129_v21 = vadd.f32 %v5332_v27, %v3163_v38  ;;  %v5590_v14 = vadd.f32 %v7126_v29, %v5589_v40  ;;  %v7083_v57 = vpop.f32.mrb[22].mxu0 }
 0x258   : > { %v7130_v58 = vadd.f32 %v7083_v57, %v6891_v26  ;;  %v5335_v18 = vpop.f32.mrb[23].mxu0  ;;  %v5634_v30 = vmul.f32 %v7128_v0, %v7128_v0 }
 0x259   : > { %v5591_v2 = vadd.f32 %v7129_v21, %v5590_v14  ;;  %v5632_v24 = vmul.f32 %v7129_v21, %v7129_v21  ;;  %v5662_v35 = vadd.f32 %v5661_v10, %v5631_v59  ;;  %v7131_v63 = vadd.f32 %v5335_v18, %v3166_v44  ;;  %v6894_v62 = vpop.f32.mrb[24].mxu1 }
 0x25a   : > { %v6392_v1 = vpack.c.bf16 %v7130_v58, %v7128_v0  ;;  %v3179_v46 = vpop.f32.mrb[25].mxu1  ;;  %v5635_v55 = vmul.f32 %v7130_v58, %v7130_v58 }
 0x25b   : > { %v5663_v51 = vadd.f32 %v5662_v35, %v5632_v24  ;;  %v6387_v52 = vpack.c.bf16 %v7131_v63, %v7129_v21  ;;  %v5592_v43 = vadd.f32 %v7131_v63, %v5591_v2  ;;  %v5633_v31 = vmul.f32 %v7131_v63, %v7131_v63  ;;  %v6895_v6 = vpop.f32.mrb[26].mxu1 }
 0x25c   : > { %6439 = vst [vmem:[%s7606_s30 + $0x58] sm:$0xff] %v6392_v1   ;;  %v3182_v4 = vpop.f32.mrb[27].mxu1 }
 0x25d   : > { %6438 = vst [vmem:[%s7606_s30 + $0x50] sm:$0xff] %v6387_v52   ;;  %v5593_v19 = vadd.f32 %v7128_v0, %v5592_v43  ;;  %v5664_v15 = vadd.f32 %v5663_v51, %v5633_v31  ;;  %v7086_v49 = vpop.f32.mrb[24].mxu0 }
 0x25e   : > { %v7132_v25 = vadd.f32 %v7086_v49, %v6894_v62  ;;  %v5348_v5 = vpop.f32.mrb[25].mxu0  ;;  %v5611_v49 = vld [vmem:[%s9046_s6] sm:$0x1] }
 0x25f   : > { %v5665_v53 = vadd.f32 %v5664_v15, %v5634_v30  ;;  %v7133_v16 = vadd.f32 %v5348_v5, %v3179_v46  ;;  %v5594_v12 = vadd.f32 %v7130_v58, %v5593_v19  ;;  %v7087_v11 = vpop.f32.mrb[26].mxu0  ;;  %v5571_v30 = vld [vmem:[%s9045_s5] sm:$0x1] }
 0x260   : > { %v7134_v20 = vadd.f32 %v7087_v11, %v6895_v6  ;;  %v5351_v39 = vpop.f32.mrb[27].mxu0  ;;  %v5638_v13 = vmul.f32 %v7132_v25, %v7132_v25 }
 0x261   : > { %v5595_v41 = vadd.f32 %v7133_v16, %v5594_v12  ;;  %v5636_v48 = vmul.f32 %v7133_v16, %v7133_v16  ;;  %v5666_v47 = vadd.f32 %v5665_v53, %v5635_v55  ;;  %v7135_v28 = vadd.f32 %v5351_v39, %v3182_v4  ;;  %v6898_v32 = vpop.f32.mrb[28].mxu1 }
 0x262   : > { %v6402_v3 = vpack.c.bf16 %v7134_v20, %v7132_v25  ;;  %v3195_v54 = vpop.f32.mrb[29].mxu1  ;;  %v5639_v37 = vmul.f32 %v7134_v20, %v7134_v20 }
 0x263   : > { %v5667_v9 = vadd.f32 %v5666_v47, %v5636_v48  ;;  %v6397_v34 = vpack.c.bf16 %v7135_v28, %v7133_v16  ;;  %v5596_v22 = vadd.f32 %v7135_v28, %v5595_v41  ;;  %v5637_v29 = vmul.f32 %v7135_v28, %v7135_v28  ;;  %v6899_v36 = vpop.f32.mrb[30].mxu1 }
 0x264   : > { %6441 = vst [vmem:[%s7606_s30 + $0x68] sm:$0xff] %v6402_v3   ;;  %v3198_v42 = vpop.f32.mrb[31].mxu1 }
 0x265   : > { %6440 = vst [vmem:[%s7606_s30 + $0x60] sm:$0xff] %v6397_v34   ;;  %v5597_v33 = vadd.f32 %v7132_v25, %v5596_v22  ;;  %v5668_v45 = vadd.f32 %v5667_v9, %v5637_v29  ;;  %v7090_v17 = vpop.f32.mrb[28].mxu0 }
 0x266   : > { %v7136_v50 = vadd.f32 %v7090_v17, %v6898_v32  ;;  %v5364_v38 = vpop.f32.mrb[29].mxu0 }
 0x267   : > { %v5669_v60 = vadd.f32 %v5668_v45, %v5638_v13  ;;  %v7137_v7 = vadd.f32 %v5364_v38, %v3195_v54  ;;  %v5598_v61 = vadd.f32 %v7134_v20, %v5597_v33  ;;  %v7091_v26 = vpop.f32.mrb[30].mxu0 }
 0x268   : > { %v7138_v44 = vadd.f32 %v7091_v26, %v6899_v36  ;;  %v5367_v8 = vpop.f32.mrb[31].mxu0  ;;  %v5642_v57 = vmul.f32 %v7136_v50, %v7136_v50 }
 0x269   : > { %v5599_v40 = vadd.f32 %v7137_v7, %v5598_v61  ;;  %v5640_v56 = vmul.f32 %v7137_v7, %v7137_v7  ;;  %v5670_v23 = vadd.f32 %v5669_v60, %v5639_v37  ;;  %v7139_v0 = vadd.f32 %v5367_v8, %v3198_v42 }
 0x26a   : > { %v6412_v27 = vpack.c.bf16 %v7138_v44, %v7136_v50  ;;  %v5643_v2 = vmul.f32 %v7138_v44, %v7138_v44 }
 0x26b   : > { %v5671_v59 = vadd.f32 %v5670_v23, %v5640_v56  ;;  %v6407_v10 = vpack.c.bf16 %v7139_v0, %v7137_v7  ;;  %v5600_v21 = vadd.f32 %v7139_v0, %v5599_v40  ;;  %v5641_v14 = vmul.f32 %v7139_v0, %v7139_v0 }
 0x26c   : > { %6443 = vst [vmem:[%s7606_s30 + $0x78] sm:$0xff] %v6412_v27  }
 0x26d   : > { %6442 = vst [vmem:[%s7606_s30 + $0x70] sm:$0xff] %v6407_v10   ;;  %v5601_v58 = vadd.f32 %v7136_v50, %v5600_v21  ;;  %v5672_v18 = vadd.f32 %v5671_v59, %v5641_v14 }
 0x26f   : > { %v5602_v24 = vadd.f32 %v7138_v44, %v5601_v58  ;;  %v5673_v35 = vadd.f32 %v5672_v18, %v5642_v57 }
 0x271   : > { %v5603_v63 = vrot.slane %v5602_v24, 4  ;;  %v5674_v62 = vadd.f32 %v5673_v35, %v5643_v2 }
 0x273   : > { %v5604_v1 = vadd.f32 %v5603_v63, %v5602_v24  ;;  %v5675_v46 = vrot.slane %v5674_v62, 4 }
 0x275   : > { %v5605_v51 = vrot.slane %v5604_v1, 2  ;;  %v5676_v52 = vadd.f32 %v5675_v46, %v5674_v62 }
 0x277   : > { %v5606_v43 = vadd.f32 %v5605_v51, %v5604_v1  ;;  %v5677_v31 = vrot.slane %v5676_v52, 2 }
 0x279   : > { %v5607_v6 = vrot.slane %v5606_v43, 1  ;;  %v5678_v4 = vadd.f32 %v5677_v31, %v5676_v52 }
 0x27b   : > { %v5608_v19 = vadd.f32 %v5607_v6, %v5606_v43  ;;  %v5679_v15 = vrot.slane %v5678_v4, 1 }
 0x27d   : > { %v5609_v25 = vadd.f32 %v5608_v19, %v5571_v30  ;;  %v5680_v5 = vadd.f32 %v5679_v15, %v5678_v4 }
 0x27f   : > { %5610 = vst [vmem:[%s9045_s5] sm:$0x1] %v5609_v25  ;;  %v5681_v55 = vadd.f32 %v5680_v5, %v5611_v49 }
 0x281   : > { %5682 = vst [vmem:[%s9046_s6] sm:$0x1] %v5681_v55 }
 0x282 PF: > { %s17_s21 = sadd.s32 1, %s7551_s21  }
 0x283   : > { %p14_p5 = scmp.ge.s32.totalorder %s17_s21, 4  }
 0x285   :  { %16 = sbr.rel (!%p14_p5) target bundleno = 1 (0x1), region = 96 }

</bundles_post_ra>
